<compile_context>
chip_gen: v5e
topology: v5e:2x2
jax: 0.10.0
libtpu: 0.0.40
codegen_flags: <defaults>
</compile_context>

<pallas_src>
import jax
import jax.numpy as jnp
from jax.experimental import pallas as pl
from jax.experimental.pallas import tpu as pltpu


# ---------------------------------------------------------------------------
# generation / tiling helpers
# ---------------------------------------------------------------------------
def _tpu_generation() -> int:
    """Best-effort TPU generation from device_kind; defaults to 6."""
    try:
        kind = jax.devices()[0].device_kind.lower()
    except Exception:
        return 6
    if "v7" in kind or "7x" in kind:
        return 7
    for g in (6, 5, 4, 3, 2):
        if f"v{g}" in kind:
            return g
    return 6


def _pick_tile(dim, target, quantum):
    """Largest t <= target with t % quantum == 0 and dim % t == 0, else dim."""
    if dim <= target:
        return dim
    t = (min(target, dim) // quantum) * quantum
    while t >= quantum:
        if dim % t == 0:
            return t
        t -= quantum
    return dim  # no aligned divisor -> full dim (correct, but masked stores)


def _lattice_vmem_bytes(tT, tV, U, J, D_enc, in_b, act_b, out_b):
    """Estimated VMEM footprint of one lattice grid step (double-buffered)."""
    per_step = (
        tT * D_enc * in_b              # h_enc tile
        + D_enc * J * 4 + J * 4        # w_enc + b_enc (resident, but buffered)
        + U * J * act_b                # dec_p tile
        + J * tV * 2 + tV * 4          # w_out (bf16) + b_out tiles
        + tT * U * tV * out_b          # output tile
    )
    # in-kernel live intermediates (not pipelined): z, z2(bf16), one out chunk
    live = tT * U * J * (act_b + 2) + tT * U * min(tV, 512) * 4
    return 2 * per_step + live


def _choose_tiles(T, U, V, J, D_enc, in_b, act_b, out_b, budget, row_target=1024):
    # Vocab-tile candidates: full V first (constant w_out block index -> single
    # DMA per (b, vi)), then progressively smaller 128-aligned divisors.
    tv_cands = [V]
    for t in (4096, 2048, 1024, 512, 256, 128):
        if t < V and V % t == 0:
            tv_cands.append(t)
    # T-tile candidates: largest 8-aligned divisor giving ~row_target rows,
    # then smaller divisors.
    tt_cands = []
    t = _pick_tile(T, max(8, row_target // max(U, 1)), 8)
    while t not in tt_cands:
        tt_cands.append(t)
        if t <= 8:
            break
        t = _pick_tile(T, max(8, t // 2), 8)
    for tV in tv_cands:           # prefer the biggest vocab tile (mem-bound)
        for tT in tt_cands:       # then the biggest T tile that still fits
            if _lattice_vmem_bytes(tT, tV, U, J, D_enc, in_b, act_b, out_b) <= budget:
                return tT, tV
    return tt_cands[-1], tv_cands[-1]


# ---------------------------------------------------------------------------
# projection kernel (hoisted lin_dec):  y = x @ w + b
# ---------------------------------------------------------------------------
def _proj_kernel(x_ref, w_ref, b_ref, o_ref):
    o_ref[...] = (
        jnp.dot(x_ref[...], w_ref[...], preferred_element_type=jnp.float32)
        + b_ref[...]
    ).astype(o_ref.dtype)


def _linear(x2d, w, b, *, out_dtype=jnp.float32):
    rows, d = x2d.shape
    j = w.shape[1]
    tm = _pick_tile(rows, 256, 8)
    return pl.pallas_call(
        _proj_kernel,
        out_shape=jax.ShapeDtypeStruct((rows, j), out_dtype),
        grid_spec=pltpu.PrefetchScalarGridSpec(
            num_scalar_prefetch=0,
            grid=(pl.cdiv(rows, tm),),
            in_specs=[
                pl.BlockSpec((tm, d), lambda i: (i, 0)),
                pl.BlockSpec((d, j), lambda i: (0, 0)),
                pl.BlockSpec((1, j), lambda i: (0, 0)),
            ],
            out_specs=pl.BlockSpec((tm, j), lambda i: (i, 0)),
        ),
        compiler_params=pltpu.CompilerParams(
            dimension_semantics=("parallel",),
        ),
    )(x2d, w, b.reshape(1, j))


# ---------------------------------------------------------------------------
# joint-lattice kernel:
#   fused lin_enc + broadcast-add + tanh + chunked lin_out on one
#   (b, T-tile, V-tile) of the lattice.
# ---------------------------------------------------------------------------
def _joint_lattice_kernel(henc_ref, wenc_ref, benc_ref, dec_ref,
                          wout_ref, bout_ref, out_ref):
    """henc_ref: (1, tT, D_enc)     wenc_ref: (D_enc, J) f32  benc_ref: (1, J) f32
       dec_ref : (1, U, J) act      wout_ref: (J, tV) bf16    bout_ref: (1, tV) f32
       out_ref : (1, tT*U, tV)"""
    tT = henc_ref.shape[1]
    U, J = dec_ref.shape[1], dec_ref.shape[2]
    tV = wout_ref.shape[1]
    act_dtype = dec_ref.dtype

    # Fused lin_enc for this T-tile (tiny vs lin_out; f32 accumulation).
    enc = (
        jnp.dot(henc_ref[0], wenc_ref[...], preferred_element_type=jnp.float32)
        + benc_ref[...]
    ).astype(act_dtype)                                   # (tT, J)
    dec = dec_ref[0]                                      # (U, J)

    # Broadcast-add over the (tT, U) sub-lattice + tanh.
    # act_dtype is bf16 on v6e/v7x (bf16 VPU/EUP), f32 on v5e.
    z = jnp.tanh(enc[:, None, :] + dec[None, :, :])       # (tT, U, J)
    z2 = z.reshape(tT * U, J).astype(jnp.bfloat16)        # MXU operand

    # lin_out in 512-column chunks: bounds the live f32 slab and streams
    # lane-aligned, unmasked stores (chunk starts are multiples of 128).
    V_CHUNK = 512
    for lo in range(0, tV, V_CHUNK):
        hi = min(tV, lo + V_CHUNK)
        oc = jnp.dot(z2, wout_ref[:, lo:hi], preferred_element_type=jnp.float32)
        oc = oc + bout_ref[:, lo:hi]                      # (tT*U, chunk) f32
        out_ref[0, :, lo:hi] = oc.astype(out_ref.dtype)


# ---------------------------------------------------------------------------
# wrapper
# ---------------------------------------------------------------------------
def prepare_joint_params(params):
    """Pre-cast the largest weight to bf16 once (outside the hot path)."""
    p = dict(params)
    p["w_out_bf16"] = params["w_out"].astype(jnp.bfloat16)
    return p


def joint_network_forward(h_enc, h_dec, params, *, out_dtype=None):
    """h_enc: (B, T, 1, D_enc), h_dec: (B, 1, U, D_dec) -> (B, T, U, V)."""
    w_enc, b_enc, w_dec, w_out, b_out = (
        params["w_enc"], params["b_enc"], params["w_dec"],
        params["w_out"], params["b_out"],
    )
    B, T, _, D_enc = h_enc.shape
    _, _, U, D_dec = h_dec.shape
    J = w_enc.shape[1]
    V = w_out.shape[1]
    # bf16 output (if the downstream log-softmax / RNN-T loss tolerates it)
    # halves the dominant HBM write; default keeps module semantics (f32).
    out_dtype = h_enc.dtype if out_dtype is None else out_dtype

    gen = _tpu_generation()
    act_dtype = jnp.bfloat16 if gen >= 6 else jnp.float32   # v5e: no bf16 VPU/EUP
    budget = (40 if gen >= 7 else (96 if gen >= 5 else 16)) << 20

    w_out_bf16 = params.get("w_out_bf16")
    if w_out_bf16 is None:
        # TODO(synk): call prepare_joint_params() once at init to avoid this
        # per-call f32->bf16 cast (extra HBM read+write of the full weight).
        w_out_bf16 = w_out.astype(jnp.bfloat16)

    in_b = jnp.dtype(h_enc.dtype).itemsize
    act_b = jnp.dtype(act_dtype).itemsize
    out_b = jnp.dtype(out_dtype).itemsize

    tT, tV = _choose_tiles(T, U, V, J, D_enc, in_b, act_b, out_b, budget)
    nT, nV = T // tT, V // tV
    # NOTE: if V is not a multiple of 128 we fall back to tV=V (correct, but
    # stores become masked and the lane-dense advantage is lost).

    # v7x has 2 TensorCores: keep >= 2 steps on the (all-parallel) grid.
    if gen >= 7 and B * nV * nT < 2:
        if tV % 256 == 0:
            tV //= 2
        elif tT % 16 == 0:
            tT //= 2
        nT, nV = T // tT, V // tV

    # --- hoisted lin_dec projection (no bias), emitted directly in act dtype
    dec_p = _linear(
        h_dec.reshape(B * U, D_dec), w_dec, jnp.zeros((J,), jnp.float32),
        out_dtype=act_dtype,
    ).reshape(B, U, J)

    h_enc3 = h_enc.reshape(B, T, D_enc)
    b_enc2 = b_enc.reshape(1, J).astype(jnp.float32)
    b_out2 = b_out.reshape(1, V).astype(jnp.float32)

    est = _lattice_vmem_bytes(tT, tV, U, J, D_enc, in_b, act_b, out_b)
    vmem_limit = int(min(budget, max(32 << 20, est * 3 // 2)))

    cost = pl.CostEstimate(
        flops=2 * B * T * U * J * V + 2 * B * T * D_enc * J * nV,
        transcendentals=B * T * U * J,
        bytes_accessed=(
            h_enc3.size * in_b * nV            # h_enc re-fetched per vocab tile
            + dec_p.size * act_b               # fetched once per batch element
            + (w_enc.size + b_enc.size + b_out.size) * 4
            + w_out_bf16.size * 2 * B * nV     # held across the inner T axis
            + B * T * U * V * out_b
        ),
    )

    out2d = pl.pallas_call(
        _joint_lattice_kernel,
        out_shape=jax.ShapeDtypeStruct((B, T * U, V), out_dtype),
        grid_spec=pltpu.PrefetchScalarGridSpec(
            num_scalar_prefetch=0,
            # T innermost: the w_out tile (largest tensor) is held across it.
            grid=(B, nV, nT),
            in_specs=[
                pl.BlockSpec((1, tT, D_enc), lambda b, vi, ti: (b, ti, 0)),
                pl.BlockSpec((D_enc, J),     lambda b, vi, ti: (0, 0)),
                pl.BlockSpec((1, J),         lambda b, vi, ti: (0, 0)),
                pl.BlockSpec((1, U, J),      lambda b, vi, ti: (b, 0, 0)),
                pl.BlockSpec((J, tV),        lambda b, vi, ti: (0, vi)),
                pl.BlockSpec((1, tV),        lambda b, vi, ti: (0, vi)),
            ],
            # lane-dense 2D output slab -> unmasked, full-lane stores
            out_specs=pl.BlockSpec((1, tT * U, tV), lambda b, vi, ti: (b, ti, vi)),
        ),
        compiler_params=pltpu.CompilerParams(
            dimension_semantics=("parallel", "parallel", "parallel"),
            vmem_limit_bytes=vmem_limit,
        ),
        cost_estimate=cost,
    )(h_enc3, w_enc, b_enc2, dec_p, w_out_bf16, b_out2)

    return out2d.reshape(B, T, U, V)


# ---------------------------------------------------------------------------
# pure-JAX reference (mirrors the PyTorch module, tanh activation, is_aux=False)
# ---------------------------------------------------------------------------
def reference_forward(h_enc, h_dec, params):
    enc_p = jnp.einsum("btod,dj->btoj", h_enc, params["w_enc"]) + params["b_enc"]
    dec_p = jnp.einsum("boud,dj->bouj", h_dec, params["w_dec"])
    z = jnp.tanh(enc_p + dec_p)                                   # (B, T, U, J)
    return jnp.einsum("btuj,jv->btuv", z, params["w_out"]) + params["b_out"]


def init_params(key, d_enc, d_dec, joint_space, vocab):
    ks = jax.random.split(key, 5)

    # deterministic, Linear-like uniform init; stored as (in, out) == PyTorch W^T
    def u(k, shape, fan_in):
        lim = 1.0 / jnp.sqrt(fan_in)
        return jax.random.uniform(k, shape, jnp.float32, -lim, lim)

    return {
        "w_enc": u(ks[0], (d_enc, joint_space), d_enc),
        "b_enc": u(ks[1], (joint_space,), d_enc),
        "w_dec": u(ks[2], (d_dec, joint_space), d_dec),   # lin_dec has no bias
        "w_out": u(ks[3], (joint_space, vocab), joint_space),
        "b_out": u(ks[4], (vocab,), joint_space),
    }


if __name__ == "__main__":
    B, T, U = 2, 64, 8
    D_ENC, D_DEC, JOINT, VOCAB = 96, 64, 128, 1024

    key = jax.random.PRNGKey(0)
    k_enc, k_dec, k_par = jax.random.split(key, 3)

    h_enc = jax.random.normal(k_enc, (B, T, 1, D_ENC), jnp.float32)
    h_dec = jax.random.normal(k_dec, (B, 1, U, D_DEC), jnp.float32)
    params = prepare_joint_params(init_params(k_par, D_ENC, D_DEC, JOINT, VOCAB))

    fwd = jax.jit(joint_network_forward)
    out = jax.block_until_ready(fwd(h_enc, h_dec, params))

    ref = reference_forward(h_enc, h_dec, params)
    assert out.shape == (B, T, U, VOCAB)
    # lin_out runs with bf16 operands (+ bf16 add/tanh on v6e/v7x) and f32
    # accumulation -> tolerance widened accordingly vs the f32 reference.
    assert jnp.allclose(out, ref, atol=7.5e-2, rtol=5e-2), "mismatch vs reference"

    print("KERNEL_OK")
</pallas_src>

<mosaic_0001>
module attributes {stable_mosaic.version = 11 : i64} {
  func.func @_proj_kernel(%arg0: i32, %arg1: memref<16x64xf32, #tpu.memory_space<vmem>>, %arg2: memref<64x128xf32, #tpu.memory_space<vmem>>, %arg3: memref<1x128xf32, #tpu.memory_space<vmem>>, %arg4: memref<16x128xbf16, #tpu.memory_space<vmem>>) attributes {dimension_semantics = [#tpu.dimension_semantics<parallel>], iteration_bounds = array<i64: 1>, scalar_prefetch = 0 : i64, scratch_operands = 0 : i64, tpu.core_type = #tpu.core_type<tc>, window_params = [{transform_indices = @transform_0, window_bounds = array<i64: 16, 64>}, {pipeline_mode = #tpu.pipeline_mode<synchronous>, transform_indices = @transform_1, window_bounds = array<i64: 64, 128>}, {pipeline_mode = #tpu.pipeline_mode<synchronous>, transform_indices = @transform_2, window_bounds = array<i64: 1, 128>}, {transform_indices = @transform_3, window_bounds = array<i64: 16, 128>}]} {
    %c0 = arith.constant 0 : index
    %c0_0 = arith.constant 0 : index
    %0 = vector.load %arg1[%c0, %c0_0] : memref<16x64xf32, #tpu.memory_space<vmem>>, vector<16x64xf32>
    %c0_1 = arith.constant 0 : index
    %c0_2 = arith.constant 0 : index
    %1 = vector.load %arg2[%c0_1, %c0_2] : memref<64x128xf32, #tpu.memory_space<vmem>>, vector<64x128xf32>
    %cst = arith.constant dense<0.000000e+00> : vector<16x128xf32>
    %2 = tpu.matmul %0, %1, %cst {dimension_numbers = #tpu.dot_dimension_numbers<[1], [0], [0], [1], [0, 0, 1, 1], [], []>} : vector<16x64xf32>, vector<64x128xf32>, vector<16x128xf32> -> vector<16x128xf32>
    %c0_3 = arith.constant 0 : index
    %c0_4 = arith.constant 0 : index
    %3 = vector.load %arg3[%c0_3, %c0_4] : memref<1x128xf32, #tpu.memory_space<vmem>>, vector<1x128xf32>
    %4 = vector.broadcast %3 : vector<1x128xf32> to vector<16x128xf32>
    %5 = arith.addf %2, %4 : vector<16x128xf32>
    %6 = arith.truncf %5 : vector<16x128xf32> to vector<16x128xbf16>
    %c0_5 = arith.constant 0 : index
    %c0_6 = arith.constant 0 : index
    %7 = vector.load %arg4[%c0_5, %c0_6] : memref<16x128xbf16, #tpu.memory_space<vmem>>, vector<16x128xbf16>
    tpu.vector_store %arg4[%c0_5, %c0_6], %6 {strides = array<i32>} : memref<16x128xbf16, #tpu.memory_space<vmem>>, vector<16x128xbf16>,
    return
  }
  func.func @transform_0(%arg0: i32) -> (i32, i32) {
    %c0_i32 = arith.constant 0 : i32
    %c0_i32_0 = arith.constant 0 : i32
    return %arg0, %c0_i32 : i32, i32
  }
  func.func @transform_1(%arg0: i32) -> (i32, i32) {
    %c0_i32 = arith.constant 0 : i32
    %c0_i32_0 = arith.constant 0 : i32
    %c0_i32_1 = arith.constant 0 : i32
    return %c0_i32, %c0_i32_0 : i32, i32
  }
  func.func @transform_2(%arg0: i32) -> (i32, i32) {
    %c0_i32 = arith.constant 0 : i32
    %c0_i32_0 = arith.constant 0 : i32
    %c0_i32_1 = arith.constant 0 : i32
    return %c0_i32, %c0_i32_0 : i32, i32
  }
  func.func @transform_3(%arg0: i32) -> (i32, i32) {
    %c0_i32 = arith.constant 0 : i32
    %c0_i32_0 = arith.constant 0 : i32
    return %arg0, %c0_i32 : i32, i32
  }
}

module attributes {stable_mosaic.version = 11 : i64} {
  func.func @_joint_lattice_kernel(%arg0: i32, %arg1: i32, %arg2: i32, %arg3: memref<1x64x96xf32, #tpu.memory_space<vmem>>, %arg4: memref<96x128xf32, #tpu.memory_space<vmem>>, %arg5: memref<1x128xf32, #tpu.memory_space<vmem>>, %arg6: memref<1x8x128xbf16, #tpu.memory_space<vmem>>, %arg7: memref<128x1024xbf16, #tpu.memory_space<vmem>>, %arg8: memref<1x1024xf32, #tpu.memory_space<vmem>>, %arg9: memref<1x512x1024xf32, #tpu.memory_space<vmem>>) attributes {dimension_semantics = [#tpu.dimension_semantics<parallel>, #tpu.dimension_semantics<parallel>, #tpu.dimension_semantics<parallel>], iteration_bounds = array<i64: 2, 1, 1>, scalar_prefetch = 0 : i64, scratch_operands = 0 : i64, tpu.core_type = #tpu.core_type<tc>, window_params = [{transform_indices = @transform_0, window_bounds = array<i64: 1, 64, 96>}, {pipeline_mode = #tpu.pipeline_mode<synchronous>, transform_indices = @transform_1, window_bounds = array<i64: 96, 128>}, {pipeline_mode = #tpu.pipeline_mode<synchronous>, transform_indices = @transform_2, window_bounds = array<i64: 1, 128>}, {transform_indices = @transform_3, window_bounds = array<i64: 1, 8, 128>}, {transform_indices = @transform_4, window_bounds = array<i64: 128, 1024>}, {transform_indices = @transform_5, window_bounds = array<i64: 1, 1024>}, {transform_indices = @transform_6, window_bounds = array<i64: 1, 512, 1024>}]} {
    %c0 = arith.constant 0 : index
    %c0_0 = arith.constant 0 : index
    %c0_1 = arith.constant 0 : index
    %0 = vector.load %arg3[%c0, %c0_0, %c0_1] : memref<1x64x96xf32, #tpu.memory_space<vmem>>, vector<1x64x96xf32>
    %1 = vector.shape_cast %0 : vector<1x64x96xf32> to vector<64x96xf32>
    %c0_2 = arith.constant 0 : index
    %c0_3 = arith.constant 0 : index
    %2 = vector.load %arg4[%c0_2, %c0_3] : memref<96x128xf32, #tpu.memory_space<vmem>>, vector<96x128xf32>
    %cst = arith.constant dense<0.000000e+00> : vector<64x128xf32>
    %3 = tpu.matmul %1, %2, %cst {dimension_numbers = #tpu.dot_dimension_numbers<[1], [0], [0], [1], [0, 0, 1, 1], [], []>} : vector<64x96xf32>, vector<96x128xf32>, vector<64x128xf32> -> vector<64x128xf32>
    %c0_4 = arith.constant 0 : index
    %c0_5 = arith.constant 0 : index
    %4 = vector.load %arg5[%c0_4, %c0_5] : memref<1x128xf32, #tpu.memory_space<vmem>>, vector<1x128xf32>
    %5 = vector.broadcast %4 : vector<1x128xf32> to vector<64x128xf32>
    %6 = arith.addf %3, %5 : vector<64x128xf32>
    %7 = arith.truncf %6 : vector<64x128xf32> to vector<64x128xbf16>
    %c0_6 = arith.constant 0 : index
    %c0_7 = arith.constant 0 : index
    %c0_8 = arith.constant 0 : index
    %8 = vector.load %arg6[%c0_6, %c0_7, %c0_8] : memref<1x8x128xbf16, #tpu.memory_space<vmem>>, vector<1x8x128xbf16>
    %9 = vector.shape_cast %8 : vector<1x8x128xbf16> to vector<8x128xbf16>
    %10 = vector.shape_cast %7 : vector<64x128xbf16> to vector<64x1x128xbf16>
    %11 = vector.shape_cast %9 : vector<8x128xbf16> to vector<1x8x128xbf16>
    %12 = vector.broadcast %10 : vector<64x1x128xbf16> to vector<64x8x128xbf16>
    %13 = vector.broadcast %11 : vector<1x8x128xbf16> to vector<64x8x128xbf16>
    %14 = arith.addf %12, %13 : vector<64x8x128xbf16>
    %15 = math.tanh %14 : vector<64x8x128xbf16>
    %16 = vector.shape_cast %15 : vector<64x8x128xbf16> to vector<512x128xbf16>
    %c0_9 = arith.constant 0 : index
    %c0_10 = arith.constant 0 : index
    %17 = vector.load %arg7[%c0_9, %c0_10] : memref<128x1024xbf16, #tpu.memory_space<vmem>>, vector<128x512xbf16>
    %cst_11 = arith.constant dense<0.000000e+00> : vector<512x512xf32>
    %18 = tpu.matmul %16, %17, %cst_11 {dimension_numbers = #tpu.dot_dimension_numbers<[1], [0], [0], [1], [0, 0, 1, 1], [], []>} : vector<512x128xbf16>, vector<128x512xbf16>, vector<512x512xf32> -> vector<512x512xf32>
    %c0_12 = arith.constant 0 : index
    %c0_13 = arith.constant 0 : index
    %19 = vector.load %arg8[%c0_12, %c0_13] : memref<1x1024xf32, #tpu.memory_space<vmem>>, vector<1x512xf32>
    %20 = vector.broadcast %19 : vector<1x512xf32> to vector<512x512xf32>
    %21 = arith.addf %18, %20 : vector<512x512xf32>
    %c0_14 = arith.constant 0 : index
    %c0_15 = arith.constant 0 : index
    %c0_16 = arith.constant 0 : index
    %22 = vector.load %arg9[%c0_14, %c0_15, %c0_16] : memref<1x512x1024xf32, #tpu.memory_space<vmem>>, vector<1x512x512xf32>
    %23 = vector.shape_cast %22 : vector<1x512x512xf32> to vector<512x512xf32>
    %24 = vector.shape_cast %21 : vector<512x512xf32> to vector<1x512x512xf32>
    tpu.vector_store %arg9[%c0_14, %c0_15, %c0_16], %24 {strides = array<i32>} : memref<1x512x1024xf32, #tpu.memory_space<vmem>>, vector<1x512x512xf32>,
    %c0_17 = arith.constant 0 : index
    %c512 = arith.constant 512 : index
    %25 = vector.load %arg7[%c0_17, %c512] : memref<128x1024xbf16, #tpu.memory_space<vmem>>, vector<128x512xbf16>
    %cst_18 = arith.constant dense<0.000000e+00> : vector<512x512xf32>
    %26 = tpu.matmul %16, %25, %cst_18 {dimension_numbers = #tpu.dot_dimension_numbers<[1], [0], [0], [1], [0, 0, 1, 1], [], []>} : vector<512x128xbf16>, vector<128x512xbf16>, vector<512x512xf32> -> vector<512x512xf32>
    %c0_19 = arith.constant 0 : index
    %c512_20 = arith.constant 512 : index
    %27 = vector.load %arg8[%c0_19, %c512_20] : memref<1x1024xf32, #tpu.memory_space<vmem>>, vector<1x512xf32>
    %28 = vector.broadcast %27 : vector<1x512xf32> to vector<512x512xf32>
    %29 = arith.addf %26, %28 : vector<512x512xf32>
    %c0_21 = arith.constant 0 : index
    %c0_22 = arith.constant 0 : index
    %c512_23 = arith.constant 512 : index
    %30 = vector.load %arg9[%c0_21, %c0_22, %c512_23] : memref<1x512x1024xf32, #tpu.memory_space<vmem>>, vector<1x512x512xf32>
    %31 = vector.shape_cast %30 : vector<1x512x512xf32> to vector<512x512xf32>
    %32 = vector.shape_cast %29 : vector<512x512xf32> to vector<1x512x512xf32>
    tpu.vector_store %arg9[%c0_21, %c0_22, %c512_23], %32 {strides = array<i32>} : memref<1x512x1024xf32, #tpu.memory_space<vmem>>, vector<1x512x512xf32>,
    return
  }
  func.func @transform_0(%arg0: i32, %arg1: i32, %arg2: i32) -> (i32, i32, i32) {
    %c0_i32 = arith.constant 0 : i32
    %c0_i32_0 = arith.constant 0 : i32
    return %arg0, %arg2, %c0_i32 : i32, i32, i32
  }
  func.func @transform_1(%arg0: i32, %arg1: i32, %arg2: i32) -> (i32, i32) {
    %c0_i32 = arith.constant 0 : i32
    %c0_i32_0 = arith.constant 0 : i32
    %c0_i32_1 = arith.constant 0 : i32
    return %c0_i32, %c0_i32_0 : i32, i32
  }
  func.func @transform_2(%arg0: i32, %arg1: i32, %arg2: i32) -> (i32, i32) {
    %c0_i32 = arith.constant 0 : i32
    %c0_i32_0 = arith.constant 0 : i32
    %c0_i32_1 = arith.constant 0 : i32
    return %c0_i32, %c0_i32_0 : i32, i32
  }
  func.func @transform_3(%arg0: i32, %arg1: i32, %arg2: i32) -> (i32, i32, i32) {
    %c0_i32 = arith.constant 0 : i32
    %c0_i32_0 = arith.constant 0 : i32
    %c0_i32_1 = arith.constant 0 : i32
    return %arg0, %c0_i32, %c0_i32_0 : i32, i32, i32
  }
  func.func @transform_4(%arg0: i32, %arg1: i32, %arg2: i32) -> (i32, i32) {
    %c0_i32 = arith.constant 0 : i32
    %c0_i32_0 = arith.constant 0 : i32
    return %c0_i32, %arg1 : i32, i32
  }
  func.func @transform_5(%arg0: i32, %arg1: i32, %arg2: i32) -> (i32, i32) {
    %c0_i32 = arith.constant 0 : i32
    %c0_i32_0 = arith.constant 0 : i32
    return %c0_i32, %arg1 : i32, i32
  }
  func.func @transform_6(%arg0: i32, %arg1: i32, %arg2: i32) -> (i32, i32, i32) {
    %c0_i32 = arith.constant 0 : i32
    return %arg0, %arg2, %arg1 : i32, i32, i32
  }
}

</mosaic_0001>

<bundles_post_ra>
// kernel: joint_network_forward.2
= control target key start
LH: loop header
LB: loop body
LE: loop exit
PB: predicated region body
PF: predicated region fallthrough
CT: control target
= control target key end

     0   :  { %8 = vsyncpa [#allocation3], 0  ;;  %s208_s0 = inlined_call_operand.hbm [shape: f32[16,64], index: 0, kind: input, shape index: {}]   ;;  %s209_s1 = inlined_call_operand.hbm [shape: f32[64,128], index: 1, kind: input, shape index: {}]   ;;  %s210_s2 = inlined_call_operand.vmem [shape: f32[1,128], index: 2, kind: input, shape index: {}]   ;;  %s211_s3 = inlined_call_operand.vmem [shape: bf16[16,128], index: 3, kind: output, shape index: {}]  }
   0x1   :  { %s14_s14 = sshll.u32 %s208_s0, 4  ;;  %s15_s14 = int_to_ptr.hbm [resolvable:$true] %s14_s14 }
   0x2   :  { %9 = vsyncpa [#allocation5], 0  ;;  %s172_s15 = smov [#allocation2]   ;;  %s27_s19 = sshll.u32 %s209_s1, 4  ;;  %s28_s19 = int_to_ptr.hbm [resolvable:$true] %s27_s19 }
   0x3   :  { %s16_s16 = sshll.u32 %s172_s15, 4  ;;  %s173_s20 = smov 128   ;;  %s17_s16 = int_to_ptr.vmem [resolvable:$true] %s16_s16 }
   0x4   :  { %s174_s21 = smov 8   ;;  %s175_s22 = smov [#allocation4]  }
   0x5   :  { %22 = dma.hbm_to_vmem [thread:$0]  %s15_s14, 256, %s17_s16, [#allocation3], %s173_s20, %s173_s20, %s174_s21  }
   0x6   :  { %s29_s23 = sshll.u32 %s175_s22, 4  ;;  %s30_s23 = int_to_ptr.vmem [resolvable:$true] %s29_s23 }
   0x7   :  { %35 = dma.hbm_to_vmem [thread:$0]  %s28_s19, 1024, %s30_s23, [#allocation5], %s173_s20, %s173_s20, %s174_s21  }
   0x8   :  { %168 = dma.done.wait [#allocation3], 256  }
   0x9   :  { %169 = vsyncadd [#allocation3], 4294967040 }
   0xa   :  { %170 = dma.done.wait [#allocation5], 1024  }
   0xb   :  { %171 = vsyncadd [#allocation5], 4294966272  ;;  %v55_v0 = vld [vmem:[#allocation4 + $0x38] sm:$0xff]  ;;  %v54_v1 = vld [vmem:[#allocation4 + $0x30] sm:$0xff]  ;;  %vm60_vm0 = vcmask 523264  }
   0xc   :  { %75 = vmatpush.msra.mxu0 %v55_v0  ;;  %107 = vmatpush.msra.mxu1 %v55_v0  ;;  %v53_v2 = vld [vmem:[#allocation4 + $0x28] sm:$0xff]  ;;  %v52_v3 = vld [vmem:[#allocation4 + $0x20] sm:$0xff]  ;;  %v51_v4 = vld [vmem:[#allocation4 + $0x18] sm:$0xff] }
   0xd   :  { %v50_v5 = vld [vmem:[#allocation4 + $0x10] sm:$0xff]  ;;  %v49_v6 = vld [vmem:[#allocation4 + $0x8] sm:$0xff]  ;;  %v48_v7 = vld [vmem:[#allocation4] sm:$0xff] }
   0xe   :  { %76 = vmatpush.msra.mxu0 %v54_v1  ;;  %108 = vmatpush.msra.mxu1 %v54_v1  ;;  %v46_v8 = vld [vmem:[#allocation2] sm:$0xff]  ;;  %v47_v9 = vld [vmem:[#allocation2 + $0x8] sm:$0xff] }
   0xf   :  { %v119_v10 = vld [vmem:[%s210_s2] ss:$0 sm:$0xff] }
  0x10   :  { %77 = vmatpush.msra.mxu0 %v53_v2  ;;  %109 = vmatpush.msra.mxu1 %v53_v2 }
  0x12   :  { %78 = vmatpush.msra.mxu0 %v52_v3  ;;  %110 = vmatpush.msra.mxu1 %v52_v3 }
  0x14   :  { %79 = vmatpush.msra.mxu0 %v51_v4  ;;  %111 = vmatpush.msra.mxu1 %v51_v4 }
  0x16   :  { %80 = vmatpush.msra.mxu0 %v50_v5  ;;  %112 = vmatpush.msra.mxu1 %v50_v5 }
  0x18   :  { %81 = vmatpush.msra.mxu0 %v49_v6  ;;  %113 = vmatpush.msra.mxu1 %v49_v6 }
  0x1a   :  { %82 = vmatpush.msra.mxu0 %v48_v7  ;;  %114 = vmatpush.msra.mxu1 %v48_v7 }
  0x1b   :  { %100 = vmatmul.msk.f32.vlgmr.msra.gmra.mxu0 %vm60_vm0, %v46_v8  ;;  %101 = vmatmul.msk.f32.vlgmr.msra.gmra.mxu1 %vm60_vm0, %v47_v9 }
  0x98   :  { %v84_v11 = vpop.f32.mrf.mxu0  ;;  %v87_v12 = vpop.f32.mrf.mxu1 }
  0x99   :  { %v85_v13 = vadd.f32 %v119_v10, %v84_v11  ;;  %v88_v14 = vadd.f32 %v119_v10, %v87_v12 }
  0x9b   :  { %v105_v15 = vpack.c.bf16 %v88_v14, %v85_v13 }
  0x9d   :  { %106 = vst [vmem:[%s211_s3] sm:$0xff] %v105_v15  }
  0x9e   :  { %98 = vsyncpa [#allocation3], 1 }
  0x9f   :  { %99 = vsyncpa [#allocation5], 1 }

// kernel: joint_network_forward.3
= control target key start
LH: loop header
LB: loop body
LE: loop exit
PB: predicated region body
PF: predicated region fallthrough
CT: control target
= control target key end

     0   :  { %s6855_s0 = inlined_call_operand.hbm [shape: f32[2,64,96], index: 0, kind: input, shape index: {}]   ;;  %s6856_s1 = inlined_call_operand.hbm [shape: f32[96,128], index: 1, kind: input, shape index: {}]   ;;  %s6857_s2 = inlined_call_operand.hbm [shape: f32[1,128], index: 2, kind: input, shape index: {}]   ;;  %s6858_s3 = inlined_call_operand.vmem [shape: bf16[2,8,128], index: 3, kind: input, shape index: {}]   ;;  %s6859_s4 = inlined_call_operand.hbm [shape: bf16[128,1024], index: 4, kind: input, shape index: {}]   ;;  %s6860_s5 = inlined_call_operand.hbm [shape: f32[1,1024], index: 5, kind: input, shape index: {}]   ;;  %s6861_s6 = inlined_call_operand.hbm [shape: f32[2,512,1024], index: 6, kind: output, shape index: {}]  }
   0x1   :  { %6864 = sst [smem:[#allocation16_spill]] %s6856_s1 }
   0x2   :  { %6865 = sst [smem:[#allocation17_spill]] %s6857_s2 }
   0x3   :  { %6866 = sst [smem:[#allocation18_spill]] %s6859_s4 }
   0x4   :  { %11 = vsyncpa [#allocation3], 0 }
   0x5   :  { %13 = vsyncpa [#allocation3 + $0x1], 0 }
   0x6   :  { %14 = vsyncpa [#allocation6], 0 }
   0x7   :  { %15 = vsyncpa [#allocation9], 0 }
   0x8   :  { %16 = vsyncpa [#allocation4], 0 }
   0x9   :  { %18 = vsyncpa [#allocation4 + $0x1], 0  ;;  %s5006_s21 = smov 0   ;;  %s5008_s22 = smov 0  }
   0xa   :  { %s5010_s23 = smov 0   ;;  %s5012_s24 = smov 0  }
   0xb   :  { %s5014_s25 = smov 0   ;;  %s5016_s26 = smov 0  }
   0xc LB: > { %s4081_s27 = sadd.s32 4294967295, %s4959_s26   ;;  %s4082_s28 = sadd.s32 4294967294, %s4959_s26   ;;  %s4959_s26 = sphi %s5016_s26, %s24_s26   ;;  %s4955_s25 = sphi %s5014_s25, %s6882_s25   ;;  %s4951_s24 = sphi %s5012_s24, %s6881_s24   ;;  %s4947_s23 = sphi %s5010_s23, %s6880_s23   ;;  %s4943_s22 = sphi %s5008_s22, %s6879_s22   ;;  %s4939_s21 = sphi %s5006_s21, %s6878_s21  }
   0xd   : > { %p65_p0 = scmp.ne.s32.totalorder %s4943_s22, %s4939_s21  ;;  %p5042_p1 = scmp.eq.s32.totalorder %s4081_s27, 0 }
   0xe   : > { %p219_p2 = scmp.eq.s32.totalorder %s4082_s28, 1  ;;  %p4083_p4 = scmp.ge.s32.totalorder %s4959_s26, 1 }
   0xf   : > { %p5048_p3 = por %p5042_p1, %p65_p0  ;;  %p226_p6 = scmp.lt.s32.totalorder %s4959_s26, 3 }
  0x10   : > { %p5053_p5 = por %p219_p2, %p65_p0  ;;  %s6870_s1 = sld [smem:[#allocation16_spill]] }
  0x11   : > { %p5061_p7 = pnand %p4083_p4, %p226_p6  ;;  %s4961_s12 = smov [#allocation5]  }
  0x12   : > { %s239_s13 = sshll.u32 %s4961_s12, 4  ;;  %p4088_p10 = scmp.ge.s32.totalorder %s4959_s26, 2  ;;  %s240_s13 = int_to_ptr.vmem [resolvable:$true] %s239_s13 }
  0x13   : > { %p4499_p8 = pneg %p5061_p7  ;;  %s6873_s4 = sld [smem:[#allocation18_spill]] }
  0x14   : > { %s6862_s18 = smov 128   ;;  %s6863_s19 = smov 8  }
  0x15   : > { %p5069_p9 = pnand %p4499_p8, %p5042_p1  ;;  %s4964_s20 = smov [#allocation8]  }
  0x16   : > { %s237_s10 = sshll.u32 %s6870_s1, 4  ;;  %s268_s28 = sshll.u32 %s4964_s20, 4  ;;  %s238_s10 = int_to_ptr.hbm [resolvable:$true] %s237_s10  ;;  %s269_s28 = int_to_ptr.vmem [resolvable:$true] %s268_s28 }
  0x17   : > { %4502 = dma.hbm_to_vmem [thread:$0]  (!%p5069_p9), %s238_s10, 1536, %s240_s13, [#allocation6], %s6862_s18, %s6862_s18, %s6863_s19  }
  0x18   : > { %s4965_s8 = smov 512   ;;  %s4966_s9 = smov 32  }
  0x19   : > { %s266_s17 = sshll.u32 %s6873_s4, 4  ;;  %s6874_s2 = sld [smem:[#allocation17_spill]]  ;;  %s267_s17 = int_to_ptr.hbm [resolvable:$true] %s266_s17 }
  0x1a   : > { %4508 = dma.hbm_to_vmem [thread:$0]  (!%p5069_p9), %s267_s17, 8192, %s269_s28, [#allocation9], %s4965_s8, %s4965_s8, %s4966_s9  }
  0x1b   : > { %s4967_s10 = smov [#allocation7]   ;;  %s283_s19 = sshll.u32 %s6860_s5, 4  ;;  %s284_s19 = int_to_ptr.hbm [resolvable:$true] %s283_s19 }
  0x1c   : > { %s254_s13 = sshll.u32 %s4967_s10, 4  ;;  %s4968_s17 = smov [#allocation10]   ;;  %s255_s13 = int_to_ptr.vmem [resolvable:$true] %s254_s13 }
  0x1d   : > { %s285_s28 = sshll.u32 %s4968_s17, 4  ;;  %p213_p11 = scmp.eq.s32.totalorder %s4081_s27, 1  ;;  %s286_s28 = int_to_ptr.vmem [resolvable:$true] %s285_s28 }
  0x1e   : > { %4511 = dma.hbm_to_vmem [thread:$0]  (!%p5069_p9), %s284_s19, 128, %s286_s28, [#allocation9]  }
  0x1f   : > { %s252_s16 = sshll.u32 %s6874_s2, 4  ;;  %s43_s8 = sadd.s32 1, %s4955_s25  ;;  %s253_s16 = int_to_ptr.hbm [resolvable:$true] %s252_s16 }
  0x20   : > { %4505 = dma.hbm_to_vmem [thread:$0]  (!%p5069_p9), %s253_s16, 16, %s255_s13, [#allocation6]  }
  0x21   : > { %p45_p12 = scmp.ge.s32.totalorder %s43_s8, 2  ;;  %s52_s9 = sadd.s32 1, %s4947_s23 }
  0x22   : > { %p59_p13 = scmp.ne.s32.totalorder %s4947_s23, %s4943_s22  ;;  %p60_p0 = scmp.eq.s32.totalorder %s4959_s26, 0 }
  0x23   : > { %s6884_s8 = smov (%p45_p12, %s43_s8), 0  ;;  %p4524_p4 = scmp.lt.s32.totalorder %s4959_s26, 2 }
  0x24   : > { %p5103_p2 = por %p213_p11, %p59_p13  ;;  %s47_s14 = ssub.s32 %s4955_s25, %s6884_s8 }
  0x25   : > { %s296_s12 = sand.u32 1, %s4947_s23   ;;  %p50_p6 = scmp.eq.s32.totalorder %s47_s14, 0 }
  0x26   : > { %p61_p8 = por %p60_p0, %p59_p13  ;;  %s4089_s19 = sshll.u32 %s296_s12, 6 }
  0x27   : > { %s4401_s27 = sshll.u32 %s4955_s25, 6  ;;  %s300_s17 = scalar_lea.vmem [#allocation2], %s4089_s19 }
  0x28   : > { %s5113_s15 = scalar_select %p50_p6, %s4947_s23, %s52_s9  }
  0x29   : > { %s307_s13 = scalar_lea.hbm %s6855_s0, %s4401_s27  ;;  %s310_s28 = sshll.u32 %s300_s17, 4  ;;  %s311_s28 = int_to_ptr.vmem [resolvable:$true] %s310_s28 }
  0x2a   : > { %s308_s20 = sshll.u32 %s307_s13, 4  ;;  %p4513_p9 = pnand %p4524_p4, %p61_p8  ;;  %s309_s20 = int_to_ptr.hbm [resolvable:$true] %s308_s20 }
  0x2b   : > { %s297_s1 = scalar_lea.sflag [#allocation3], %s296_s12  ;;  %s6876_s2 = smov 8  }
  0x2c   : > { %s6877_s4 = smov 128   ;;  %329 = sbr.rel (%p5061_p7) target bundleno = 1434 (0x59a), region = 44 }
  0x2d   : > { %4515 = dma.hbm_to_vmem [thread:$0]  (!%p4513_p9), %s309_s20, 1024, %s311_s28, %s297_s1, %s6877_s4, %s6877_s4, %s6876_s2  }
  0x2e   : > { %s5126_s9 = sand.u32 (!%p5061_p7), 1, %s4943_s22  }
  0x2f   : > { %s4093_s14 = sshll.u32 (!%p5061_p7), %s5126_s9, 6  ;;  %s332_s19 = scalar_lea.sflag (!%p5061_p7), [#allocation3], %s5126_s9 }
  0x30   : > { %s5130_s27 = scalar_lea.vmem (!%p5061_p7), [#allocation2], %s4093_s14 }
  0x31   : > { %4922 = dma.done.wait (%p5048_p3), %s332_s19, 1024  }
  0x32   : > { %4924 = vsyncadd (%p5048_p3), %s332_s19, 4294966272 }
  0x33   : > { %4926 = dma.done.wait (%p5042_p1), [#allocation6], 1552  }
  0x34   : > { %4928 = vsyncadd (%p5042_p1), [#allocation6], 4294965744 }
  0x35   : > { %4930 = dma.done.wait (%p5042_p1), [#allocation9], 8320  }
  0x36   : > { %4932 = vsyncadd (%p5042_p1), [#allocation9], 4294958976  ;;  %v417_v0 = vld [vmem:[#allocation5 + $0x58] sm:$0xff]  ;;  %v416_v1 = vld [vmem:[#allocation5 + $0x50] sm:$0xff]  ;;  %vm422_vm0 = vcmask 785408   ;;  %p390_p1 = scmp.lt.s32.totalorder %s4951_s24, 1 }
  0x37   : > { %451 = vmatpush.msra.mxu0 %v417_v0  ;;  %4467 = vmatpush.msra.mxu1 %v417_v0  ;;  %v415_v2 = vld [vmem:[#allocation5 + $0x48] sm:$0xff]  ;;  %v414_v3 = vld [vmem:[#allocation5 + $0x40] sm:$0xff]  ;;  %v413_v4 = vld [vmem:[#allocation5 + $0x38] sm:$0xff]  ;;  %vm513_vm1 = vcmask 1040384   ;;  %vm518_vm2 = vcmask 1041409   ;;  %vm522_vm3 = vcmask 1042434  }
  0x38   : > { %v412_v5 = vld [vmem:[#allocation5 + $0x30] sm:$0xff]  ;;  %v411_v6 = vld [vmem:[#allocation5 + $0x28] sm:$0xff]  ;;  %v410_v7 = vld [vmem:[#allocation5 + $0x20] sm:$0xff]  ;;  %s5162_s1 = scalar_select %p390_p1, %s4951_s24, 1  ;;  %vm526_vm4 = vcmask 1043459  }
  0x39   : > { %452 = vmatpush.msra.mxu0 %v416_v1  ;;  %4468 = vmatpush.msra.mxu1 %v416_v1  ;;  %v409_v8 = vld [vmem:[#allocation5 + $0x18] sm:$0xff]  ;;  %v408_v9 = vld [vmem:[#allocation5 + $0x10] sm:$0xff]  ;;  %v407_v10 = vld [vmem:[#allocation5 + $0x8] sm:$0xff]  ;;  %s4098_s11 = sshll.u32 %s5126_s9, 12  ;;  %s4466_s16 = sshll.u32 %s4951_s24, 12 }
  0x3a   : > { %v406_v11 = vld [vmem:[#allocation5] sm:$0xff]  ;;  %v399_v13 = vld [vmem:[%s5130_s27 + $0x8] sm:$0xff]  ;;  %v400_v14 = vld [vmem:[%s5130_s27 + $0x10] sm:$0xff]  ;;  %s4099_s2 = sshll.u32 %s5162_s1, 2  ;;  %s5413_s12 = scalar_lea.vmem [#allocation11], %s4098_s11 }
  0x3b   : > { %453 = vmatpush.msra.mxu0 %v415_v2  ;;  %4469 = vmatpush.msra.mxu1 %v415_v2  ;;  %v398_v12 = vld [vmem:[%s5130_s27] sm:$0xff]  ;;  %v4262_v21 = vld [vmem:[#allocation8 + $0x1c8] sm:$0xf]  ;;  %v4431_v24 = vld [vmem:[#allocation8 + $0x1cc] sm:$0xf]  ;;  %s393_s30 = scalar_lea.vmem %s6858_s3, %s4099_s2  ;;  %s3931_s20 = scalar_lea.hbm %s6861_s6, %s4466_s16 }
  0x3c   : > { %v4254_v15 = vld [vmem:[#allocation8 + $0x1c0] sm:$0xf]  ;;  %v4430_v17 = vld [vmem:[#allocation8 + $0x1c4] sm:$0xf]  ;;  %v4433_v23 = vld [vmem:[#allocation8 + $0x1e4] sm:$0xf0] }
  0x3d   : > { %454 = vmatpush.msra.mxu0 %v414_v3  ;;  %4470 = vmatpush.msra.mxu1 %v414_v3  ;;  %v4432_v16 = vld [vmem:[#allocation8 + $0x1dc] sm:$0xf0]  ;;  %v4256_v20 = vld [vmem:[#allocation8 + $0x1e0] sm:$0xf0]  ;;  %v4264_v25 = vld [vmem:[#allocation8 + $0x1e8] sm:$0xf0]  ;;  %v4263_v26 = vor.u32 %v4433_v23, %v4262_v21 }
  0x3e   : > { %v402_v18 = vld [vmem:[%s5130_s27 + $0x20] sm:$0xff]  ;;  %v4255_v19 = vor.u32 %v4432_v16, %v4254_v15  ;;  %v4259_v22 = vor.u32 %v4430_v17, %v4256_v20  ;;  %v4267_v27 = vor.u32 %v4431_v24, %v4264_v25  ;;  %v4246_v33 = vld [vmem:[#allocation8 + $0x188] sm:$0xf]  ;;  %v4427_v37 = vld [vmem:[#allocation8 + $0x18c] sm:$0xf]  ;;  %s3932_s24 = sshll.u32 %s5413_s12, 4  ;;  %s3933_s24 = int_to_ptr.vmem [resolvable:$true] %s3932_s24 }
  0x3f   : > { %455 = vmatpush.msra.mxu0 %v413_v4  ;;  %4471 = vmatpush.msra.mxu1 %v413_v4  ;;  %v4238_v28 = vld [vmem:[#allocation8 + $0x180] sm:$0xf]  ;;  %v4426_v30 = vld [vmem:[#allocation8 + $0x184] sm:$0xf]  ;;  %v4429_v34 = vld [vmem:[#allocation8 + $0x1a4] sm:$0xf0] }
  0x40   : > { %2017 = vmatpush.bf16.msra.mxu2 %v4259_v22  ;;  %v4428_v29 = vld [vmem:[#allocation8 + $0x19c] sm:$0xf0]  ;;  %2186 = vmatpush.bf16.msra.mxu3 %v4263_v26  ;;  %v4240_v32 = vld [vmem:[#allocation8 + $0x1a0] sm:$0xf0]  ;;  %v4247_v36 = vor.u32 %v4429_v34, %v4246_v33  ;;  %v4248_v38 = vld [vmem:[#allocation8 + $0x1a8] sm:$0xf0] }
  0x41   : > { %456 = vmatpush.msra.mxu0 %v412_v5  ;;  %4472 = vmatpush.msra.mxu1 %v412_v5  ;;  %v4239_v31 = vor.u32 %v4428_v29, %v4238_v28  ;;  %v4243_v35 = vor.u32 %v4426_v30, %v4240_v32  ;;  %v4251_v39 = vor.u32 %v4427_v37, %v4248_v38  ;;  %v4222_v40 = vld [vmem:[#allocation8 + $0x140] sm:$0xf]  ;;  %v4422_v42 = vld [vmem:[#allocation8 + $0x144] sm:$0xf]  ;;  %v4230_v46 = vld [vmem:[#allocation8 + $0x148] sm:$0xf] }
  0x42   : > { %v4424_v41 = vld [vmem:[#allocation8 + $0x15c] sm:$0xf0]  ;;  %v403_v43 = vld [vmem:[%s5130_s27 + $0x28] sm:$0xff]  ;;  %v404_v4 = vld [vmem:[%s5130_s27 + $0x30] sm:$0xff]  ;;  %s3934_s17 = sshll.u32 %s3931_s20, 4  ;;  %s3915_s28 = scalar_lea.sflag [#allocation4], %s5126_s9  ;;  %s3935_s17 = int_to_ptr.hbm [resolvable:$true] %s3934_s17 }
  0x43   : > { %457 = vmatpush.msra.mxu0 %v411_v6  ;;  %4473 = vmatpush.msra.mxu1 %v411_v6  ;;  %v4223_v44 = vor.u32 %v4424_v41, %v4222_v40  ;;  %v4224_v45 = vld [vmem:[#allocation8 + $0x160] sm:$0xf0]  ;;  %v4425_v48 = vld [vmem:[#allocation8 + $0x164] sm:$0xf0]  ;;  %v4423_v49 = vld [vmem:[#allocation8 + $0x14c] sm:$0xf] }
  0x44   : > { %2018 = vmatpush.bf16.msra.mxu2 %v4243_v35  ;;  %2187 = vmatpush.bf16.msra.mxu3 %v4247_v36  ;;  %v4227_v47 = vor.u32 %v4422_v42, %v4224_v45  ;;  %v4232_v50 = vld [vmem:[#allocation8 + $0x168] sm:$0xf0]  ;;  %v4231_v51 = vor.u32 %v4425_v48, %v4230_v46  ;;  %v4206_v53 = vld [vmem:[#allocation8 + $0x100] sm:$0xf]  ;;  %v4418_v55 = vld [vmem:[#allocation8 + $0x104] sm:$0xf] }
  0x45   : > { %458 = vmatpush.msra.mxu0 %v410_v7  ;;  %4474 = vmatpush.msra.mxu1 %v410_v7  ;;  %v4235_v52 = vor.u32 %v4423_v49, %v4232_v50  ;;  %v4420_v54 = vld [vmem:[#allocation8 + $0x11c] sm:$0xf0]  ;;  %v4208_v57 = vld [vmem:[#allocation8 + $0x120] sm:$0xf0]  ;;  %v4214_v58 = vld [vmem:[#allocation8 + $0x108] sm:$0xf] }
  0x46   : > { %v4207_v56 = vor.u32 %v4420_v54, %v4206_v53  ;;  %v4421_v59 = vld [vmem:[#allocation8 + $0x124] sm:$0xf0]  ;;  %v4211_v60 = vor.u32 %v4418_v55, %v4208_v57  ;;  %v4419_v62 = vld [vmem:[#allocation8 + $0x10c] sm:$0xf]  ;;  %v4190_v1 = vld [vmem:[#allocation8 + $0xc0] sm:$0xf] }
  0x47   : > { %459 = vmatpush.msra.mxu0 %v409_v8  ;;  %4475 = vmatpush.msra.mxu1 %v409_v8  ;;  %v4215_v61 = vor.u32 %v4421_v59, %v4214_v58  ;;  %v4216_v63 = vld [vmem:[#allocation8 + $0x128] sm:$0xf0]  ;;  %v4416_v2 = vld [vmem:[#allocation8 + $0xdc] sm:$0xf0]  ;;  %v4414_v3 = vld [vmem:[#allocation8 + $0xc4] sm:$0xf] }
  0x48   : > { %2019 = vmatpush.bf16.msra.mxu2 %v4227_v47  ;;  %2188 = vmatpush.bf16.msra.mxu3 %v4231_v51  ;;  %v4219_v0 = vor.u32 %v4419_v62, %v4216_v63  ;;  %v4191_v5 = vor.u32 %v4416_v2, %v4190_v1  ;;  %v4192_v6 = vld [vmem:[#allocation8 + $0xe0] sm:$0xf0]  ;;  %v4198_v7 = vld [vmem:[#allocation8 + $0xc8] sm:$0xf]  ;;  %v4174_v15 = vld [vmem:[#allocation8 + $0x80] sm:$0xf] }
  0x49   : > { %460 = vmatpush.msra.mxu0 %v408_v9  ;;  %4476 = vmatpush.msra.mxu1 %v408_v9  ;;  %v4195_v8 = vor.u32 %v4414_v3, %v4192_v6  ;;  %v4417_v9 = vld [vmem:[#allocation8 + $0xe4] sm:$0xf0]  ;;  %v4412_v16 = vld [vmem:[#allocation8 + $0x9c] sm:$0xf0]  ;;  %v4410_v17 = vld [vmem:[#allocation8 + $0x84] sm:$0xf] }
  0x4a   : > { %v4182_v20 = vld [vmem:[#allocation8 + $0x88] sm:$0xf]  ;;  %v4411_v25 = vld [vmem:[#allocation8 + $0x8c] sm:$0xf]  ;;  %v4158_v29 = vld [vmem:[#allocation8 + $0x40] sm:$0xf] }
  0x4b   : > { %461 = vmatpush.msra.mxu0 %v407_v10  ;;  %4477 = vmatpush.msra.mxu1 %v407_v10  ;;  %v4415_v10 = vld [vmem:[#allocation8 + $0xcc] sm:$0xf]  ;;  %v4413_v21 = vld [vmem:[#allocation8 + $0xa4] sm:$0xf0]  ;;  %v4408_v30 = vld [vmem:[#allocation8 + $0x5c] sm:$0xf0] }
  0x4c   : > { %2020 = vmatpush.bf16.msra.mxu2 %v4211_v60  ;;  %2189 = vmatpush.bf16.msra.mxu3 %v4215_v61  ;;  %v4183_v24 = vor.u32 %v4413_v21, %v4182_v20  ;;  %v4184_v26 = vld [vmem:[#allocation8 + $0xa8] sm:$0xf0]  ;;  %v401_v33 = vld [vmem:[%s5130_s27 + $0x18] sm:$0xff]  ;;  %v4159_v35 = vor.u32 %v4408_v30, %v4158_v29  ;;  %v4160_v36 = vld [vmem:[#allocation8 + $0x60] sm:$0xf0]  ;;  %s4883_s14 = sshra.s32 %s3935_s17, 4  ;;  %s4884_s14 = int_to_ptr.hbm [resolvable:$true] %s4883_s14 }
  0x4d   : > { %462 = vmatpush.msra.mxu0 %v406_v11  ;;  %4478 = vmatpush.msra.mxu1 %v406_v11  ;;  %v4200_v11 = vld [vmem:[#allocation8 + $0xe8] sm:$0xf0]  ;;  %v4187_v28 = vor.u32 %v4411_v25, %v4184_v26  ;;  %v405_v34 = vld [vmem:[%s5130_s27 + $0x38] sm:$0xff]  ;;  %v4166_v38 = vld [vmem:[#allocation8 + $0x48] sm:$0xf]  ;;  %s4885_s19 = scalar_lea.hbm %s4884_s14, 4096  ;;  %p4890_p12 = scmp.lt.s32.totalorder %s4884_s14, %s6861_s6 }
  0x4e   : > { %4100 = vmatmul.msk.f32.vlgmr.msra.gmra.mxu0 %vm422_vm0, %v398_v12  ;;  %4104 = vmatmul.msk.f32.vlgmr.msra.gmra.mxu1 %vm422_vm0, %v402_v18  ;;  %v5157_v12 = vld [vmem:[#allocation7] ss:$0 sm:$0xff]  ;;  %v4175_v18 = vor.u32 %v4412_v16, %v4174_v15  ;;  %v4407_v40 = vld [vmem:[#allocation8 + $0x4c] sm:$0xf]  ;;  %v4142_v45 = vld [vmem:[#allocation8] sm:$0xf]  ;;  %p4886_p3 = scmp.ne.s32.totalorder %s4884_s14, %s4885_s19 }
  0x4f   : > { %1848 = vmatpush.bf16.msrb.mxu1 %v4255_v19  ;;  %2355 = vmatpush.bf16.msrb.mxu0 %v4267_v27  ;;  %v4176_v19 = vld [vmem:[#allocation8 + $0xa0] sm:$0xf0]  ;;  %v4404_v46 = vld [vmem:[#allocation8 + $0x1c] sm:$0xf0]  ;;  %v4150_v51 = vld [vmem:[#allocation8 + $0x8] sm:$0xf] }
  0x50   : > { %2021 = vmatpush.bf16.msra.mxu2 %v4195_v8  ;;  %v4179_v23 = vor.u32 %v4410_v17, %v4176_v19  ;;  %v4402_v47 = vld [vmem:[#allocation8 + $0x4] sm:$0xf]  ;;  %v4143_v57 = vor.u32 %v4404_v46, %v4142_v45  ;;  %v4462_v30 = vld [vmem:[#allocation8 + $0x1d4] sm:$0xf]  ;;  %p4887_p7 = pnand %p4886_p3, %p5103_p2  ;;  %s4889_s2 = scalar_lea.hbm %s6861_s6, 8192 }
  0x51   : > { %v4144_v50 = vld [vmem:[#allocation8 + $0x20] sm:$0xf0]  ;;  %p4891_p13 = scmp.lt.s32.totalorder %s4889_s2, %s4885_s19 }
  0x52   : > { %v4147_v58 = vor.u32 %v4402_v47, %v4144_v50  ;;  %p4888_p11 = pneg %p4887_p7 }
  0x53   : > { %1849 = vmatpush.bf16.msrb.mxu1 %v4239_v31  ;;  %2356 = vmatpush.bf16.msrb.mxu0 %v4251_v39  ;;  %v4406_v31 = vld [vmem:[#allocation8 + $0x44] sm:$0xf]  ;;  %v4409_v39 = vld [vmem:[#allocation8 + $0x64] sm:$0xf0]  ;;  %p4892_p0 = por %p4891_p13, %p4890_p12 }
  0x54   : > { %2022 = vmatpush.bf16.msra.mxu2 %v4179_v23  ;;  %v4163_v37 = vor.u32 %v4406_v31, %v4160_v36  ;;  %v4167_v42 = vor.u32 %v4409_v39, %v4166_v38  ;;  %v4384_v31 = vld [vmem:[#allocation8 + $0x1f0] sm:$0xf0]  ;;  %v4465_v38 = vld [vmem:[#allocation8 + $0x1f4] sm:$0xf0]  ;;  %v4382_v39 = vld [vmem:[#allocation8 + $0x1d0] sm:$0xf] }
  0x55   : > { %p4893_p4 = pnand %p4892_p0, %p4888_p11 }
  0x56   : > { %4101 = vmatmul.msk.f32.gmra.mxu0 %vm422_vm0, %v399_v13  ;;  %4105 = vmatmul.msk.f32.gmra.mxu1 %vm422_vm0, %v403_v43  ;;  %v4199_v13 = vor.u32 %v4417_v9, %v4198_v7  ;;  %v4168_v43 = vld [vmem:[#allocation8 + $0x68] sm:$0xf0] }
  0x57   : > { %1850 = vmatpush.bf16.msrb.mxu1 %v4223_v44  ;;  %2357 = vmatpush.bf16.msrb.mxu0 %v4235_v52  ;;  %v4171_v44 = vor.u32 %v4407_v40, %v4168_v43  ;;  %v4405_v52 = vld [vmem:[#allocation8 + $0x24] sm:$0xf0]  ;;  %v4464_v40 = vld [vmem:[#allocation8 + $0x1ec] sm:$0xf0]  ;;  %v4392_v43 = vld [vmem:[#allocation8 + $0x1f8] sm:$0xf0] }
  0x58   : > { %2190 = vmatpush.bf16.msra.mxu3 %v4199_v13  ;;  %2023 = vmatpush.bf16.msra.mxu2 %v4163_v37  ;;  %v4151_v59 = vor.u32 %v4405_v52, %v4150_v51 }
  0x5b   : > { %1851 = vmatpush.bf16.msrb.mxu1 %v4207_v56  ;;  %2358 = vmatpush.bf16.msrb.mxu0 %v4219_v0  ;;  %v496_v0 = vld [vmem:[%s393_s30] sm:$0xf] }
  0x5c   : > { %2191 = vmatpush.bf16.msra.mxu3 %v4183_v24  ;;  %2024 = vmatpush.bf16.msra.mxu2 %v4147_v58 }
  0x5e   : > { %4102 = vmatmul.msk.f32.gmra.mxu0 %vm422_vm0, %v400_v14  ;;  %4106 = vmatmul.msk.f32.gmra.mxu1 %vm422_vm0, %v404_v4  ;;  %v4203_v14 = vor.u32 %v4415_v10, %v4200_v11  ;;  %v5187_v10 = vunpack.c.l.bf16 %v496_v0 }
  0x5f   : > { %1852 = vmatpush.bf16.msrb.mxu1 %v4191_v5 }
  0x60   : > { %2359 = vmatpush.bf16.msrb.mxu0 %v4203_v14  ;;  %2192 = vmatpush.bf16.msra.mxu3 %v4167_v42  ;;  %v4463_v42 = vld [vmem:[#allocation8 + $0x1dc] sm:$0xf] }
  0x61   : > { %v4395_v51 = vor.u32 %v4463_v42, %v4392_v43 }
  0x63   : > { %1853 = vmatpush.bf16.msrb.mxu1 %v4175_v18 }
  0x64   : > { %2360 = vmatpush.bf16.msrb.mxu0 %v4187_v28  ;;  %2193 = vmatpush.bf16.msra.mxu3 %v4151_v59  ;;  %v4152_v28 = vld [vmem:[#allocation8 + $0x28] sm:$0xf0] }
  0x66   : > { %4103 = vmatmul.msk.f32.gmra.mxu0 %vm422_vm0, %v401_v33  ;;  %4107 = vmatmul.msk.f32.gmra.mxu1 %vm422_vm0, %v405_v34  ;;  %v4390_v33 = vld [vmem:[#allocation8 + $0x1d8] sm:$0xf] }
  0x67   : > { %1854 = vmatpush.bf16.msrb.mxu1 %v4159_v35 }
  0x68   : > { %2361 = vmatpush.bf16.msrb.mxu0 %v4171_v44 }
  0x6b   : > { %1855 = vmatpush.bf16.msrb.mxu1 %v4143_v57 }
  0xcb   : > { %v464_v22 = vpop.f32.mrf.mxu0 }
  0xcc   : > { %v465_v27 = vadd.f32 %v5157_v12, %v464_v22 }
  0xce   : > { %v5165_v32 = vpack.c.bf16 %v465_v27, %v465_v27  ;;  %v4403_v27 = vld [vmem:[#allocation8 + $0xc] sm:$0xf] }
  0xcf   : > { %v4155_v47 = vor.u32 %v4403_v27, %v4152_v28 }
  0xd0   : > { %v5173_v41 = vrot.slane %v5165_v32, 3 }
  0xd1   : > { %2362 = vmatpush.bf16.msrb.mxu0 %v4155_v47 }
  0xd2   : > { %v516_v48 = vsel %vm513_vm1, %v5165_v32, %v5173_v41  ;;  %v519_v49 = vsel %vm518_vm2, %v5165_v32, %v5173_v41  ;;  %v523_v54 = vsel %vm522_vm3, %v5165_v32, %v5173_v41  ;;  %v527_v34 = vsel %vm526_vm4, %v5165_v32, %v5173_v41 }
  0xd3   : > { %v521_v53 = vrot.slane %v519_v49, 1  ;;  %v622_v55 = vunpack.i.h.s16 %v516_v48  ;;  %v4108_v56 = vpack.i.b16 %v516_v48, %v516_v48  ;;  %v525_v1 = vrot.slane %v523_v54, 2  ;;  %v467_v54 = vpop.f32.mrf.mxu0 }
  0xd4   : > { %v529_v46 = vrot.slane %v527_v34, 3  ;;  %v4387_v48 = vor.u32 %v4462_v30, %v4384_v31  ;;  %v4391_v49 = vor.u32 %v4465_v38, %v4390_v33  ;;  %v4383_v41 = vor.u32 %v4464_v40, %v4382_v39 }
  0xd5   : > { %v624_v60 = vunpack.i.h.s16 %v521_v53  ;;  %v686_v61 = vpack.i.b16 %v622_v55, %v622_v55  ;;  %v4109_v62 = vpack.i.b16 %v521_v53, %v521_v53  ;;  %v749_v63 = vperm.slane %v4108_v56, 0  ;;  %3489 = vmatpush.bf16.msra.mxu0 %v4395_v51 }
  0xd6   : > { %v626_v11 = vunpack.i.h.s16 %v525_v1  ;;  %v4110_v24 = vpack.i.b16 %v525_v1, %v525_v1  ;;  %3151 = vmatpush.bf16.msrb.mxu2 %v4387_v48  ;;  %3320 = vmatpush.bf16.msrb.mxu3 %v4391_v49  ;;  %v628_v57 = vunpack.i.h.s16 %v529_v46 }
  0xd7   : > { %v688_v2 = vpack.i.b16 %v624_v60, %v624_v60  ;;  %v750_v3 = vperm.slane %v686_v61, 0  ;;  %v751_v4 = vperm.slane %v4109_v62, 0  ;;  %v814_v5 = vpack.i.b16 %v749_v63, %v749_v63  ;;  %2982 = vmatpush.bf16.msra.mxu1 %v4383_v41 }
  0xd8   : > { %v690_v20 = vpack.i.b16 %v626_v11, %v626_v11  ;;  %v753_v44 = vperm.slane %v4110_v24, 0  ;;  %v468_v62 = vadd.f32 %v5157_v12, %v467_v54 }
  0xd9   : > { %v752_v6 = vperm.slane %v688_v2, 0  ;;  %v818_v7 = vpack.i.b16 %v750_v3, %v750_v3  ;;  %v816_v8 = vperm.slane %v814_v5, 0  ;;  %v822_v9 = vpack.i.b16 %v751_v4, %v751_v4 }
  0xda   : > { %v754_v35 = vperm.slane %v690_v20, 0  ;;  %v830_v52 = vpack.i.b16 %v753_v44, %v753_v44  ;;  %v692_v3 = vpack.i.b16 %v628_v57, %v628_v57 }
  0xdb   : > { %v820_v13 = vperm.slane %v818_v7, 0  ;;  %v826_v14 = vpack.i.b16 %v752_v6, %v752_v6  ;;  %v1069_v15 = vunpack.c.l.bf16 %v816_v8  ;;  %v824_v16 = vperm.slane %v822_v9, 0 }
  0xdc   : > { %v834_v50 = vpack.i.b16 %v754_v35, %v754_v35  ;;  %v832_v63 = vperm.slane %v830_v52, 0  ;;  %v5199_v6 = vpack.c.bf16 %v468_v62, %v468_v62  ;;  %v4111_v7 = vpack.i.b16 %v529_v46, %v529_v46 }
  0xdd   : > { %v828_v17 = vperm.slane %v826_v14, 0  ;;  %v1070_v18 = vunpack.c.l.bf16 %v820_v13  ;;  %v1134_v19 = vadd.f32 %v5187_v10, %v1069_v15  ;;  %v1071_v25 = vunpack.c.l.bf16 %v824_v16 }
  0xde   : > { %v836_v58 = vperm.slane %v834_v50, 0  ;;  %v1073_v8 = vunpack.c.l.bf16 %v832_v63  ;;  %v756_v9 = vperm.slane %v692_v3, 0  ;;  %v5207_v13 = vrot.slane %v5199_v6, 3  ;;  %v4458_v3 = vld [vmem:[#allocation8 + $0x194] sm:$0xf] }
  0xdf   : > { %v1072_v21 = vunpack.c.l.bf16 %v828_v17  ;;  %v1135_v22 = vadd.f32 %v5187_v10, %v1070_v18  ;;  %v1198_v23 = vpack.c.bf16 %v1134_v19, %v1134_v19  ;;  %v1136_v45 = vadd.f32 %v5187_v10, %v1071_v25 }
  0xe0   : > { %v1074_v4 = vunpack.c.l.bf16 %v836_v58  ;;  %v755_v15 = vperm.slane %v4111_v7, 0  ;;  %v1138_v16 = vadd.f32 %v5187_v10, %v1073_v8  ;;  %v842_v18 = vpack.i.b16 %v756_v9, %v756_v9  ;;  %v4374_v7 = vld [vmem:[#allocation8 + $0x198] sm:$0xf] }
  0xe1   : > { %v1199_v26 = vpack.c.bf16 %v1135_v22, %v1135_v22  ;;  %v1262_v29 = vunpack.c.l.bf16 %v1198_v23  ;;  %v1137_v36 = vadd.f32 %v5187_v10, %v1072_v21  ;;  %v1200_v53 = vpack.c.bf16 %v1136_v45, %v1136_v45 }
  0xe2   : > { %v1139_v11 = vadd.f32 %v5187_v10, %v1074_v4  ;;  %v532_v21 = vsel %vm513_vm1, %v5199_v6, %v5207_v13  ;;  %v838_v22 = vpack.i.b16 %v755_v15, %v755_v15  ;;  %v1202_v23 = vpack.c.bf16 %v1138_v16, %v1138_v16  ;;  %v4368_v4 = vld [vmem:[#allocation8 + $0x1b0] sm:$0xf0]  ;;  %v4460_v15 = vld [vmem:[#allocation8 + $0x1ac] sm:$0xf0] }
  0xe3   : > { %v1263_v37 = vunpack.c.l.bf16 %v1199_v26  ;;  %4589 = vtanh.f32 %v1262_v29  ;;  %v1201_v32 = vpack.c.bf16 %v1137_v36, %v1137_v36  ;;  %v1264_v0 = vunpack.c.l.bf16 %v1200_v53 }
  0xe4   : > { %v1203_v19 = vpack.c.bf16 %v1139_v11, %v1139_v11  ;;  %v844_v25 = vperm.slane %v842_v18, 0  ;;  %v630_v27 = vunpack.i.h.s16 %v532_v21  ;;  %v840_v29 = vperm.slane %v838_v22, 0  ;;  %v4461_v11 = vld [vmem:[#allocation8 + $0x1b4] sm:$0xf0] }
  0xe5   : > { %4591 = vtanh.f32 %v1263_v37  ;;  %v1265_v59 = vunpack.c.l.bf16 %v1201_v32  ;;  %v1266_v30 = vunpack.c.l.bf16 %v1202_v23  ;;  %v4112_v33 = vpack.i.b16 %v532_v21, %v532_v21 }
  0xe6   : > { %v1267_v26 = vunpack.c.l.bf16 %v1203_v19  ;;  %v1076_v34 = vunpack.c.l.bf16 %v844_v25  ;;  %v694_v35 = vpack.i.b16 %v630_v27, %v630_v27  ;;  %v1075_v37 = vunpack.c.l.bf16 %v840_v29  ;;  %v4459_v19 = vld [vmem:[#allocation8 + $0x19c] sm:$0xf] }
  0xe7   : > { %4593 = vtanh.f32 %v1265_v59  ;;  %v757_v38 = vperm.slane %v4112_v33, 0  ;;  %v534_v40 = vsel %vm518_vm2, %v5199_v6, %v5207_v13  ;;  %v537_v8 = vsel %vm522_vm3, %v5199_v6, %v5207_v13 }
  0xe8   : > { %4595 = vtanh.f32 %v1264_v0  ;;  %v1141_v39 = vadd.f32 %v5187_v10, %v1076_v34  ;;  %v758_v42 = vperm.slane %v694_v35, 0  ;;  %v1140_v44 = vadd.f32 %v5187_v10, %v1075_v37 }
  0xe9   : > { %v4590_v55 = vpop.eup %4589  ;;  %4597 = vtanh.f32 %v1267_v26  ;;  %v536_v45 = vrot.slane %v534_v40, 1  ;;  %v846_v46 = vpack.i.b16 %v757_v38, %v757_v38  ;;  %v4371_v9 = vor.u32 %v4458_v3, %v4368_v4 }
  0xea   : > { %v1390_v60 = vpack.c.bf16 %v4590_v55, %v4590_v55  ;;  %4599 = vtanh.f32 %v1266_v30  ;;  %v1205_v48 = vpack.c.bf16 %v1141_v39, %v1141_v39  ;;  %v850_v49 = vpack.i.b16 %v758_v42, %v758_v42 }
  0xeb   : > { %v4592_v56 = vpop.eup %4591  ;;  %v1204_v32 = vpack.c.bf16 %v1140_v44, %v1140_v44  ;;  %v632_v51 = vunpack.i.h.s16 %v536_v45  ;;  %v848_v52 = vperm.slane %v846_v46, 0  ;;  %v4113_v58 = vpack.i.b16 %v536_v45, %v536_v45  ;;  %3152 = vmatpush.bf16.msrb.mxu2 %v4371_v9 }
  0xec   : > { %v1391_v61 = vpack.c.bf16 %v4592_v56, %v4592_v56  ;;  %v1560_v1 = vunpack.c.l.b16 %v1390_v60  ;;  %v1269_v53 = vunpack.c.l.bf16 %v1205_v48  ;;  %v852_v54 = vperm.slane %v850_v49, 0 }
  0xed   : > { %v4594_v14 = vpop.eup %4593  ;;  %v1268_v56 = vunpack.c.l.bf16 %v1204_v32  ;;  %v696_v59 = vpack.i.b16 %v632_v51, %v632_v51  ;;  %v1077_v60 = vunpack.c.l.bf16 %v848_v52  ;;  %v759_v63 = vperm.slane %v4113_v58, 0 }
  0xee   : > { %v1561_v2 = vunpack.c.l.b16 %v1391_v61  ;;  %v4596_v17 = vpop.eup %4595  ;;  %v1393_v20 = vpack.c.bf16 %v4594_v14, %v4594_v14  ;;  %4601 = vtanh.f32 %v1269_v53  ;;  %v1078_v61 = vunpack.c.l.bf16 %v852_v54  ;;  %v4366_v14 = vld [vmem:[#allocation8 + $0x190] sm:$0xf] }
  0xef   : > { %v1392_v24 = vpack.c.bf16 %v4596_v17, %v4596_v17  ;;  %v4598_v43 = vpop.eup %4597  ;;  %4603 = vtanh.f32 %v1268_v56  ;;  %v760_v0 = vperm.slane %v696_v59, 0  ;;  %v4375_v17 = vor.u32 %v4461_v11, %v4374_v7 }
  0xf0   : > { %v5197_v5 = vpack.c.b16 %v1561_v2, %v1560_v1  ;;  %v1563_v28 = vunpack.c.l.b16 %v1393_v20  ;;  %v4600_v47 = vpop.eup %4599  ;;  %v1395_v50 = vpack.c.bf16 %v4598_v43, %v4598_v43  ;;  %v1142_v1 = vadd.f32 %v5187_v10, %v1077_v60  ;;  %v4376_v20 = vld [vmem:[#allocation8 + $0x1b8] sm:$0xf0] }
  0xf1   : > { %v1562_v31 = vunpack.c.l.b16 %v1392_v24  ;;  %v1394_v41 = vpack.c.bf16 %v4600_v47, %v4600_v47  ;;  %v1143_v2 = vadd.f32 %v5187_v10, %v1078_v61  ;;  %v4367_v18 = vor.u32 %v4460_v15, %v4366_v14  ;;  %3321 = vmatpush.bf16.msrb.mxu3 %v4375_v17 }
  0xf2   : > { %1856 = vmatmul.bf16.vlgmr.msrb.gmra.mxu1 %v5197_v5  ;;  %2025 = vmatmul.bf16.vlgmr.msra.gmra.mxu2 %v5197_v5  ;;  %v1565_v55 = vunpack.c.l.b16 %v1395_v50  ;;  %v854_v21 = vpack.i.b16 %v759_v63, %v759_v63  ;;  %v1206_v22 = vpack.c.bf16 %v1142_v1, %v1142_v1  ;;  %v4379_v23 = vor.u32 %v4459_v19, %v4376_v20 }
  0xf3   : > { %2194 = vmatmul.bf16.vlgmr.msra.gmra.mxu3 %v5197_v5  ;;  %2363 = vmatmul.bf16.vlgmr.msrb.gmra.mxu0 %v5197_v5  ;;  %v5213_v36 = vpack.c.b16 %v1563_v28, %v1562_v31  ;;  %v1564_v57 = vunpack.c.l.b16 %v1394_v41  ;;  %v539_v25 = vrot.slane %v537_v8, 2  ;;  %v858_v26 = vpack.i.b16 %v760_v0, %v760_v0 }
  0xf4   : > { %v4602_v16 = vpop.eup %4601  ;;  %v1207_v27 = vpack.c.bf16 %v1143_v2, %v1143_v2  ;;  %2983 = vmatpush.bf16.msra.mxu1 %v4367_v18  ;;  %3490 = vmatpush.bf16.msra.mxu0 %v4379_v23  ;;  %v856_v30 = vperm.slane %v854_v21, 0  ;;  %v1270_v31 = vunpack.c.l.bf16 %v1206_v22  ;;  %v540_v50 = vsel %vm526_vm4, %v5199_v6, %v5207_v13 }
  0xf5   : > { %v5224_v62 = vpack.c.b16 %v1565_v55, %v1564_v57  ;;  %v4604_v24 = vpop.eup %4603  ;;  %v1397_v28 = vpack.c.bf16 %v4602_v16, %v4602_v16  ;;  %v634_v33 = vunpack.i.h.s16 %v539_v25  ;;  %v860_v34 = vperm.slane %v858_v26, 0  ;;  %v470_v57 = vpop.f32.mrf.mxu0 }
  0xf6   : > { %v1396_v29 = vpack.c.bf16 %v4604_v24, %v4604_v24  ;;  %v1271_v35 = vunpack.c.l.bf16 %v1207_v27  ;;  %v4114_v39 = vpack.i.b16 %v539_v25, %v539_v25  ;;  %v1079_v40 = vunpack.c.l.bf16 %v856_v30 }
  0xf7   : > { %v1567_v37 = vunpack.c.l.b16 %v1397_v28  ;;  %4605 = vtanh.f32 %v1270_v31  ;;  %v698_v42 = vpack.i.b16 %v634_v33, %v634_v33  ;;  %v1080_v43 = vunpack.c.l.bf16 %v860_v34 }
  0xf8   : > { %v1566_v38 = vunpack.c.l.b16 %v1396_v29  ;;  %4607 = vtanh.f32 %v1271_v35  ;;  %v761_v45 = vperm.slane %v4114_v39, 0  ;;  %v1144_v46 = vadd.f32 %v5187_v10, %v1079_v40 }
  0xf9   : > { %v762_v47 = vperm.slane %v698_v42, 0  ;;  %v1145_v48 = vadd.f32 %v5187_v10, %v1080_v43  ;;  %v542_v52 = vrot.slane %v540_v50, 3  ;;  %v471_v2 = vadd.f32 %v5157_v12, %v470_v57 }
  0xfa   : > { %v5235_v44 = vpack.c.b16 %v1567_v37, %v1566_v38  ;;  %v862_v41 = vpack.i.b16 %v761_v45, %v761_v45  ;;  %v1208_v51 = vpack.c.bf16 %v1144_v46, %v1144_v46 }
  0xfb   : > { %v866_v53 = vpack.i.b16 %v762_v47, %v762_v47  ;;  %v1209_v54 = vpack.c.bf16 %v1145_v48, %v1145_v48  ;;  %v636_v60 = vunpack.i.h.s16 %v542_v52  ;;  %v4115_v3 = vpack.i.b16 %v542_v52, %v542_v52 }
  0xfc   : > { %v864_v58 = vperm.slane %v862_v41, 0  ;;  %v1272_v59 = vunpack.c.l.bf16 %v1208_v51  ;;  %v5249_v8 = vpack.c.bf16 %v471_v2, %v471_v2 }
  0xfd   : > { %v4606_v49 = vpop.eup %4605  ;;  %v868_v61 = vperm.slane %v866_v53, 0  ;;  %v1273_v63 = vunpack.c.l.bf16 %v1209_v54  ;;  %v700_v13 = vpack.i.b16 %v636_v60, %v636_v60  ;;  %v763_v9 = vperm.slane %v4115_v3, 0 }
  0xfe   : > { %v4608_v32 = vpop.eup %4607  ;;  %v1398_v55 = vpack.c.bf16 %v4606_v49, %v4606_v49  ;;  %v1081_v6 = vunpack.c.l.bf16 %v864_v58  ;;  %4609 = vtanh.f32 %v1272_v59  ;;  %v5258_v17 = vrot.slane %v5249_v8, 3 }
  0xff   : > { %v1399_v56 = vpack.c.bf16 %v4608_v32, %v4608_v32  ;;  %v1082_v4 = vunpack.c.l.bf16 %v868_v61  ;;  %4611 = vtanh.f32 %v1273_v63  ;;  %v764_v14 = vperm.slane %v700_v13, 0 }
 0x100   : > { %v1568_v0 = vunpack.c.l.b16 %v1398_v55  ;;  %v1146_v11 = vadd.f32 %v5187_v10, %v1081_v6  ;;  %v870_v19 = vpack.i.b16 %v763_v9, %v763_v9  ;;  %v545_v25 = vsel %vm513_vm1, %v5249_v8, %v5258_v17 }
 0x101   : > { %v1569_v1 = vunpack.c.l.b16 %v1399_v56  ;;  %v1147_v15 = vadd.f32 %v5187_v10, %v1082_v4  ;;  %v874_v21 = vpack.i.b16 %v764_v14, %v764_v14  ;;  %v638_v30 = vunpack.i.h.s16 %v545_v25 }
 0x102   : > { %1861 = vmatmul.bf16.gmra.mxu1 %v5213_v36  ;;  %2030 = vmatmul.bf16.gmra.mxu2 %v5213_v36  ;;  %v1210_v20 = vpack.c.bf16 %v1146_v11, %v1146_v11  ;;  %v872_v26 = vperm.slane %v870_v19, 0  ;;  %v4116_v35 = vpack.i.b16 %v545_v25, %v545_v25  ;;  %v547_v47 = vsel %vm518_vm2, %v5249_v8, %v5258_v17 }
 0x103   : > { %2199 = vmatmul.bf16.gmra.mxu3 %v5213_v36  ;;  %2368 = vmatmul.bf16.gmra.mxu0 %v5213_v36  ;;  %v5247_v7 = vpack.c.b16 %v1569_v1, %v1568_v0  ;;  %v1211_v22 = vpack.c.bf16 %v1147_v15, %v1147_v15  ;;  %v876_v28 = vperm.slane %v874_v21, 0  ;;  %v702_v38 = vpack.i.b16 %v638_v30, %v638_v30 }
 0x104   : > { %v4610_v16 = vpop.eup %4609  ;;  %v1274_v27 = vunpack.c.l.bf16 %v1210_v20  ;;  %v1083_v34 = vunpack.c.l.bf16 %v872_v26  ;;  %v765_v42 = vperm.slane %v4116_v35, 0  ;;  %v549_v41 = vrot.slane %v547_v47, 1 }
 0x105   : > { %v4612_v18 = vpop.eup %4611  ;;  %v1400_v23 = vpack.c.bf16 %v4610_v16, %v4610_v16  ;;  %v1275_v29 = vunpack.c.l.bf16 %v1211_v22  ;;  %v1084_v37 = vunpack.c.l.bf16 %v876_v28  ;;  %v766_v45 = vperm.slane %v702_v38, 0 }
 0x106   : > { %v1401_v24 = vpack.c.bf16 %v4612_v18, %v4612_v18  ;;  %4613 = vtanh.f32 %v1274_v27  ;;  %v1148_v40 = vadd.f32 %v5187_v10, %v1083_v34  ;;  %v878_v50 = vpack.i.b16 %v765_v42, %v765_v42 }
 0x107   : > { %v1570_v31 = vunpack.c.l.b16 %v1400_v23  ;;  %4615 = vtanh.f32 %v1275_v29  ;;  %v1149_v43 = vadd.f32 %v5187_v10, %v1084_v37  ;;  %v882_v51 = vpack.i.b16 %v766_v45, %v766_v45 }
 0x108   : > { %v1571_v33 = vunpack.c.l.b16 %v1401_v24  ;;  %v1212_v49 = vpack.c.bf16 %v1148_v40, %v1148_v40  ;;  %v880_v55 = vperm.slane %v878_v50, 0  ;;  %v640_v57 = vunpack.i.h.s16 %v549_v41 }
 0x109   : > { %v1213_v32 = vpack.c.bf16 %v1149_v43, %v1149_v43  ;;  %v884_v58 = vperm.slane %v882_v51, 0  ;;  %v4117_v61 = vpack.i.b16 %v549_v41, %v549_v41  ;;  %v550_v11 = vsel %vm522_vm3, %v5249_v8, %v5258_v17 }
 0x10a   : > { %v5263_v39 = vpack.c.b16 %v1571_v33, %v1570_v31  ;;  %v1276_v54 = vunpack.c.l.bf16 %v1212_v49  ;;  %v1085_v63 = vunpack.c.l.bf16 %v880_v55  ;;  %v704_v0 = vpack.i.b16 %v640_v57, %v640_v57 }
 0x10b   : > { %v1277_v56 = vunpack.c.l.bf16 %v1213_v32  ;;  %v1086_v1 = vunpack.c.l.bf16 %v884_v58  ;;  %v767_v3 = vperm.slane %v4117_v61, 0  ;;  %v552_v18 = vrot.slane %v550_v11, 2 }
 0x10c   : > { %v4614_v46 = vpop.eup %4613  ;;  %4617 = vtanh.f32 %v1276_v54  ;;  %v1150_v6 = vadd.f32 %v5187_v10, %v1085_v63  ;;  %v768_v13 = vperm.slane %v704_v0, 0  ;;  %v553_v45 = vsel %vm526_vm4, %v5249_v8, %v5258_v17 }
 0x10d   : > { %v4616_v48 = vpop.eup %4615  ;;  %v1402_v52 = vpack.c.bf16 %v4614_v46, %v4614_v46  ;;  %4619 = vtanh.f32 %v1277_v56  ;;  %v1151_v4 = vadd.f32 %v5187_v10, %v1086_v1  ;;  %v886_v15 = vpack.i.b16 %v767_v3, %v767_v3 }
 0x10e   : > { %v1403_v53 = vpack.c.bf16 %v4616_v48, %v4616_v48  ;;  %v1214_v16 = vpack.c.bf16 %v1150_v6, %v1150_v6  ;;  %v890_v19 = vpack.i.b16 %v768_v13, %v768_v13  ;;  %v642_v25 = vunpack.i.h.s16 %v552_v18 }
 0x10f   : > { %v1572_v59 = vunpack.c.l.b16 %v1402_v52  ;;  %v1215_v20 = vpack.c.bf16 %v1151_v4, %v1151_v4  ;;  %v888_v23 = vperm.slane %v886_v15, 0  ;;  %v4118_v30 = vpack.i.b16 %v552_v18, %v552_v18 }
 0x110   : > { %v1573_v60 = vunpack.c.l.b16 %v1403_v53  ;;  %v1278_v24 = vunpack.c.l.bf16 %v1214_v16  ;;  %v892_v26 = vperm.slane %v890_v19, 0  ;;  %v706_v33 = vpack.i.b16 %v642_v25, %v642_v25 }
 0x111   : > { %v1279_v27 = vunpack.c.l.bf16 %v1215_v20  ;;  %v1087_v31 = vunpack.c.l.bf16 %v888_v23  ;;  %v769_v37 = vperm.slane %v4118_v30, 0  ;;  %v555_v49 = vrot.slane %v553_v45, 3 }
 0x112   : > { %1866 = vmatmul.bf16.gmra.mxu1 %v5224_v62  ;;  %2035 = vmatmul.bf16.gmra.mxu2 %v5224_v62  ;;  %v5274_v2 = vpack.c.b16 %v1573_v60, %v1572_v59  ;;  %v4618_v9 = vpop.eup %4617  ;;  %4621 = vtanh.f32 %v1278_v24  ;;  %v1088_v34 = vunpack.c.l.bf16 %v892_v26  ;;  %v770_v40 = vperm.slane %v706_v33, 0  ;;  %v5304_v24 = vpop.f32.mrf.mxu1 }
 0x113   : > { %2204 = vmatmul.bf16.gmra.mxu3 %v5224_v62  ;;  %2373 = vmatmul.bf16.gmra.mxu0 %v5224_v62  ;;  %v4620_v14 = vpop.eup %4619  ;;  %v1404_v21 = vpack.c.bf16 %v4618_v9, %v4618_v9  ;;  %4623 = vtanh.f32 %v1279_v27  ;;  %v1152_v38 = vadd.f32 %v5187_v10, %v1087_v31  ;;  %v894_v47 = vpack.i.b16 %v769_v37, %v769_v37 }
 0x114   : > { %v1405_v22 = vpack.c.bf16 %v4620_v14, %v4620_v14  ;;  %v1153_v42 = vadd.f32 %v5187_v10, %v1088_v34  ;;  %v898_v50 = vpack.i.b16 %v770_v40, %v770_v40  ;;  %v644_v54 = vunpack.i.h.s16 %v555_v49 }
 0x115   : > { %v1574_v28 = vunpack.c.l.b16 %v1404_v21  ;;  %v1216_v48 = vpack.c.bf16 %v1152_v38, %v1152_v38  ;;  %v896_v52 = vperm.slane %v894_v47, 0  ;;  %v4119_v59 = vpack.i.b16 %v555_v49, %v555_v49 }
 0x116   : > { %v1575_v29 = vunpack.c.l.b16 %v1405_v22  ;;  %v1217_v32 = vpack.c.bf16 %v1153_v42, %v1153_v42  ;;  %v900_v55 = vperm.slane %v898_v50, 0  ;;  %v708_v61 = vpack.i.b16 %v644_v54, %v644_v54  ;;  %v473_v42 = vpop.f32.mrf.mxu0 }
 0x117   : > { %v1280_v53 = vunpack.c.l.bf16 %v1216_v48  ;;  %v1089_v60 = vunpack.c.l.bf16 %v896_v52  ;;  %v771_v63 = vperm.slane %v4119_v59, 0 }
 0x118   : > { %v5285_v35 = vpack.c.b16 %v1575_v29, %v1574_v28  ;;  %v4622_v43 = vpop.eup %4621  ;;  %v1281_v56 = vunpack.c.l.bf16 %v1217_v32  ;;  %v1090_v8 = vunpack.c.l.bf16 %v900_v55  ;;  %v772_v1 = vperm.slane %v708_v61, 0 }
 0x119   : > { %v4624_v46 = vpop.eup %4623  ;;  %v1406_v41 = vpack.c.bf16 %v4622_v43, %v4622_v43  ;;  %4625 = vtanh.f32 %v1280_v53  ;;  %v1154_v0 = vadd.f32 %v5187_v10, %v1089_v60  ;;  %v902_v4 = vpack.i.b16 %v771_v63, %v771_v63 }
 0x11a   : > { %v1407_v51 = vpack.c.bf16 %v4624_v46, %v4624_v46  ;;  %4627 = vtanh.f32 %v1281_v56  ;;  %v1155_v3 = vadd.f32 %v5187_v10, %v1090_v8  ;;  %v906_v11 = vpack.i.b16 %v772_v1, %v772_v1  ;;  %v5314_v34 = vpop.f32.mrf.mxu1 }
 0x11b   : > { %v1576_v57 = vunpack.c.l.b16 %v1406_v41  ;;  %v1218_v9 = vpack.c.bf16 %v1154_v0, %v1154_v0  ;;  %v904_v18 = vperm.slane %v902_v4, 0  ;;  %v474_v43 = vadd.f32 %v5157_v12, %v473_v42 }
 0x11c   : > { %v1577_v58 = vunpack.c.l.b16 %v1407_v51  ;;  %v1219_v14 = vpack.c.bf16 %v1155_v3, %v1155_v3  ;;  %v908_v20 = vperm.slane %v906_v11, 0 }
 0x11d   : > { %v1282_v19 = vunpack.c.l.bf16 %v1218_v9  ;;  %v1091_v25 = vunpack.c.l.bf16 %v904_v18  ;;  %v491_v49 = vpack.c.bf16 %v474_v43, %v474_v43 }
 0x11e   : > { %v5296_v17 = vpack.c.b16 %v1577_v58, %v1576_v57  ;;  %v1283_v21 = vunpack.c.l.bf16 %v1219_v14  ;;  %v1092_v26 = vunpack.c.l.bf16 %v908_v20 }
 0x11f   : > { %v4626_v6 = vpop.eup %4625  ;;  %4629 = vtanh.f32 %v1282_v19  ;;  %v1156_v28 = vadd.f32 %v5187_v10, %v1091_v25  ;;  %v508_v41 = vrot.slane %v491_v49, 3 }
 0x120   : > { %v4628_v13 = vpop.eup %4627  ;;  %v1408_v15 = vpack.c.bf16 %v4626_v6, %v4626_v6  ;;  %4631 = vtanh.f32 %v1283_v21  ;;  %v1157_v29 = vadd.f32 %v5187_v10, %v1092_v26 }
 0x121   : > { %v1409_v16 = vpack.c.bf16 %v4628_v13, %v4628_v13  ;;  %v1220_v33 = vpack.c.bf16 %v1156_v28, %v1156_v28  ;;  %v558_v51 = vsel %vm513_vm1, %v491_v49, %v508_v41  ;;  %v560_v52 = vsel %vm518_vm2, %v491_v49, %v508_v41 }
 0x122   : > { %1871 = vmatmul.bf16.gmra.mxu1 %v5235_v44  ;;  %2040 = vmatmul.bf16.gmra.mxu2 %v5235_v44  ;;  %v1578_v22 = vunpack.c.l.b16 %v1408_v15  ;;  %v1221_v37 = vpack.c.bf16 %v1157_v29, %v1157_v29  ;;  %v5319_v32 = vpop.f32.mrf.mxu1  ;;  %v562_v53 = vrot.slane %v560_v52, 1  ;;  %v646_v55 = vunpack.i.h.s16 %v558_v51 }
 0x123   : > { %2209 = vmatmul.bf16.gmra.mxu3 %v5235_v44  ;;  %2378 = vmatmul.bf16.gmra.mxu0 %v5235_v44  ;;  %v1579_v23 = vunpack.c.l.b16 %v1409_v16  ;;  %v1284_v45 = vunpack.c.l.bf16 %v1220_v33  ;;  %v4120_v57 = vpack.i.b16 %v558_v51, %v558_v51  ;;  %v563_v1 = vsel %vm522_vm3, %v491_v49, %v508_v41 }
 0x124   : > { %v1285_v46 = vunpack.c.l.bf16 %v1221_v37  ;;  %v648_v56 = vunpack.i.h.s16 %v562_v53  ;;  %v710_v58 = vpack.i.b16 %v646_v55, %v646_v55  ;;  %v4121_v61 = vpack.i.b16 %v562_v53, %v562_v53 }
 0x125   : > { %v5306_v27 = vpack.c.b16 %v1579_v23, %v1578_v22  ;;  %v4630_v30 = vpop.eup %4629  ;;  %4633 = vtanh.f32 %v1284_v45  ;;  %v773_v63 = vperm.slane %v4120_v57, 0  ;;  %v565_v11 = vrot.slane %v563_v1, 2 }
 0x126   : > { %v4632_v31 = vpop.eup %4631  ;;  %v1410_v38 = vpack.c.bf16 %v4630_v30, %v4630_v30  ;;  %4635 = vtanh.f32 %v1285_v46  ;;  %v712_v8 = vpack.i.b16 %v648_v56, %v648_v56  ;;  %v774_v3 = vperm.slane %v710_v58, 0 }
 0x127   : > { %v1411_v40 = vpack.c.bf16 %v4632_v31, %v4632_v31  ;;  %v775_v4 = vperm.slane %v4121_v61, 0  ;;  %v910_v14 = vpack.i.b16 %v773_v63, %v773_v63  ;;  %v650_v22 = vunpack.i.h.s16 %v565_v11 }
 0x128   : > { %v1580_v47 = vunpack.c.l.b16 %v1410_v38  ;;  %v776_v9 = vperm.slane %v712_v8, 0  ;;  %v914_v15 = vpack.i.b16 %v774_v3, %v774_v3  ;;  %v4122_v30 = vpack.i.b16 %v565_v11, %v565_v11 }
 0x129   : > { %v1581_v48 = vunpack.c.l.b16 %v1411_v40  ;;  %v912_v18 = vperm.slane %v910_v14, 0  ;;  %v918_v19 = vpack.i.b16 %v775_v4, %v775_v4  ;;  %v714_v38 = vpack.i.b16 %v650_v22, %v650_v22 }
 0x12a   : > { %v5327_v0 = vpop.f32.mrf.mxu1  ;;  %v922_v20 = vpack.i.b16 %v776_v9, %v776_v9  ;;  %v916_v21 = vperm.slane %v914_v15, 0  ;;  %v566_v46 = vsel %vm526_vm4, %v491_v49, %v508_v41  ;;  %v5353_v9 = vld [vmem:[#allocation7] ss:$0 sm:$0xff] }
 0x12b   : > { %v5317_v50 = vpack.c.b16 %v1581_v48, %v1580_v47  ;;  %v4634_v12 = vpop.eup %4633  ;;  %v920_v23 = vperm.slane %v918_v19, 0  ;;  %v1093_v26 = vunpack.c.l.bf16 %v912_v18  ;;  %v777_v47 = vperm.slane %v4122_v30, 0 }
 0x12c   : > { %v4636_v54 = vpop.eup %4635  ;;  %v1412_v59 = vpack.c.bf16 %v4634_v12, %v4634_v12  ;;  %v924_v25 = vperm.slane %v922_v20, 0  ;;  %v1094_v28 = vunpack.c.l.bf16 %v916_v21  ;;  %v778_v52 = vperm.slane %v714_v38, 0 }
 0x12d   : > { %v1413_v60 = vpack.c.bf16 %v4636_v54, %v4636_v54  ;;  %v1095_v31 = vunpack.c.l.bf16 %v920_v23  ;;  %v1158_v33 = vadd.f32 %v5187_v10, %v1093_v26  ;;  %v568_v54 = vrot.slane %v566_v46, 3 }
 0x12e   : > { %v1582_v6 = vunpack.c.l.b16 %v1412_v59  ;;  %v1096_v40 = vunpack.c.l.bf16 %v924_v25  ;;  %v1159_v42 = vadd.f32 %v5187_v10, %v1094_v28  ;;  %v926_v57 = vpack.i.b16 %v777_v47, %v777_v47 }
 0x12f   : > { %v1583_v13 = vunpack.c.l.b16 %v1413_v60  ;;  %v1222_v43 = vpack.c.bf16 %v1158_v33, %v1158_v33  ;;  %v1160_v48 = vadd.f32 %v5187_v10, %v1095_v31  ;;  %v930_v59 = vpack.i.b16 %v778_v52, %v778_v52 }
 0x130   : > { %v1223_v45 = vpack.c.bf16 %v1159_v42, %v1159_v42  ;;  %v1161_v12 = vadd.f32 %v5187_v10, %v1096_v40  ;;  %v652_v61 = vunpack.i.h.s16 %v568_v54  ;;  %v928_v63 = vperm.slane %v926_v57, 0 }
 0x131   : > { %v5330_v16 = vpack.c.b16 %v1583_v13, %v1582_v6  ;;  %v1286_v51 = vunpack.c.l.bf16 %v1222_v43  ;;  %v1224_v58 = vpack.c.bf16 %v1160_v48, %v1160_v48  ;;  %v932_v6 = vperm.slane %v930_v59, 0 }
 0x132   : > { %1876 = vmatmul.bf16.gmra.mxu1 %v5247_v7  ;;  %2045 = vmatmul.bf16.gmra.mxu2 %v5247_v7  ;;  %v1287_v53 = vunpack.c.l.bf16 %v1223_v45  ;;  %v1225_v60 = vpack.c.bf16 %v1161_v12, %v1161_v12  ;;  %v477_v11 = vadd.f32 %v5353_v9, %v5304_v24  ;;  %v4123_v15 = vpack.i.b16 %v568_v54, %v568_v54 }
 0x133   : > { %2214 = vmatmul.bf16.gmra.mxu3 %v5247_v7  ;;  %2383 = vmatmul.bf16.gmra.mxu0 %v5247_v7  ;;  %4637 = vtanh.f32 %v1286_v51  ;;  %v1288_v1 = vunpack.c.l.bf16 %v1224_v58  ;;  %v716_v18 = vpack.i.b16 %v652_v61, %v652_v61  ;;  %v1097_v22 = vunpack.c.l.bf16 %v928_v63 }
 0x134   : > { %4639 = vtanh.f32 %v1287_v53  ;;  %v1289_v13 = vunpack.c.l.bf16 %v1225_v60  ;;  %v1098_v25 = vunpack.c.l.bf16 %v932_v6  ;;  %v5365_v30 = vpack.c.bf16 %v477_v11, %v477_v11  ;;  %v1486_v60 = vld [vmem:[#allocation10] sm:$0xf] }
 0x135   : > { %4641 = vtanh.f32 %v1288_v1  ;;  %v779_v31 = vperm.slane %v4123_v15, 0  ;;  %v780_v33 = vperm.slane %v716_v18, 0  ;;  %v1162_v38 = vadd.f32 %v5187_v10, %v1097_v22  ;;  %v4454_v18 = vld [vmem:[#allocation8 + $0x154] sm:$0xf] }
 0x136   : > { %4643 = vtanh.f32 %v1289_v13  ;;  %v1163_v40 = vadd.f32 %v5187_v10, %v1098_v25  ;;  %v5376_v43 = vrot.slane %v5365_v30, 3  ;;  %v5390_v6 = vperm.slane %v1486_v60, 0 }
 0x137   : > { %v934_v46 = vpack.i.b16 %v779_v31, %v779_v31  ;;  %v938_v47 = vpack.i.b16 %v780_v33, %v780_v33  ;;  %v1226_v52 = vpack.c.bf16 %v1162_v38, %v1162_v38  ;;  %v5392_v11 = vperm.slane %v1486_v60, 3  ;;  %v4358_v31 = vld [vmem:[#allocation8 + $0x158] sm:$0xf] }
 0x138   : > { %v1227_v12 = vpack.c.bf16 %v1163_v40, %v1163_v40  ;;  %v571_v57 = vsel %vm513_vm1, %v5365_v30, %v5376_v43  ;;  %v4457_v33 = vld [vmem:[#allocation8 + $0x174] sm:$0xf0] }
 0x139   : > { %v4638_v8 = vpop.eup %4637  ;;  %v936_v61 = vperm.slane %v934_v46, 0  ;;  %v1290_v63 = vunpack.c.l.bf16 %v1226_v52  ;;  %v654_v1 = vunpack.i.h.s16 %v571_v57  ;;  %v4124_v25 = vpack.i.b16 %v571_v57, %v571_v57 }
 0x13a   : > { %v4640_v3 = vpop.eup %4639  ;;  %v1414_v4 = vpack.c.bf16 %v4638_v8, %v4638_v8  ;;  %v940_v8 = vperm.slane %v938_v47, 0  ;;  %v573_v47 = vsel %vm518_vm2, %v5365_v30, %v5376_v43 }
 0x13b   : > { %v1415_v14 = vpack.c.bf16 %v4640_v3, %v4640_v3  ;;  %v4642_v42 = vpop.eup %4641  ;;  %v1291_v3 = vunpack.c.l.bf16 %v1227_v12  ;;  %4645 = vtanh.f32 %v1290_v63  ;;  %v718_v38 = vpack.i.b16 %v654_v1, %v654_v1 }
 0x13c   : > { %v1584_v19 = vunpack.c.l.b16 %v1414_v4  ;;  %v4644_v45 = vpop.eup %4643  ;;  %v1416_v58 = vpack.c.bf16 %v4642_v42, %v4642_v42  ;;  %v1100_v15 = vunpack.c.l.bf16 %v940_v8  ;;  %v4350_v42 = vld [vmem:[#allocation8 + $0x150] sm:$0xf]  ;;  %v4359_v63 = vor.u32 %v4457_v33, %v4358_v31 }
 0x13d   : > { %v1585_v23 = vunpack.c.l.b16 %v1415_v14  ;;  %v1417_v59 = vpack.c.bf16 %v4644_v45, %v4644_v45  ;;  %v1099_v14 = vunpack.c.l.bf16 %v936_v61  ;;  %4647 = vtanh.f32 %v1291_v3  ;;  %v4360_v61 = vld [vmem:[#allocation8 + $0x178] sm:$0xf0] }
 0x13e   : > { %v1586_v13 = vunpack.c.l.b16 %v1416_v58  ;;  %v4456_v58 = vld [vmem:[#allocation8 + $0x16c] sm:$0xf0]  ;;  %v1165_v8 = vadd.f32 %v5187_v10, %v1100_v15  ;;  %v5416_v1 = vperm.slane %v1486_v60, 1  ;;  %v781_v3 = vperm.slane %v4124_v25, 0  ;;  %3322 = vmatpush.bf16.msrb.mxu3 %v4359_v63  ;;  %v4342_v63 = vld [vmem:[#allocation8 + $0x118] sm:$0xf] }
 0x13f   : > { %v5367_v24 = vpack.c.b16 %v1585_v23, %v1584_v19  ;;  %v1587_v4 = vunpack.c.l.b16 %v1417_v59  ;;  %v4352_v19 = vld [vmem:[#allocation8 + $0x170] sm:$0xf0]  ;;  %v4455_v59 = vld [vmem:[#allocation8 + $0x15c] sm:$0xf] }
 0x140   : > { %v4355_v57 = vor.u32 %v4454_v18, %v4352_v19  ;;  %v4351_v18 = vor.u32 %v4456_v58, %v4350_v42  ;;  %v4363_v19 = vor.u32 %v4455_v59, %v4360_v61 }
 0x141   : > { %v5407_v52 = vpack.c.b16 %v1587_v4, %v1586_v13 }
 0x142   : > { %1881 = vmatmul.bf16.gmra.mxu1 %v5263_v39  ;;  %2050 = vmatmul.bf16.gmra.mxu2 %v5263_v39 }
 0x143   : > { %2219 = vmatmul.bf16.gmra.mxu3 %v5263_v39  ;;  %2388 = vmatmul.bf16.gmra.mxu0 %v5263_v39 }
 0x144   : > { %3153 = vmatpush.bf16.msrb.mxu2 %v4355_v57  ;;  %2984 = vmatpush.bf16.msra.mxu1 %v4351_v18 }
 0x145   : > { %3491 = vmatpush.bf16.msra.mxu0 %v4363_v19 }
 0x152   : > { %1886 = vmatmul.bf16.gmra.mxu1 %v5274_v2  ;;  %2055 = vmatmul.bf16.gmra.mxu2 %v5274_v2 }
 0x153   : > { %2224 = vmatmul.bf16.gmra.mxu3 %v5274_v2  ;;  %2393 = vmatmul.bf16.gmra.mxu0 %v5274_v2 }
 0x162   : > { %1891 = vmatmul.bf16.gmra.mxu1 %v5285_v35  ;;  %2060 = vmatmul.bf16.gmra.mxu2 %v5285_v35 }
 0x163   : > { %2229 = vmatmul.bf16.gmra.mxu3 %v5285_v35  ;;  %2398 = vmatmul.bf16.gmra.mxu0 %v5285_v35 }
 0x16f   : > { %v5335_v29 = vpop.f32.mrf.mxu1 }
 0x170   : > { %v5339_v37 = vpop.f32.mrf.mxu0  ;;  %v1858_v40 = vadd.f32 %v5335_v29, %v5390_v6  ;;  %v1164_v29 = vadd.f32 %v5187_v10, %v1099_v14  ;;  %v782_v14 = vperm.slane %v718_v38, 0  ;;  %v942_v38 = vpack.i.b16 %v781_v3, %v781_v3  ;;  %v4453_v3 = vld [vmem:[#allocation8 + $0x134] sm:$0xf0] }
 0x171   : > { %v2365_v12 = vadd.f32 %v5339_v37, %v5392_v11  ;;  %v5419_v37 = vperm.slane %v1486_v60, 2  ;;  %v4646_v60 = vpop.eup %4645 }
 0x172   : > { %1896 = vmatmul.bf16.gmra.mxu1 %v5296_v17  ;;  %2065 = vmatmul.bf16.gmra.mxu2 %v5296_v17  ;;  %2524 = vst [vmem:[%s5413_s12] sm:$0xff] %v1858_v40  ;;  %v1228_v40 = vpack.c.bf16 %v1164_v29, %v1164_v29  ;;  %v946_v42 = vpack.i.b16 %v782_v14, %v782_v14  ;;  %v4336_v29 = vld [vmem:[#allocation8 + $0x130] sm:$0xf0] }
 0x173   : > { %2234 = vmatmul.bf16.gmra.mxu3 %v5296_v17  ;;  %2403 = vmatmul.bf16.gmra.mxu0 %v5296_v17  ;;  %2527 = vst [vmem:[%s5413_s12 + $0x18] sm:$0xff] %v2365_v12  ;;  %v1229_v12 = vpack.c.bf16 %v1165_v8, %v1165_v8  ;;  %v1418_v57 = vpack.c.bf16 %v4646_v60, %v4646_v60  ;;  %v4452_v60 = vld [vmem:[#allocation8 + $0x12c] sm:$0xf0] }
 0x175   : > { %v5345_v55 = vpop.f32.mrf.mxu2  ;;  %v1588_v18 = vunpack.c.l.b16 %v1418_v57 }
 0x176   : > { %v5347_v56 = vpop.f32.mrf.mxu3  ;;  %v2027_v15 = vadd.f32 %v5345_v55, %v5416_v1 }
 0x177   : > { %v5349_v49 = vpop.f32.mrf.mxu1  ;;  %v2196_v25 = vadd.f32 %v5347_v56, %v5419_v37  ;;  %v5442_v56 = vrot.slane %v573_v47, 1 }
 0x178   : > { %v5351_v41 = vpop.f32.mrf.mxu0  ;;  %v1860_v13 = vadd.f32 %v5349_v49, %v5390_v6  ;;  %2525 = vst [vmem:[%s5413_s12 + $0x8] sm:$0xff] %v2027_v15  ;;  %v948_v15 = vperm.slane %v946_v42, 0 }
 0x179   : > { %v2367_v4 = vadd.f32 %v5351_v41, %v5392_v11  ;;  %v4648_v41 = vpop.eup %4647  ;;  %2526 = vst [vmem:[%s5413_s12 + $0x10] sm:$0xff] %v2196_v25 }
 0x17a   : > { %2528 = vst [vmem:[%s5413_s12 + $0x40] sm:$0xff] %v1860_v13  ;;  %v1419_v59 = vpack.c.bf16 %v4648_v41, %v4648_v41  ;;  %v944_v13 = vperm.slane %v942_v38, 0  ;;  %v4451_v38 = vld [vmem:[#allocation8 + $0x11c] sm:$0xf] }
 0x17b   : > { %2531 = vst [vmem:[%s5413_s12 + $0x58] sm:$0xff] %v2367_v4  ;;  %v1292_v4 = vunpack.c.l.bf16 %v1228_v40  ;;  %v4125_v40 = vpack.i.b16 %v5442_v56, %v5442_v56 }
 0x17c   : > { %v1589_v25 = vunpack.c.l.b16 %v1419_v59  ;;  %v1102_v59 = vunpack.c.l.bf16 %v948_v15 }
 0x17d   : > { %v5357_v20 = vpop.f32.mrf.mxu2  ;;  %4649 = vtanh.f32 %v1292_v4  ;;  %v576_v4 = vsel %vm522_vm3, %v5365_v30, %v5376_v43 }
 0x17e   : > { %v5359_v21 = vpop.f32.mrf.mxu3  ;;  %v2029_v49 = vadd.f32 %v5357_v20, %v5416_v1 }
 0x17f   : > { %v5361_v26 = vpop.f32.mrf.mxu1  ;;  %v2198_v55 = vadd.f32 %v5359_v21, %v5419_v37 }
 0x180   : > { %v5363_v28 = vpop.f32.mrf.mxu0  ;;  %v1863_v20 = vadd.f32 %v5361_v26, %v5390_v6  ;;  %2529 = vst [vmem:[%s5413_s12 + $0x48] sm:$0xff] %v2029_v49  ;;  %v4450_v26 = vld [vmem:[#allocation8 + $0x114] sm:$0xf] }
 0x181   : > { %v2370_v21 = vadd.f32 %v5363_v28, %v5392_v11  ;;  %2530 = vst [vmem:[%s5413_s12 + $0x50] sm:$0xff] %v2198_v55  ;;  %v656_v28 = vunpack.i.h.s16 %v5442_v56  ;;  %v4339_v41 = vor.u32 %v4450_v26, %v4336_v29  ;;  %v4343_v55 = vor.u32 %v4453_v3, %v4342_v63 }
 0x182   : > { %1901 = vmatmul.bf16.gmra.mxu1 %v5306_v27  ;;  %2070 = vmatmul.bf16.gmra.mxu2 %v5306_v27  ;;  %2532 = vst [vmem:[%s5413_s12 + $0x80] sm:$0xff] %v1863_v20  ;;  %v5480_v29 = vpack.c.b16 %v1589_v25, %v1588_v18  ;;  %v783_v63 = vperm.slane %v4125_v40, 0 }
 0x183   : > { %2239 = vmatmul.bf16.gmra.mxu3 %v5306_v27  ;;  %2408 = vmatmul.bf16.gmra.mxu0 %v5306_v27  ;;  %2535 = vst [vmem:[%s5413_s12 + $0x98] sm:$0xff] %v2370_v21  ;;  %v720_v57 = vpack.i.b16 %v656_v28, %v656_v28  ;;  %v1101_v21 = vunpack.c.l.bf16 %v944_v13  ;;  %v1167_v13 = vadd.f32 %v5187_v10, %v1102_v59 }
 0x184   : > { %3154 = vmatpush.bf16.msrb.mxu2 %v4339_v41  ;;  %3323 = vmatpush.bf16.msrb.mxu3 %v4343_v55  ;;  %v950_v18 = vpack.i.b16 %v783_v63, %v783_v63 }
 0x185   : > { %v5378_v48 = vpop.f32.mrf.mxu2  ;;  %v784_v28 = vperm.slane %v720_v57, 0 }
 0x186   : > { %v5380_v51 = vpop.f32.mrf.mxu3  ;;  %v2032_v61 = vadd.f32 %v5378_v48, %v5416_v1  ;;  %v1293_v48 = vunpack.c.l.bf16 %v1229_v12 }
 0x187   : > { %v5382_v53 = vpop.f32.mrf.mxu1  ;;  %v2201_v8 = vadd.f32 %v5380_v51, %v5419_v37  ;;  %v4334_v51 = vld [vmem:[#allocation8 + $0x110] sm:$0xf]  ;;  %v954_v25 = vpack.i.b16 %v784_v28, %v784_v28 }
 0x188   : > { %v5384_v54 = vpop.f32.mrf.mxu0  ;;  %v1865_v14 = vadd.f32 %v5382_v53, %v5390_v6  ;;  %2533 = vst [vmem:[%s5413_s12 + $0x88] sm:$0xff] %v2032_v61  ;;  %v4344_v53 = vld [vmem:[#allocation8 + $0x138] sm:$0xf0]  ;;  %v4335_v12 = vor.u32 %v4452_v60, %v4334_v51  ;;  %4651 = vtanh.f32 %v1293_v48  ;;  %v578_v60 = vrot.slane %v576_v4, 2 }
 0x189   : > { %v2372_v19 = vadd.f32 %v5384_v54, %v5392_v11  ;;  %2534 = vst [vmem:[%s5413_s12 + $0x90] sm:$0xff] %v2201_v8  ;;  %v4347_v26 = vor.u32 %v4451_v38, %v4344_v53 }
 0x18a   : > { %2536 = vst [vmem:[%s5413_s12 + $0xc0] sm:$0xff] %v1865_v14  ;;  %2985 = vmatpush.bf16.msra.mxu1 %v4335_v12 }
 0x18b   : > { %2539 = vst [vmem:[%s5413_s12 + $0xd8] sm:$0xff] %v2372_v19  ;;  %3492 = vmatpush.bf16.msra.mxu0 %v4347_v26  ;;  %v4126_v26 = vpack.i.b16 %v578_v60, %v578_v60 }
 0x18d   : > { %v5394_v22 = vpop.f32.mrf.mxu2 }
 0x18e   : > { %v5396_v23 = vpop.f32.mrf.mxu3  ;;  %v2034_v49 = vadd.f32 %v5394_v22, %v5416_v1 }
 0x18f   : > { %v5400_v45 = vpop.f32.mrf.mxu1  ;;  %v2203_v54 = vadd.f32 %v5396_v23, %v5419_v37 }
 0x190   : > { %v5402_v46 = vpop.f32.mrf.mxu0  ;;  %v1868_v22 = vadd.f32 %v5400_v45, %v5390_v6  ;;  %2537 = vst [vmem:[%s5413_s12 + $0xc8] sm:$0xff] %v2034_v49  ;;  %v1231_v49 = vpack.c.bf16 %v1167_v13, %v1167_v13 }
 0x191   : > { %v2375_v23 = vadd.f32 %v5402_v46, %v5392_v11  ;;  %2538 = vst [vmem:[%s5413_s12 + $0xd0] sm:$0xff] %v2203_v54  ;;  %v1166_v46 = vadd.f32 %v5187_v10, %v1101_v21  ;;  %v658_v21 = vunpack.i.h.s16 %v578_v60 }
 0x192   : > { %1906 = vmatmul.bf16.gmra.mxu1 %v5317_v50  ;;  %2075 = vmatmul.bf16.gmra.mxu2 %v5317_v50  ;;  %2540 = vst [vmem:[%s5413_s12 + $0x100] sm:$0xff] %v1868_v22  ;;  %v956_v22 = vperm.slane %v954_v25, 0  ;;  %v1295_v59 = vunpack.c.l.bf16 %v1231_v49 }
 0x193   : > { %2244 = vmatmul.bf16.gmra.mxu3 %v5317_v50  ;;  %2413 = vmatmul.bf16.gmra.mxu0 %v5317_v50  ;;  %2543 = vst [vmem:[%s5413_s12 + $0x118] sm:$0xff] %v2375_v23  ;;  %v1230_v19 = vpack.c.bf16 %v1166_v46, %v1166_v46  ;;  %v722_v28 = vpack.i.b16 %v658_v21, %v658_v21 }
 0x194   : > { %v1104_v13 = vunpack.c.l.bf16 %v956_v22 }
 0x195   : > { %v5438_v31 = vpop.f32.mrf.mxu2  ;;  %v1294_v12 = vunpack.c.l.bf16 %v1230_v19 }
 0x196   : > { %v5440_v33 = vpop.f32.mrf.mxu3  ;;  %v2037_v45 = vadd.f32 %v5438_v31, %v5416_v1 }
 0x197   : > { %v1869_v58 = vpop.f32.mrf.mxu1  ;;  %v2206_v8 = vadd.f32 %v5440_v33, %v5419_v37  ;;  %v4650_v33 = vpop.eup %4649  ;;  %4653 = vtanh.f32 %v1294_v12 }
 0x198   : > { %v5451_v47 = vpop.f32.mrf.mxu0  ;;  %v1870_v3 = vadd.f32 %v1869_v58, %v5390_v6  ;;  %2541 = vst [vmem:[%s5413_s12 + $0x108] sm:$0xff] %v2037_v45  ;;  %v4652_v14 = vpop.eup %4651  ;;  %v1420_v53 = vpack.c.bf16 %v4650_v33, %v4650_v33  ;;  %4655 = vtanh.f32 %v1295_v59 }
 0x199   : > { %v2377_v31 = vadd.f32 %v5451_v47, %v5392_v11  ;;  %2542 = vst [vmem:[%s5413_s12 + $0x110] sm:$0xff] %v2206_v8  ;;  %v1421_v40 = vpack.c.bf16 %v4652_v14, %v4652_v14 }
 0x19a   : > { %2544 = vst [vmem:[%s5413_s12 + $0x140] sm:$0xff] %v1870_v3 }
 0x19b   : > { %2547 = vst [vmem:[%s5413_s12 + $0x158] sm:$0xff] %v2377_v31 }
 0x19d   : > { %v2038_v20 = vpop.f32.mrf.mxu2  ;;  %v4654_v19 = vpop.eup %4653 }
 0x19e   : > { %v2207_v42 = vpop.f32.mrf.mxu3  ;;  %v2039_v58 = vadd.f32 %v2038_v20, %v5416_v1  ;;  %v4656_v60 = vpop.eup %4655 }
 0x19f   : > { %v1872_v56 = vpop.f32.mrf.mxu1  ;;  %v2208_v15 = vadd.f32 %v2207_v42, %v5419_v37  ;;  %v952_v42 = vperm.slane %v950_v18, 0  ;;  %v1169_v18 = vadd.f32 %v5187_v10, %v1104_v13  ;;  %v1423_v12 = vpack.c.bf16 %v4656_v60, %v4656_v60 }
 0x1a0   : > { %v2379_v61 = vpop.f32.mrf.mxu0  ;;  %v1873_v51 = vadd.f32 %v1872_v56, %v5390_v6  ;;  %2545 = vst [vmem:[%s5413_s12 + $0x148] sm:$0xff] %v2039_v58  ;;  %v1590_v56 = vunpack.c.l.b16 %v1420_v53 }
 0x1a1   : > { %v2380_v41 = vadd.f32 %v2379_v61, %v5392_v11  ;;  %2546 = vst [vmem:[%s5413_s12 + $0x150] sm:$0xff] %v2208_v15  ;;  %v1591_v61 = vunpack.c.l.b16 %v1421_v40  ;;  %v1103_v63 = vunpack.c.l.bf16 %v952_v42  ;;  %v785_v15 = vperm.slane %v4126_v26, 0 }
 0x1a2   : > { %1911 = vmatmul.bf16.gmra.mxu1 %v5330_v16  ;;  %2080 = vmatmul.bf16.gmra.mxu2 %v5330_v16  ;;  %2548 = vst [vmem:[%s5413_s12 + $0x180] sm:$0xff] %v1873_v51  ;;  %v579_v51 = vsel %vm526_vm4, %v5365_v30, %v5376_v43  ;;  %v1422_v42 = vpack.c.bf16 %v4654_v19, %v4654_v19 }
 0x1a3   : > { %2249 = vmatmul.bf16.gmra.mxu3 %v5330_v16  ;;  %2418 = vmatmul.bf16.gmra.mxu0 %v5330_v16  ;;  %2551 = vst [vmem:[%s5413_s12 + $0x198] sm:$0xff] %v2380_v41  ;;  %v5524_v4 = vpack.c.b16 %v1591_v61, %v1590_v56  ;;  %v958_v41 = vpack.i.b16 %v785_v15, %v785_v15  ;;  %v581_v40 = vrot.slane %v579_v51, 3 }
 0x1a4   : > { %v480_v26 = vadd.f32 %v5353_v9, %v5314_v34 }
 0x1a5   : > { %v2041_v48 = vpop.f32.mrf.mxu2  ;;  %v960_v22 = vperm.slane %v958_v41, 0 }
 0x1a6   : > { %v2210_v47 = vpop.f32.mrf.mxu3  ;;  %v2042_v54 = vadd.f32 %v2041_v48, %v5416_v1  ;;  %v1168_v48 = vadd.f32 %v5187_v10, %v1103_v63  ;;  %v4127_v63 = vpack.i.b16 %v581_v40, %v581_v40  ;;  %v5553_v34 = vpack.c.bf16 %v480_v26, %v480_v26 }
 0x1a7   : > { %v1874_v55 = vpop.f32.mrf.mxu1  ;;  %v2211_v20 = vadd.f32 %v2210_v47, %v5419_v37  ;;  %v786_v47 = vperm.slane %v722_v28, 0  ;;  %v1105_v28 = vunpack.c.l.bf16 %v960_v22 }
 0x1a8   : > { %v2381_v38 = vpop.f32.mrf.mxu0  ;;  %v1875_v57 = vadd.f32 %v1874_v55, %v5390_v6  ;;  %2549 = vst [vmem:[%s5413_s12 + $0x188] sm:$0xff] %v2042_v54  ;;  %v1232_v55 = vpack.c.bf16 %v1168_v48, %v1168_v48 }
 0x1a9   : > { %v2382_v23 = vadd.f32 %v2381_v38, %v5392_v11  ;;  %2550 = vst [vmem:[%s5413_s12 + $0x190] sm:$0xff] %v2211_v20  ;;  %v962_v54 = vpack.i.b16 %v786_v47, %v786_v47  ;;  %v1233_v20 = vpack.c.bf16 %v1169_v18, %v1169_v18  ;;  %v787_v18 = vperm.slane %v4127_v63, 0 }
 0x1aa   : > { %2552 = vst [vmem:[%s5413_s12 + $0x1c0] sm:$0xff] %v1875_v57  ;;  %v1296_v59 = vunpack.c.l.bf16 %v1232_v55  ;;  %v1170_v19 = vadd.f32 %v5187_v10, %v1105_v28 }
 0x1ab   : > { %2555 = vst [vmem:[%s5413_s12 + $0x1d8] sm:$0xff] %v2382_v23  ;;  %v660_v23 = vunpack.i.h.s16 %v581_v40  ;;  %v964_v56 = vperm.slane %v962_v54, 0  ;;  %v1297_v61 = vunpack.c.l.bf16 %v1233_v20  ;;  %v966_v55 = vpack.i.b16 %v787_v18, %v787_v18 }
 0x1ac   : > { %4657 = vtanh.f32 %v1296_v59  ;;  %v1234_v40 = vpack.c.bf16 %v1170_v19, %v1170_v19 }
 0x1ad   : > { %v2043_v45 = vpop.f32.mrf.mxu2  ;;  %4659 = vtanh.f32 %v1297_v61 }
 0x1ae   : > { %v2212_v8 = vpop.f32.mrf.mxu3  ;;  %v2044_v46 = vadd.f32 %v2043_v45, %v5416_v1  ;;  %v1592_v45 = vunpack.c.l.b16 %v1422_v42  ;;  %v1298_v61 = vunpack.c.l.bf16 %v1234_v40 }
 0x1af   : > { %v2213_v3 = vadd.f32 %v2212_v8, %v5419_v37  ;;  %v1877_v31 = vpop.f32.mrf.mxu1  ;;  %v1593_v8 = vunpack.c.l.b16 %v1423_v12 }
 0x1b0   : > { %v2384_v33 = vpop.f32.mrf.mxu0  ;;  %2553 = vst [vmem:[%s5413_s12 + $0x1c8] sm:$0xff] %v2044_v46  ;;  %v1878_v58 = vadd.f32 %v1877_v31, %v5390_v6  ;;  %4661 = vtanh.f32 %v1298_v61 }
 0x1b1   : > { %v2385_v14 = vadd.f32 %v2384_v33, %v5392_v11  ;;  %2554 = vst [vmem:[%s5413_s12 + $0x1d0] sm:$0xff] %v2213_v3  ;;  %v724_v33 = vpack.i.b16 %v660_v23, %v660_v23  ;;  %v5555_v15 = vpack.c.b16 %v1593_v8, %v1592_v45 }
 0x1b2   : > { %1916 = vmatmul.bf16.gmra.mxu1 %v5367_v24  ;;  %2085 = vmatmul.bf16.gmra.mxu2 %v5367_v24  ;;  %2556 = vst [vmem:[%s5413_s12 + $0x200] sm:$0xff] %v1878_v58  ;;  %v1106_v58 = vunpack.c.l.bf16 %v964_v56  ;;  %v968_v56 = vperm.slane %v966_v55, 0 }
 0x1b3   : > { %2254 = vmatmul.bf16.gmra.mxu3 %v5367_v24  ;;  %2423 = vmatmul.bf16.gmra.mxu0 %v5367_v24  ;;  %2559 = vst [vmem:[%s5413_s12 + $0x218] sm:$0xff] %v2385_v14  ;;  %v788_v51 = vperm.slane %v724_v33, 0 }
 0x1b4   : > { %v1171_v60 = vadd.f32 %v5187_v10, %v1106_v58 }
 0x1b5   : > { %v2046_v25 = vpop.f32.mrf.mxu2 }
 0x1b6   : > { %v2215_v49 = vpop.f32.mrf.mxu3  ;;  %v2047_v38 = vadd.f32 %v2046_v25, %v5416_v1  ;;  %v5566_v25 = vrot.slane %v5553_v34, 3 }
 0x1b7   : > { %v2216_v53 = vadd.f32 %v2215_v49, %v5419_v37  ;;  %v1879_v30 = vpop.f32.mrf.mxu1  ;;  %v4658_v49 = vpop.eup %4657 }
 0x1b8   : > { %v2386_v43 = vpop.f32.mrf.mxu0  ;;  %2557 = vst [vmem:[%s5413_s12 + $0x208] sm:$0xff] %v2047_v38  ;;  %v1880_v57 = vadd.f32 %v1879_v30, %v5390_v6  ;;  %v4660_v41 = vpop.eup %4659  ;;  %v970_v30 = vpack.i.b16 %v788_v51, %v788_v51  ;;  %v584_v42 = vsel %vm513_vm1, %v5553_v34, %v5566_v25 }
 0x1b9   : > { %v2387_v21 = vadd.f32 %v2386_v43, %v5392_v11  ;;  %2558 = vst [vmem:[%s5413_s12 + $0x210] sm:$0xff] %v2216_v53  ;;  %v1235_v43 = vpack.c.bf16 %v1171_v60, %v1171_v60  ;;  %v1425_v22 = vpack.c.bf16 %v4660_v41, %v4660_v41  ;;  %v662_v8 = vunpack.i.h.s16 %v584_v42  ;;  %v4662_v40 = vpop.eup %4661 }
 0x1ba   : > { %2560 = vst [vmem:[%s5413_s12 + $0x240] sm:$0xff] %v1880_v57  ;;  %v972_v26 = vperm.slane %v970_v30, 0  ;;  %v4326_v30 = vld [vmem:[#allocation8 + $0xd8] sm:$0xf] }
 0x1bb   : > { %2563 = vst [vmem:[%s5413_s12 + $0x258] sm:$0xff] %v2387_v21  ;;  %v1424_v21 = vpack.c.bf16 %v4658_v49, %v4658_v49  ;;  %v1299_v45 = vunpack.c.l.bf16 %v1235_v43  ;;  %v4449_v43 = vld [vmem:[#allocation8 + $0xf4] sm:$0xf0] }
 0x1bd   : > { %v2048_v46 = vpop.f32.mrf.mxu2  ;;  %v1594_v63 = vunpack.c.l.b16 %v1424_v21  ;;  %4663 = vtanh.f32 %v1299_v45 }
 0x1be   : > { %v2217_v3 = vpop.f32.mrf.mxu3  ;;  %v2049_v13 = vadd.f32 %v2048_v46, %v5416_v1  ;;  %v1595_v46 = vunpack.c.l.b16 %v1425_v22  ;;  %v4327_v22 = vor.u32 %v4449_v43, %v4326_v30 }
 0x1bf   : > { %v2218_v31 = vadd.f32 %v2217_v3, %v5419_v37  ;;  %v1882_v9 = vpop.f32.mrf.mxu1  ;;  %v1107_v3 = vunpack.c.l.bf16 %v968_v56 }
 0x1c0   : > { %v2389_v14 = vpop.f32.mrf.mxu0  ;;  %2561 = vst [vmem:[%s5413_s12 + $0x248] sm:$0xff] %v2049_v13  ;;  %v1883_v48 = vadd.f32 %v1882_v9, %v5390_v6  ;;  %v1108_v9 = vunpack.c.l.bf16 %v972_v26  ;;  %v5585_v18 = vpack.c.b16 %v1595_v46, %v1594_v63  ;;  %3324 = vmatpush.bf16.msrb.mxu3 %v4327_v22  ;;  %v1426_v46 = vpack.c.bf16 %v4662_v40, %v4662_v40 }
 0x1c1   : > { %v2390_v47 = vadd.f32 %v2389_v14, %v5392_v11  ;;  %2562 = vst [vmem:[%s5413_s12 + $0x250] sm:$0xff] %v2218_v31  ;;  %v4128_v31 = vpack.i.b16 %v584_v42, %v584_v42  ;;  %v726_v14 = vpack.i.b16 %v662_v8, %v662_v8  ;;  %v1172_v60 = vadd.f32 %v5187_v10, %v1107_v3 }
 0x1c2   : > { %1921 = vmatmul.bf16.gmra.mxu1 %v5407_v52  ;;  %2090 = vmatmul.bf16.gmra.mxu2 %v5407_v52  ;;  %2564 = vst [vmem:[%s5413_s12 + $0x280] sm:$0xff] %v1883_v48  ;;  %v1173_v41 = vadd.f32 %v5187_v10, %v1108_v9 }
 0x1c3   : > { %2259 = vmatmul.bf16.gmra.mxu3 %v5407_v52  ;;  %2428 = vmatmul.bf16.gmra.mxu0 %v5407_v52  ;;  %2567 = vst [vmem:[%s5413_s12 + $0x298] sm:$0xff] %v2390_v47  ;;  %v789_v49 = vperm.slane %v4128_v31, 0  ;;  %v790_v55 = vperm.slane %v726_v14, 0  ;;  %v4664_v42 = vpop.eup %4663 }
 0x1c4   : > { %v1237_v61 = vpack.c.bf16 %v1173_v41, %v1173_v41  ;;  %v1427_v3 = vpack.c.bf16 %v4664_v42, %v4664_v42  ;;  %v4328_v41 = vld [vmem:[#allocation8 + $0xf8] sm:$0xf0] }
 0x1c5   : > { %v2051_v38 = vpop.f32.mrf.mxu2  ;;  %v978_v45 = vpack.i.b16 %v790_v55, %v790_v55 }
 0x1c6   : > { %v2220_v53 = vpop.f32.mrf.mxu3  ;;  %v2052_v54 = vadd.f32 %v2051_v38, %v5416_v1  ;;  %v4446_v38 = vld [vmem:[#allocation8 + $0xd4] sm:$0xf] }
 0x1c7   : > { %v2221_v20 = vadd.f32 %v2220_v53, %v5419_v37  ;;  %v1884_v12 = vpop.f32.mrf.mxu1  ;;  %v4320_v53 = vld [vmem:[#allocation8 + $0xf0] sm:$0xf0]  ;;  %v980_v14 = vperm.slane %v978_v45, 0 }
 0x1c8   : > { %v2391_v57 = vpop.f32.mrf.mxu0  ;;  %2565 = vst [vmem:[%s5413_s12 + $0x288] sm:$0xff] %v2052_v54  ;;  %v1885_v59 = vadd.f32 %v1884_v12, %v5390_v6  ;;  %v586_v54 = vsel %vm518_vm2, %v5553_v34, %v5566_v25  ;;  %v1236_v12 = vpack.c.bf16 %v1172_v60, %v1172_v60 }
 0x1c9   : > { %v2392_v23 = vadd.f32 %v2391_v57, %v5392_v11  ;;  %2566 = vst [vmem:[%s5413_s12 + $0x290] sm:$0xff] %v2221_v20  ;;  %v4323_v20 = vor.u32 %v4446_v38, %v4320_v53  ;;  %v588_v26 = vrot.slane %v586_v54, 1  ;;  %v1110_v42 = vunpack.c.l.bf16 %v980_v14 }
 0x1ca   : > { %2568 = vst [vmem:[%s5413_s12 + $0x2c0] sm:$0xff] %v1885_v59  ;;  %v974_v59 = vpack.i.b16 %v789_v49, %v789_v49  ;;  %v1300_v31 = vunpack.c.l.bf16 %v1236_v12  ;;  %v4447_v49 = vld [vmem:[#allocation8 + $0xdc] sm:$0xf] }
 0x1cb   : > { %2571 = vst [vmem:[%s5413_s12 + $0x2d8] sm:$0xff] %v2392_v23  ;;  %3155 = vmatpush.bf16.msrb.mxu2 %v4323_v20  ;;  %v664_v9 = vunpack.i.h.s16 %v588_v26  ;;  %v4129_v55 = vpack.i.b16 %v588_v26, %v588_v26  ;;  %v4331_v40 = vor.u32 %v4447_v49, %v4328_v41  ;;  %v1175_v26 = vadd.f32 %v5187_v10, %v1110_v42 }
 0x1cc   : > { %4665 = vtanh.f32 %v1300_v31 }
 0x1cd   : > { %v2053_v28 = vpop.f32.mrf.mxu2  ;;  %v728_v43 = vpack.i.b16 %v664_v9, %v664_v9  ;;  %3493 = vmatpush.bf16.msra.mxu0 %v4331_v40  ;;  %v1239_v14 = vpack.c.bf16 %v1175_v26, %v1175_v26 }
 0x1ce   : > { %v2222_v13 = vpop.f32.mrf.mxu3  ;;  %v2054_v33 = vadd.f32 %v2053_v28, %v5416_v1 }
 0x1cf   : > { %v2223_v58 = vadd.f32 %v2222_v13, %v5419_v37  ;;  %v1887_v48 = vpop.f32.mrf.mxu1  ;;  %v1303_v40 = vunpack.c.l.bf16 %v1239_v14 }
 0x1d0   : > { %v2394_v47 = vpop.f32.mrf.mxu0  ;;  %2569 = vst [vmem:[%s5413_s12 + $0x2c8] sm:$0xff] %v2054_v33  ;;  %v1888_v19 = vadd.f32 %v1887_v48, %v5390_v6  ;;  %v976_v33 = vperm.slane %v974_v59, 0  ;;  %v4318_v48 = vld [vmem:[#allocation8 + $0xd0] sm:$0xf] }
 0x1d1   : > { %v2395_v51 = vadd.f32 %v2394_v47, %v5392_v11  ;;  %2570 = vst [vmem:[%s5413_s12 + $0x2d0] sm:$0xff] %v2223_v58  ;;  %v1301_v58 = vunpack.c.l.bf16 %v1237_v61  ;;  %v4448_v47 = vld [vmem:[#allocation8 + $0xec] sm:$0xf0]  ;;  %v792_v61 = vperm.slane %v728_v43, 0 }
 0x1d2   : > { %1926 = vmatmul.bf16.gmra.mxu1 %v5480_v29  ;;  %2095 = vmatmul.bf16.gmra.mxu2 %v5480_v29  ;;  %2572 = vst [vmem:[%s5413_s12 + $0x300] sm:$0xff] %v1888_v19  ;;  %v1596_v19 = vunpack.c.l.b16 %v1426_v46  ;;  %v4319_v60 = vor.u32 %v4448_v47, %v4318_v48  ;;  %v1109_v54 = vunpack.c.l.bf16 %v976_v33  ;;  %v4666_v45 = vpop.eup %4665 }
 0x1d3   : > { %2264 = vmatmul.bf16.gmra.mxu3 %v5480_v29  ;;  %2433 = vmatmul.bf16.gmra.mxu0 %v5480_v29  ;;  %2575 = vst [vmem:[%s5413_s12 + $0x318] sm:$0xff] %v2395_v51  ;;  %v1597_v51 = vunpack.c.l.b16 %v1427_v3  ;;  %4667 = vtanh.f32 %v1301_v58  ;;  %v986_v9 = vpack.i.b16 %v792_v61, %v792_v61 }
 0x1d4   : > { %2986 = vmatpush.bf16.msra.mxu1 %v4319_v60 }
 0x1d5   : > { %v2056_v57 = vpop.f32.mrf.mxu2 }
 0x1d6   : > { %v2225_v21 = vpop.f32.mrf.mxu3  ;;  %v2057_v23 = vadd.f32 %v2056_v57, %v5416_v1 }
 0x1d7   : > { %v2226_v56 = vadd.f32 %v2225_v21, %v5419_v37  ;;  %v1889_v8 = vpop.f32.mrf.mxu1  ;;  %v5612_v21 = vpack.c.b16 %v1597_v51, %v1596_v19  ;;  %v1428_v19 = vpack.c.bf16 %v4666_v45, %v4666_v45 }
 0x1d8   : > { %v2396_v63 = vpop.f32.mrf.mxu0  ;;  %2573 = vst [vmem:[%s5413_s12 + $0x308] sm:$0xff] %v2057_v23  ;;  %v1890_v28 = vadd.f32 %v1889_v8, %v5390_v6  ;;  %v791_v23 = vperm.slane %v4129_v55, 0  ;;  %v589_v8 = vsel %vm522_vm3, %v5553_v34, %v5566_v25 }
 0x1d9   : > { %v2397_v13 = vadd.f32 %v2396_v63, %v5392_v11  ;;  %2574 = vst [vmem:[%s5413_s12 + $0x310] sm:$0xff] %v2226_v56  ;;  %v1174_v56 = vadd.f32 %v5187_v10, %v1109_v54  ;;  %v4668_v63 = vpop.eup %4667  ;;  %v591_v58 = vrot.slane %v589_v8, 2  ;;  %v1598_v54 = vunpack.c.l.b16 %v1428_v19 }
 0x1da   : > { %2576 = vst [vmem:[%s5413_s12 + $0x340] sm:$0xff] %v1890_v28  ;;  %v982_v28 = vpack.i.b16 %v791_v23, %v791_v23  ;;  %v1429_v51 = vpack.c.bf16 %v4668_v63, %v4668_v63 }
 0x1db   : > { %2579 = vst [vmem:[%s5413_s12 + $0x358] sm:$0xff] %v2397_v13  ;;  %v1238_v13 = vpack.c.bf16 %v1174_v56, %v1174_v56 }
 0x1dc   : > { %v984_v41 = vperm.slane %v982_v28, 0 }
 0x1dd   : > { %v2058_v38 = vpop.f32.mrf.mxu2  ;;  %v1302_v55 = vunpack.c.l.bf16 %v1238_v13 }
 0x1de   : > { %v2227_v53 = vpop.f32.mrf.mxu3  ;;  %v2059_v20 = vadd.f32 %v2058_v38, %v5416_v1  ;;  %v666_v38 = vunpack.i.h.s16 %v591_v58 }
 0x1df   : > { %v2228_v30 = vadd.f32 %v2227_v53, %v5419_v37  ;;  %v1892_v12 = vpop.f32.mrf.mxu1  ;;  %v988_v53 = vperm.slane %v986_v9, 0  ;;  %4669 = vtanh.f32 %v1302_v55 }
 0x1e0   : > { %v2399_v57 = vpop.f32.mrf.mxu0  ;;  %2577 = vst [vmem:[%s5413_s12 + $0x348] sm:$0xff] %v2059_v20  ;;  %v1893_v22 = vadd.f32 %v1892_v12, %v5390_v6  ;;  %v1599_v20 = vunpack.c.l.b16 %v1429_v51  ;;  %v1111_v12 = vunpack.c.l.bf16 %v984_v41  ;;  %4671 = vtanh.f32 %v1303_v40 }
 0x1e1   : > { %v2400_v59 = vadd.f32 %v2399_v57, %v5392_v11  ;;  %2578 = vst [vmem:[%s5413_s12 + $0x350] sm:$0xff] %v2228_v30  ;;  %v4130_v30 = vpack.i.b16 %v591_v58, %v591_v58  ;;  %v1112_v23 = vunpack.c.l.bf16 %v988_v53 }
 0x1e2   : > { %1931 = vmatmul.bf16.gmra.mxu1 %v5524_v4  ;;  %2100 = vmatmul.bf16.gmra.mxu2 %v5524_v4  ;;  %2580 = vst [vmem:[%s5413_s12 + $0x380] sm:$0xff] %v1893_v22  ;;  %v5639_v26 = vpack.c.b16 %v1599_v20, %v1598_v54 }
 0x1e3   : > { %2269 = vmatmul.bf16.gmra.mxu3 %v5524_v4  ;;  %2438 = vmatmul.bf16.gmra.mxu0 %v5524_v4  ;;  %2583 = vst [vmem:[%s5413_s12 + $0x398] sm:$0xff] %v2400_v59  ;;  %v730_v59 = vpack.i.b16 %v666_v38, %v666_v38  ;;  %v793_v63 = vperm.slane %v4130_v30, 0  ;;  %v1177_v28 = vadd.f32 %v5187_v10, %v1112_v23 }
 0x1e5   : > { %v2061_v46 = vpop.f32.mrf.mxu2  ;;  %v4670_v13 = vpop.eup %4669  ;;  %v990_v14 = vpack.i.b16 %v793_v63, %v793_v63 }
 0x1e6   : > { %v2230_v3 = vpop.f32.mrf.mxu3  ;;  %v2062_v31 = vadd.f32 %v2061_v46, %v5416_v1  ;;  %v1176_v46 = vadd.f32 %v5187_v10, %v1111_v12  ;;  %v1430_v41 = vpack.c.bf16 %v4670_v13, %v4670_v13 }
 0x1e7   : > { %v2231_v33 = vadd.f32 %v2230_v3, %v5419_v37  ;;  %v1894_v48 = vpop.f32.mrf.mxu1  ;;  %v794_v3 = vperm.slane %v730_v59, 0  ;;  %v992_v40 = vperm.slane %v990_v14, 0 }
 0x1e8   : > { %v2401_v47 = vpop.f32.mrf.mxu0  ;;  %2581 = vst [vmem:[%s5413_s12 + $0x388] sm:$0xff] %v2062_v31  ;;  %v1895_v60 = vadd.f32 %v1894_v48, %v5390_v6  ;;  %v592_v31 = vsel %vm526_vm4, %v5553_v34, %v5566_v25  ;;  %v1240_v48 = vpack.c.bf16 %v1176_v46, %v1176_v46 }
 0x1e9   : > { %v2402_v49 = vadd.f32 %v2401_v47, %v5392_v11  ;;  %2582 = vst [vmem:[%s5413_s12 + $0x390] sm:$0xff] %v2231_v33  ;;  %v4672_v33 = vpop.eup %4671  ;;  %v594_v51 = vrot.slane %v592_v31, 3 }
 0x1ea   : > { %2584 = vst [vmem:[%s5413_s12 + $0x3c0] sm:$0xff] %v1895_v60  ;;  %v994_v60 = vpack.i.b16 %v794_v3, %v794_v3  ;;  %v1431_v55 = vpack.c.bf16 %v4672_v33, %v4672_v33  ;;  %v1304_v54 = vunpack.c.l.bf16 %v1240_v48 }
 0x1eb   : > { %2587 = vst [vmem:[%s5413_s12 + $0x3d8] sm:$0xff] %v2402_v49  ;;  %v1241_v49 = vpack.c.bf16 %v1177_v28, %v1177_v28  ;;  %v668_v20 = vunpack.i.h.s16 %v594_v51  ;;  %v4131_v59 = vpack.i.b16 %v594_v51, %v594_v51 }
 0x1ec   : > { %v996_v30 = vperm.slane %v994_v60, 0  ;;  %4673 = vtanh.f32 %v1304_v54 }
 0x1ed   : > { %v2063_v43 = vpop.f32.mrf.mxu2  ;;  %v732_v63 = vpack.i.b16 %v668_v20, %v668_v20 }
 0x1ee   : > { %v2232_v42 = vpop.f32.mrf.mxu3  ;;  %v2064_v57 = vadd.f32 %v2063_v43, %v5416_v1  ;;  %v1305_v43 = vunpack.c.l.bf16 %v1241_v49  ;;  %v1114_v46 = vunpack.c.l.bf16 %v996_v30 }
 0x1ef   : > { %v2233_v22 = vadd.f32 %v2232_v42, %v5419_v37  ;;  %v1897_v56 = vpop.f32.mrf.mxu1  ;;  %v5663_v42 = vld [vmem:[#allocation7] ss:$0 sm:$0xff]  ;;  %v796_v14 = vperm.slane %v732_v63, 0 }
 0x1f0   : > { %v2404_v61 = vpop.f32.mrf.mxu0  ;;  %2585 = vst [vmem:[%s5413_s12 + $0x3c8] sm:$0xff] %v2064_v57  ;;  %v1898_v45 = vadd.f32 %v1897_v56, %v5390_v6  ;;  %v483_v12 = vadd.f32 %v5663_v42, %v5319_v32  ;;  %v1600_v57 = vunpack.c.l.b16 %v1430_v41  ;;  %4675 = vtanh.f32 %v1305_v43 }
 0x1f1   : > { %v2405_v8 = vadd.f32 %v2404_v61, %v5392_v11  ;;  %2586 = vst [vmem:[%s5413_s12 + $0x3d0] sm:$0xff] %v2233_v22  ;;  %v1601_v22 = vunpack.c.l.b16 %v1431_v55  ;;  %v1113_v61 = vunpack.c.l.bf16 %v992_v40  ;;  %v1179_v48 = vadd.f32 %v5187_v10, %v1114_v46 }
 0x1f2   : > { %1936 = vmatmul.bf16.gmra.mxu1 %v5555_v15  ;;  %2105 = vmatmul.bf16.gmra.mxu2 %v5555_v15  ;;  %2588 = vst [vmem:[%s5413_s12 + $0x400] sm:$0xff] %v1898_v45  ;;  %v5670_v32 = vpack.c.bf16 %v483_v12, %v483_v12 }
 0x1f3   : > { %2274 = vmatmul.bf16.gmra.mxu3 %v5555_v15  ;;  %2443 = vmatmul.bf16.gmra.mxu0 %v5555_v15  ;;  %2591 = vst [vmem:[%s5413_s12 + $0x418] sm:$0xff] %v2405_v8  ;;  %v5672_v13 = vpack.c.b16 %v1601_v22, %v1600_v57 }
 0x1f5   : > { %v2066_v58 = vpop.f32.mrf.mxu2 }
 0x1f6   : > { %v2235_v9 = vpop.f32.mrf.mxu3  ;;  %v2067_v47 = vadd.f32 %v2066_v58, %v5416_v1  ;;  %v795_v58 = vperm.slane %v4131_v59, 0 }
 0x1f7   : > { %v2236_v19 = vadd.f32 %v2235_v9, %v5419_v37  ;;  %v1899_v34 = vpop.f32.mrf.mxu1  ;;  %v1178_v9 = vadd.f32 %v5187_v10, %v1113_v61 }
 0x1f8   : > { %v2406_v25 = vpop.f32.mrf.mxu0  ;;  %2589 = vst [vmem:[%s5413_s12 + $0x408] sm:$0xff] %v2067_v47  ;;  %v1900_v38 = vadd.f32 %v1899_v34, %v5390_v6  ;;  %v5683_v47 = vrot.slane %v5670_v32, 3  ;;  %v998_v60 = vpack.i.b16 %v795_v58, %v795_v58 }
 0x1f9   : > { %v2407_v53 = vadd.f32 %v2406_v25, %v5392_v11  ;;  %2590 = vst [vmem:[%s5413_s12 + $0x410] sm:$0xff] %v2236_v19  ;;  %v4674_v19 = vpop.eup %4673  ;;  %v1242_v25 = vpack.c.bf16 %v1178_v9, %v1178_v9 }
 0x1fa   : > { %2592 = vst [vmem:[%s5413_s12 + $0x440] sm:$0xff] %v1900_v38  ;;  %v4676_v51 = vpop.eup %4675  ;;  %v1002_v38 = vpack.i.b16 %v796_v14, %v796_v14  ;;  %v597_v40 = vsel %vm513_vm1, %v5670_v32, %v5683_v47  ;;  %v1432_v30 = vpack.c.bf16 %v4674_v19, %v4674_v19  ;;  %v1000_v22 = vperm.slane %v998_v60, 0 }
 0x1fb   : > { %2595 = vst [vmem:[%s5413_s12 + $0x458] sm:$0xff] %v2407_v53  ;;  %v1243_v53 = vpack.c.bf16 %v1179_v48, %v1179_v48  ;;  %v1433_v43 = vpack.c.bf16 %v4676_v51, %v4676_v51  ;;  %v1306_v59 = vunpack.c.l.bf16 %v1242_v25  ;;  %v670_v61 = vunpack.i.h.s16 %v597_v40 }
 0x1fc   : > { %v1115_v63 = vunpack.c.l.bf16 %v1000_v22 }
 0x1fd   : > { %v2068_v23 = vpop.f32.mrf.mxu2  ;;  %4677 = vtanh.f32 %v1306_v59  ;;  %v734_v9 = vpack.i.b16 %v670_v61, %v670_v61 }
 0x1fe   : > { %v2237_v56 = vpop.f32.mrf.mxu3  ;;  %v2069_v45 = vadd.f32 %v2068_v23, %v5416_v1  ;;  %v1004_v23 = vperm.slane %v1002_v38, 0  ;;  %v4304_v38 = vld [vmem:[#allocation8 + $0xb0] sm:$0xf0] }
 0x1ff   : > { %v2238_v8 = vadd.f32 %v2237_v56, %v5419_v37  ;;  %v1902_v3 = vpop.f32.mrf.mxu1  ;;  %v1307_v56 = vunpack.c.l.bf16 %v1243_v53 }
 0x200   : > { %v2409_v28 = vpop.f32.mrf.mxu0  ;;  %2593 = vst [vmem:[%s5413_s12 + $0x448] sm:$0xff] %v2069_v45  ;;  %v1903_v31 = vadd.f32 %v1902_v3, %v5390_v6  ;;  %v1602_v45 = vunpack.c.l.b16 %v1432_v30  ;;  %v1116_v58 = vunpack.c.l.bf16 %v1004_v23  ;;  %v4445_v30 = vld [vmem:[#allocation8 + $0xb4] sm:$0xf0] }
 0x201   : > { %v2410_v33 = vadd.f32 %v2409_v28, %v5392_v11  ;;  %2594 = vst [vmem:[%s5413_s12 + $0x450] sm:$0xff] %v2238_v8  ;;  %v1603_v8 = vunpack.c.l.b16 %v1433_v43  ;;  %v4132_v28 = vpack.i.b16 %v597_v40, %v597_v40  ;;  %4679 = vtanh.f32 %v1307_v56 }
 0x202   : > { %1941 = vmatmul.bf16.gmra.mxu1 %v5585_v18  ;;  %2110 = vmatmul.bf16.gmra.mxu2 %v5585_v18  ;;  %2596 = vst [vmem:[%s5413_s12 + $0x480] sm:$0xff] %v1903_v31  ;;  %v1181_v25 = vadd.f32 %v5187_v10, %v1116_v58  ;;  %v599_v40 = vsel %vm518_vm2, %v5670_v32, %v5683_v47 }
 0x203   : > { %2279 = vmatmul.bf16.gmra.mxu3 %v5585_v18  ;;  %2448 = vmatmul.bf16.gmra.mxu0 %v5585_v18  ;;  %2599 = vst [vmem:[%s5413_s12 + $0x498] sm:$0xff] %v2410_v33  ;;  %v5702_v19 = vpack.c.b16 %v1603_v8, %v1602_v45  ;;  %v4678_v53 = vpop.eup %4677  ;;  %v601_v8 = vrot.slane %v599_v40, 1 }
 0x204   : > { %v1245_v45 = vpack.c.bf16 %v1181_v25, %v1181_v25 }
 0x205   : > { %v2071_v49 = vpop.f32.mrf.mxu2 }
 0x206   : > { %v2240_v34 = vpop.f32.mrf.mxu3  ;;  %v2072_v41 = vadd.f32 %v2071_v49, %v5416_v1  ;;  %v1180_v49 = vadd.f32 %v5187_v10, %v1115_v63 }
 0x207   : > { %v2241_v55 = vadd.f32 %v2240_v34, %v5419_v37  ;;  %v1904_v54 = vpop.f32.mrf.mxu1  ;;  %v797_v34 = vperm.slane %v4132_v28, 0  ;;  %v4680_v43 = vpop.eup %4679  ;;  %v1434_v28 = vpack.c.bf16 %v4678_v53, %v4678_v53  ;;  %v4312_v53 = vld [vmem:[#allocation8 + $0xb8] sm:$0xf0] }
 0x208   : > { %v2411_v20 = vpop.f32.mrf.mxu0  ;;  %2597 = vst [vmem:[%s5413_s12 + $0x488] sm:$0xff] %v2072_v41  ;;  %v1905_v12 = vadd.f32 %v1904_v54, %v5390_v6  ;;  %v798_v41 = vperm.slane %v734_v9, 0 }
 0x209   : > { %v2412_v57 = vadd.f32 %v2411_v20, %v5392_v11  ;;  %2598 = vst [vmem:[%s5413_s12 + $0x490] sm:$0xff] %v2241_v55  ;;  %v4442_v55 = vld [vmem:[#allocation8 + $0x94] sm:$0xf]  ;;  %v4310_v20 = vld [vmem:[#allocation8 + $0x98] sm:$0xf]  ;;  %v1006_v23 = vpack.i.b16 %v797_v34, %v797_v34  ;;  %v1604_v25 = vunpack.c.l.b16 %v1434_v28 }
 0x20a   : > { %2600 = vst [vmem:[%s5413_s12 + $0x4c0] sm:$0xff] %v1905_v12  ;;  %v4307_v54 = vor.u32 %v4442_v55, %v4304_v38  ;;  %v1244_v12 = vpack.c.bf16 %v1180_v49, %v1180_v49  ;;  %v4311_v59 = vor.u32 %v4445_v30, %v4310_v20  ;;  %v1010_v63 = vpack.i.b16 %v798_v41, %v798_v41  ;;  %v4302_v49 = vld [vmem:[#allocation8 + $0x90] sm:$0xf]  ;;  %v4443_v38 = vld [vmem:[#allocation8 + $0x9c] sm:$0xf] }
 0x20b   : > { %2603 = vst [vmem:[%s5413_s12 + $0x4d8] sm:$0xff] %v2412_v57  ;;  %v4444_v34 = vld [vmem:[#allocation8 + $0xac] sm:$0xf0]  ;;  %v4315_v20 = vor.u32 %v4443_v38, %v4312_v53  ;;  %v4133_v30 = vpack.i.b16 %v601_v8, %v601_v8 }
 0x20c   : > { %3156 = vmatpush.bf16.msrb.mxu2 %v4307_v54  ;;  %3325 = vmatpush.bf16.msrb.mxu3 %v4311_v59  ;;  %v1308_v9 = vunpack.c.l.bf16 %v1244_v12  ;;  %v4303_v55 = vor.u32 %v4444_v34, %v4302_v49 }
 0x20d   : > { %v2073_v46 = vpop.f32.mrf.mxu2  ;;  %3494 = vmatpush.bf16.msra.mxu0 %v4315_v20 }
 0x20e   : > { %v2242_v3 = vpop.f32.mrf.mxu3  ;;  %v2074_v31 = vadd.f32 %v2073_v46, %v5416_v1  ;;  %4681 = vtanh.f32 %v1308_v9  ;;  %2987 = vmatpush.bf16.msra.mxu1 %v4303_v55 }
 0x20f   : > { %v2243_v33 = vadd.f32 %v2242_v3, %v5419_v37  ;;  %v1907_v14 = vpop.f32.mrf.mxu1 }
 0x210   : > { %v2414_v48 = vpop.f32.mrf.mxu0  ;;  %2601 = vst [vmem:[%s5413_s12 + $0x4c8] sm:$0xff] %v2074_v31  ;;  %v1908_v51 = vadd.f32 %v1907_v14, %v5390_v6  ;;  %v1435_v31 = vpack.c.bf16 %v4680_v43, %v4680_v43  ;;  %v1008_v14 = vperm.slane %v1006_v23, 0 }
 0x211   : > { %v2415_v60 = vadd.f32 %v2414_v48, %v5392_v11  ;;  %2602 = vst [vmem:[%s5413_s12 + $0x4d0] sm:$0xff] %v2243_v33  ;;  %v1309_v48 = vunpack.c.l.bf16 %v1245_v45 }
 0x212   : > { %1946 = vmatmul.bf16.gmra.mxu1 %v5612_v21  ;;  %2115 = vmatmul.bf16.gmra.mxu2 %v5612_v21  ;;  %2604 = vst [vmem:[%s5413_s12 + $0x500] sm:$0xff] %v1908_v51  ;;  %v672_v51 = vunpack.i.h.s16 %v601_v8  ;;  %v1605_v41 = vunpack.c.l.b16 %v1435_v31  ;;  %v1117_v43 = vunpack.c.l.bf16 %v1008_v14 }
 0x213   : > { %2284 = vmatmul.bf16.gmra.mxu3 %v5612_v21  ;;  %2453 = vmatmul.bf16.gmra.mxu0 %v5612_v21  ;;  %2607 = vst [vmem:[%s5413_s12 + $0x518] sm:$0xff] %v2415_v60  ;;  %v1012_v60 = vperm.slane %v1010_v63, 0  ;;  %4683 = vtanh.f32 %v1309_v48  ;;  %v799_v63 = vperm.slane %v4133_v30, 0 }
 0x215   : > { %v2076_v57 = vpop.f32.mrf.mxu2  ;;  %v1118_v59 = vunpack.c.l.bf16 %v1012_v60  ;;  %v1014_v48 = vpack.i.b16 %v799_v63, %v799_v63 }
 0x216   : > { %v2245_v22 = vpop.f32.mrf.mxu3  ;;  %v2077_v56 = vadd.f32 %v2076_v57, %v5416_v1 }
 0x217   : > { %v2246_v61 = vadd.f32 %v2245_v22, %v5419_v37  ;;  %v1909_v46 = vpop.f32.mrf.mxu1  ;;  %v736_v22 = vpack.i.b16 %v672_v51, %v672_v51  ;;  %v1183_v31 = vadd.f32 %v5187_v10, %v1118_v59  ;;  %v1016_v30 = vperm.slane %v1014_v48, 0 }
 0x218   : > { %v2416_v3 = vpop.f32.mrf.mxu0  ;;  %2605 = vst [vmem:[%s5413_s12 + $0x508] sm:$0xff] %v2077_v56  ;;  %v1910_v33 = vadd.f32 %v1909_v46, %v5390_v6  ;;  %v1182_v46 = vadd.f32 %v5187_v10, %v1117_v43 }
 0x219   : > { %v2417_v58 = vadd.f32 %v2416_v3, %v5392_v11  ;;  %2606 = vst [vmem:[%s5413_s12 + $0x510] sm:$0xff] %v2246_v61  ;;  %v5729_v61 = vpack.c.b16 %v1605_v41, %v1604_v25  ;;  %v4682_v3 = vpop.eup %4681  ;;  %v800_v28 = vperm.slane %v736_v22, 0  ;;  %v1247_v41 = vpack.c.bf16 %v1183_v31, %v1183_v31 }
 0x21a   : > { %2608 = vst [vmem:[%s5413_s12 + $0x540] sm:$0xff] %v1910_v33  ;;  %v602_v33 = vsel %vm522_vm3, %v5670_v32, %v5683_v47  ;;  %v1246_v51 = vpack.c.bf16 %v1182_v46, %v1182_v46  ;;  %v1436_v53 = vpack.c.bf16 %v4682_v3, %v4682_v3  ;;  %v1119_v63 = vunpack.c.l.bf16 %v1016_v30 }
 0x21b   : > { %2611 = vst [vmem:[%s5413_s12 + $0x558] sm:$0xff] %v2417_v58  ;;  %v4684_v58 = vpop.eup %4683  ;;  %v604_v34 = vrot.slane %v602_v33, 2  ;;  %v1018_v25 = vpack.i.b16 %v800_v28, %v800_v28  ;;  %v1311_v22 = vunpack.c.l.bf16 %v1247_v41  ;;  %v605_v41 = vsel %vm526_vm4, %v5670_v32, %v5683_v47 }
 0x21c   : > { %v1310_v43 = vunpack.c.l.bf16 %v1246_v51  ;;  %v1606_v59 = vunpack.c.l.b16 %v1436_v53 }
 0x21d   : > { %v2078_v40 = vpop.f32.mrf.mxu2 }
 0x21e   : > { %v2247_v54 = vpop.f32.mrf.mxu3  ;;  %v2079_v12 = vadd.f32 %v2078_v40, %v5416_v1  ;;  %v1437_v40 = vpack.c.bf16 %v4684_v58, %v4684_v58  ;;  %4685 = vtanh.f32 %v1310_v43  ;;  %v607_v43 = vrot.slane %v605_v41, 3 }
 0x21f   : > { %v2248_v57 = vadd.f32 %v2247_v54, %v5419_v37  ;;  %v1912_v23 = vpop.f32.mrf.mxu1  ;;  %4687 = vtanh.f32 %v1311_v22 }
 0x220   : > { %v2419_v56 = vpop.f32.mrf.mxu0  ;;  %2609 = vst [vmem:[%s5413_s12 + $0x548] sm:$0xff] %v2079_v12  ;;  %v1913_v45 = vadd.f32 %v1912_v23, %v5390_v6  ;;  %v674_v12 = vunpack.i.h.s16 %v604_v34  ;;  %v1607_v23 = vunpack.c.l.b16 %v1437_v40 }
 0x221   : > { %v2420_v8 = vadd.f32 %v2419_v56, %v5392_v11  ;;  %2610 = vst [vmem:[%s5413_s12 + $0x550] sm:$0xff] %v2248_v57  ;;  %v1020_v57 = vperm.slane %v1018_v25, 0  ;;  %v4134_v56 = vpack.i.b16 %v604_v34, %v604_v34 }
 0x222   : > { %1951 = vmatmul.bf16.gmra.mxu1 %v5639_v26  ;;  %2120 = vmatmul.bf16.gmra.mxu2 %v5639_v26  ;;  %2612 = vst [vmem:[%s5413_s12 + $0x580] sm:$0xff] %v1913_v45  ;;  %v738_v28 = vpack.i.b16 %v674_v12, %v674_v12 }
 0x223   : > { %2289 = vmatmul.bf16.gmra.mxu3 %v5639_v26  ;;  %2458 = vmatmul.bf16.gmra.mxu0 %v5639_v26  ;;  %2615 = vst [vmem:[%s5413_s12 + $0x598] sm:$0xff] %v2420_v8  ;;  %v1120_v31 = vunpack.c.l.bf16 %v1020_v57  ;;  %v801_v51 = vperm.slane %v4134_v56, 0 }
 0x224   : > { %v4686_v25 = vpop.eup %4685 }
 0x225   : > { %v2081_v9 = vpop.f32.mrf.mxu2  ;;  %v1185_v34 = vadd.f32 %v5187_v10, %v1120_v31  ;;  %v1022_v40 = vpack.i.b16 %v801_v51, %v801_v51  ;;  %v1438_v22 = vpack.c.bf16 %v4686_v25, %v4686_v25 }
 0x226   : > { %v2250_v14 = vpop.f32.mrf.mxu3  ;;  %v2082_v60 = vadd.f32 %v2081_v9, %v5416_v1  ;;  %v5756_v9 = vpack.c.b16 %v1607_v23, %v1606_v59 }
 0x227   : > { %v2251_v49 = vadd.f32 %v2250_v14, %v5419_v37  ;;  %v1914_v55 = vpop.f32.mrf.mxu1  ;;  %v1249_v32 = vpack.c.bf16 %v1185_v34, %v1185_v34 }
 0x228   : > { %v2421_v38 = vpop.f32.mrf.mxu0  ;;  %2613 = vst [vmem:[%s5413_s12 + $0x588] sm:$0xff] %v2082_v60  ;;  %v1915_v54 = vadd.f32 %v1914_v55, %v5390_v6  ;;  %v1184_v60 = vadd.f32 %v5187_v10, %v1119_v63  ;;  %v4688_v55 = vpop.eup %4687  ;;  %v676_v63 = vunpack.i.h.s16 %v607_v43 }
 0x229   : > { %v2422_v20 = vadd.f32 %v2421_v38, %v5392_v11  ;;  %2614 = vst [vmem:[%s5413_s12 + $0x590] sm:$0xff] %v2251_v49  ;;  %v802_v49 = vperm.slane %v738_v28, 0  ;;  %v1439_v59 = vpack.c.bf16 %v4688_v55, %v4688_v55  ;;  %v1608_v28 = vunpack.c.l.b16 %v1438_v22 }
 0x22a   : > { %2616 = vst [vmem:[%s5413_s12 + $0x5c0] sm:$0xff] %v1915_v54  ;;  %v1248_v54 = vpack.c.bf16 %v1184_v60, %v1184_v60  ;;  %v740_v34 = vpack.i.b16 %v676_v63, %v676_v63 }
 0x22b   : > { %2619 = vst [vmem:[%s5413_s12 + $0x5d8] sm:$0xff] %v2422_v20  ;;  %v1026_v12 = vpack.i.b16 %v802_v49, %v802_v49  ;;  %v1609_v31 = vunpack.c.l.b16 %v1439_v59 }
 0x22d   : > { %v2083_v45 = vpop.f32.mrf.mxu2 }
 0x22e   : > { %v2252_v8 = vpop.f32.mrf.mxu3  ;;  %v2084_v46 = vadd.f32 %v2083_v45, %v5416_v1  ;;  %v1024_v45 = vperm.slane %v1022_v40, 0 }
 0x22f   : > { %v2253_v3 = vadd.f32 %v2252_v8, %v5419_v37  ;;  %v1917_v33 = vpop.f32.mrf.mxu1  ;;  %v1312_v8 = vunpack.c.l.bf16 %v1248_v54 }
 0x230   : > { %v2424_v58 = vpop.f32.mrf.mxu0  ;;  %2617 = vst [vmem:[%s5413_s12 + $0x5c8] sm:$0xff] %v2084_v46  ;;  %v1918_v14 = vadd.f32 %v1917_v33, %v5390_v6  ;;  %v1028_v46 = vperm.slane %v1026_v12, 0  ;;  %v486_v33 = vadd.f32 %v5663_v42, %v5327_v0  ;;  %v1121_v51 = vunpack.c.l.bf16 %v1024_v45 }
 0x231   : > { %v2425_v48 = vadd.f32 %v2424_v58, %v5392_v11  ;;  %2618 = vst [vmem:[%s5413_s12 + $0x5d0] sm:$0xff] %v2253_v3  ;;  %v1313_v3 = vunpack.c.l.bf16 %v1249_v32  ;;  %v4135_v58 = vpack.i.b16 %v607_v43, %v607_v43  ;;  %4689 = vtanh.f32 %v1312_v8 }
 0x232   : > { %1956 = vmatmul.bf16.gmra.mxu1 %v5672_v13  ;;  %2125 = vmatmul.bf16.gmra.mxu2 %v5672_v13  ;;  %2620 = vst [vmem:[%s5413_s12 + $0x600] sm:$0xff] %v1918_v14  ;;  %v1122_v25 = vunpack.c.l.bf16 %v1028_v46  ;;  %v5787_v0 = vpack.c.bf16 %v486_v33, %v486_v33  ;;  %v1186_v54 = vadd.f32 %v5187_v10, %v1121_v51 }
 0x233   : > { %2294 = vmatmul.bf16.gmra.mxu3 %v5672_v13  ;;  %2463 = vmatmul.bf16.gmra.mxu0 %v5672_v13  ;;  %2623 = vst [vmem:[%s5413_s12 + $0x618] sm:$0xff] %v2425_v48  ;;  %4691 = vtanh.f32 %v1313_v3  ;;  %v803_v40 = vperm.slane %v4135_v58, 0 }
 0x234   : > { %v5800_v12 = vrot.slane %v5787_v0, 3  ;;  %v1250_v59 = vpack.c.bf16 %v1186_v54, %v1186_v54 }
 0x235   : > { %v2086_v38 = vpop.f32.mrf.mxu2 }
 0x236   : > { %v2255_v53 = vpop.f32.mrf.mxu3  ;;  %v2087_v20 = vadd.f32 %v2086_v38, %v5416_v1  ;;  %v5785_v38 = vpack.c.b16 %v1609_v31, %v1608_v28  ;;  %v610_v31 = vsel %vm513_vm1, %v5787_v0, %v5800_v12 }
 0x237   : > { %v2256_v30 = vadd.f32 %v2255_v53, %v5419_v37  ;;  %v1919_v47 = vpop.f32.mrf.mxu1  ;;  %v4690_v43 = vpop.eup %4689 }
 0x238   : > { %v2426_v57 = vpop.f32.mrf.mxu0  ;;  %2621 = vst [vmem:[%s5413_s12 + $0x608] sm:$0xff] %v2087_v20  ;;  %v1920_v23 = vadd.f32 %v1919_v47, %v5390_v6  ;;  %v804_v20 = vperm.slane %v740_v34, 0  ;;  %v1030_v47 = vpack.i.b16 %v803_v40, %v803_v40  ;;  %v1440_v63 = vpack.c.bf16 %v4690_v43, %v4690_v43 }
 0x239   : > { %v2427_v56 = vadd.f32 %v2426_v57, %v5392_v11  ;;  %2622 = vst [vmem:[%s5413_s12 + $0x610] sm:$0xff] %v2256_v30  ;;  %v1187_v30 = vadd.f32 %v5187_v10, %v1122_v25  ;;  %v4692_v32 = vpop.eup %4691 }
 0x23a   : > { %2624 = vst [vmem:[%s5413_s12 + $0x640] sm:$0xff] %v1920_v23  ;;  %v1034_v45 = vpack.i.b16 %v804_v20, %v804_v20  ;;  %v1441_v28 = vpack.c.bf16 %v4692_v32, %v4692_v32  ;;  %v1610_v34 = vunpack.c.l.b16 %v1440_v63  ;;  %v4288_v63 = vld [vmem:[#allocation8 + $0x70] sm:$0xf0] }
 0x23b   : > { %2627 = vst [vmem:[%s5413_s12 + $0x658] sm:$0xff] %v2427_v56  ;;  %v1251_v8 = vpack.c.bf16 %v1187_v30, %v1187_v30 }
 0x23c   : > { %v1036_v51 = vperm.slane %v1034_v45, 0  ;;  %v1611_v25 = vunpack.c.l.b16 %v1441_v28 }
 0x23d   : > { %v2088_v14 = vpop.f32.mrf.mxu2 }
 0x23e   : > { %v2257_v48 = vpop.f32.mrf.mxu3  ;;  %v2089_v60 = vadd.f32 %v2088_v14, %v5416_v1  ;;  %v1032_v14 = vperm.slane %v1030_v47, 0  ;;  %v1124_v20 = vunpack.c.l.bf16 %v1036_v51  ;;  %v5817_v47 = vpack.c.b16 %v1611_v25, %v1610_v34 }
 0x23f   : > { %v2258_v49 = vadd.f32 %v2257_v48, %v5419_v37  ;;  %v1922_v41 = vpop.f32.mrf.mxu1  ;;  %v1314_v48 = vunpack.c.l.bf16 %v1250_v59 }
 0x240   : > { %v2429_v55 = vpop.f32.mrf.mxu0  ;;  %2625 = vst [vmem:[%s5413_s12 + $0x648] sm:$0xff] %v2089_v60  ;;  %v1923_v42 = vadd.f32 %v1922_v41, %v5390_v6  ;;  %v1315_v60 = vunpack.c.l.bf16 %v1251_v8  ;;  %v1123_v41 = vunpack.c.l.bf16 %v1032_v14  ;;  %v4438_v8 = vld [vmem:[#allocation8 + $0x54] sm:$0xf] }
 0x241   : > { %v2430_v53 = vadd.f32 %v2429_v55, %v5392_v11  ;;  %2626 = vst [vmem:[%s5413_s12 + $0x650] sm:$0xff] %v2258_v49  ;;  %v678_v49 = vunpack.i.h.s16 %v610_v31  ;;  %4693 = vtanh.f32 %v1314_v48  ;;  %v4291_v28 = vor.u32 %v4438_v8, %v4288_v63 }
 0x242   : > { %1961 = vmatmul.bf16.gmra.mxu1 %v5702_v19  ;;  %2130 = vmatmul.bf16.gmra.mxu2 %v5702_v19  ;;  %2628 = vst [vmem:[%s5413_s12 + $0x680] sm:$0xff] %v1923_v42  ;;  %4695 = vtanh.f32 %v1315_v60  ;;  %v1188_v59 = vadd.f32 %v5187_v10, %v1123_v41 }
 0x243   : > { %2299 = vmatmul.bf16.gmra.mxu3 %v5702_v19  ;;  %2468 = vmatmul.bf16.gmra.mxu0 %v5702_v19  ;;  %2631 = vst [vmem:[%s5413_s12 + $0x698] sm:$0xff] %v2430_v53  ;;  %v4136_v53 = vpack.i.b16 %v610_v31, %v610_v31  ;;  %v742_v30 = vpack.i.b16 %v678_v49, %v678_v49  ;;  %v4294_v31 = vld [vmem:[#allocation8 + $0x58] sm:$0xf] }
 0x244   : > { %v1252_v14 = vpack.c.bf16 %v1188_v59, %v1188_v59  ;;  %3157 = vmatpush.bf16.msrb.mxu2 %v4291_v28  ;;  %v4296_v28 = vld [vmem:[#allocation8 + $0x78] sm:$0xf0] }
 0x245   : > { %v2091_v57 = vpop.f32.mrf.mxu2  ;;  %v806_v45 = vperm.slane %v742_v30, 0 }
 0x246   : > { %v2260_v22 = vpop.f32.mrf.mxu3  ;;  %v2092_v23 = vadd.f32 %v2091_v57, %v5416_v1 }
 0x247   : > { %v2261_v56 = vadd.f32 %v2260_v22, %v5419_v37  ;;  %v1924_v46 = vpop.f32.mrf.mxu1 }
 0x248   : > { %v2431_v3 = vpop.f32.mrf.mxu0  ;;  %2629 = vst [vmem:[%s5413_s12 + $0x688] sm:$0xff] %v2092_v23  ;;  %v1925_v33 = vadd.f32 %v1924_v46, %v5390_v6  ;;  %v805_v23 = vperm.slane %v4136_v53, 0  ;;  %v4694_v46 = vpop.eup %4693 }
 0x249   : > { %v2432_v58 = vadd.f32 %v2431_v3, %v5392_v11  ;;  %2630 = vst [vmem:[%s5413_s12 + $0x690] sm:$0xff] %v2261_v56  ;;  %v1189_v56 = vadd.f32 %v5187_v10, %v1124_v20  ;;  %v612_v3 = vsel %vm518_vm2, %v5787_v0, %v5800_v12 }
 0x24a   : > { %2632 = vst [vmem:[%s5413_s12 + $0x6c0] sm:$0xff] %v1925_v33  ;;  %v4441_v33 = vld [vmem:[#allocation8 + $0x74] sm:$0xf0]  ;;  %v1038_v49 = vpack.i.b16 %v805_v23, %v805_v23 }
 0x24b   : > { %2635 = vst [vmem:[%s5413_s12 + $0x6d8] sm:$0xff] %v2432_v58  ;;  %v4696_v58 = vpop.eup %4695  ;;  %v4295_v60 = vor.u32 %v4441_v33, %v4294_v31  ;;  %v1253_v41 = vpack.c.bf16 %v1189_v56, %v1189_v56  ;;  %v4286_v56 = vld [vmem:[#allocation8 + $0x50] sm:$0xf] }
 0x24c   : > { %v1443_v20 = vpack.c.bf16 %v4696_v58, %v4696_v58 }
 0x24d   : > { %v2093_v55 = vpop.f32.mrf.mxu2  ;;  %3326 = vmatpush.bf16.msrb.mxu3 %v4295_v60 }
 0x24e   : > { %v2262_v42 = vpop.f32.mrf.mxu3  ;;  %v2094_v40 = vadd.f32 %v2093_v55, %v5416_v1  ;;  %v614_v55 = vrot.slane %v612_v3, 1  ;;  %v1613_v63 = vunpack.c.l.b16 %v1443_v20 }
 0x24f   : > { %v2263_v54 = vadd.f32 %v2262_v42, %v5419_v37  ;;  %v1927_v43 = vpop.f32.mrf.mxu1  ;;  %v1042_v42 = vpack.i.b16 %v806_v45, %v806_v45  ;;  %v4440_v45 = vld [vmem:[#allocation8 + $0x6c] sm:$0xf0] }
 0x250   : > { %v2434_v32 = vpop.f32.mrf.mxu0  ;;  %2633 = vst [vmem:[%s5413_s12 + $0x6c8] sm:$0xff] %v2094_v40  ;;  %v1928_v57 = vadd.f32 %v1927_v43, %v5390_v6  ;;  %v680_v59 = vunpack.i.h.s16 %v614_v55  ;;  %v4287_v3 = vor.u32 %v4440_v45, %v4286_v56 }
 0x251   : > { %v2435_v22 = vadd.f32 %v2434_v32, %v5392_v11  ;;  %2634 = vst [vmem:[%s5413_s12 + $0x6d0] sm:$0xff] %v2263_v54  ;;  %v1442_v54 = vpack.c.bf16 %v4694_v46, %v4694_v46  ;;  %v1316_v32 = vunpack.c.l.bf16 %v1252_v14  ;;  %v1044_v23 = vperm.slane %v1042_v42, 0  ;;  %v4439_v46 = vld [vmem:[#allocation8 + $0x5c] sm:$0xf] }
 0x252   : > { %1966 = vmatmul.bf16.gmra.mxu1 %v5729_v61  ;;  %2135 = vmatmul.bf16.gmra.mxu2 %v5729_v61  ;;  %2636 = vst [vmem:[%s5413_s12 + $0x700] sm:$0xff] %v1928_v57  ;;  %v1040_v57 = vperm.slane %v1038_v49, 0  ;;  %v4299_v58 = vor.u32 %v4439_v46, %v4296_v28  ;;  %v4137_v14 = vpack.i.b16 %v614_v55, %v614_v55 }
 0x253   : > { %2304 = vmatmul.bf16.gmra.mxu3 %v5729_v61  ;;  %2473 = vmatmul.bf16.gmra.mxu0 %v5729_v61  ;;  %2639 = vst [vmem:[%s5413_s12 + $0x718] sm:$0xff] %v2435_v22  ;;  %v1317_v22 = vunpack.c.l.bf16 %v1253_v41  ;;  %v1612_v8 = vunpack.c.l.b16 %v1442_v54  ;;  %4697 = vtanh.f32 %v1316_v32  ;;  %v744_v49 = vpack.i.b16 %v680_v59, %v680_v59 }
 0x254   : > { %2988 = vmatpush.bf16.msra.mxu1 %v4287_v3  ;;  %3495 = vmatpush.bf16.msra.mxu0 %v4299_v58  ;;  %v615_v32 = vsel %vm522_vm3, %v5787_v0, %v5800_v12 }
 0x255   : > { %v2096_v48 = vpop.f32.mrf.mxu2  ;;  %4699 = vtanh.f32 %v1317_v22  ;;  %v5844_v42 = vpack.c.b16 %v1613_v63, %v1612_v8  ;;  %v617_v63 = vrot.slane %v615_v32, 2 }
 0x256   : > { %v2265_v51 = vpop.f32.mrf.mxu3  ;;  %v2097_v34 = vadd.f32 %v2096_v48, %v5416_v1  ;;  %v1125_v48 = vunpack.c.l.bf16 %v1040_v57 }
 0x257   : > { %v2266_v25 = vadd.f32 %v2265_v51, %v5419_v37  ;;  %v1929_v53 = vpop.f32.mrf.mxu1 }
 0x258   : > { %v2436_v40 = vpop.f32.mrf.mxu0  ;;  %2637 = vst [vmem:[%s5413_s12 + $0x708] sm:$0xff] %v2097_v34  ;;  %v1930_v30 = vadd.f32 %v1929_v53, %v5390_v6  ;;  %v1126_v34 = vunpack.c.l.bf16 %v1044_v23  ;;  %v1190_v54 = vadd.f32 %v5187_v10, %v1125_v48 }
 0x259   : > { %v2437_v43 = vadd.f32 %v2436_v40, %v5392_v11  ;;  %2638 = vst [vmem:[%s5413_s12 + $0x710] sm:$0xff] %v2266_v25  ;;  %v807_v40 = vperm.slane %v4137_v14, 0  ;;  %v4698_v20 = vpop.eup %4697 }
 0x25a   : > { %2640 = vst [vmem:[%s5413_s12 + $0x740] sm:$0xff] %v1930_v30  ;;  %v808_v30 = vperm.slane %v744_v49, 0  ;;  %v1254_v56 = vpack.c.bf16 %v1190_v54, %v1190_v54  ;;  %v682_v49 = vunpack.i.h.s16 %v617_v63 }
 0x25b   : > { %2643 = vst [vmem:[%s5413_s12 + $0x758] sm:$0xff] %v2437_v43  ;;  %v1191_v43 = vadd.f32 %v5187_v10, %v1126_v34  ;;  %v4700_v57 = vpop.eup %4699  ;;  %v1046_v23 = vpack.i.b16 %v807_v40, %v807_v40 }
 0x25c   : > { %v1050_v3 = vpack.i.b16 %v808_v30, %v808_v30  ;;  %v1445_v58 = vpack.c.bf16 %v4700_v57, %v4700_v57  ;;  %v746_v32 = vpack.i.b16 %v682_v49, %v682_v49 }
 0x25d   : > { %v2098_v31 = vpop.f32.mrf.mxu2  ;;  %v1255_v46 = vpack.c.bf16 %v1191_v43, %v1191_v43 }
 0x25e   : > { %v2267_v33 = vpop.f32.mrf.mxu3  ;;  %v2099_v51 = vadd.f32 %v2098_v31, %v5416_v1  ;;  %v1052_v34 = vperm.slane %v1050_v3, 0  ;;  %v810_v3 = vperm.slane %v746_v32, 0 }
 0x25f   : > { %v2268_v60 = vadd.f32 %v2267_v33, %v5419_v37  ;;  %v1932_v25 = vpop.f32.mrf.mxu1  ;;  %v1444_v33 = vpack.c.bf16 %v4698_v20, %v4698_v20 }
 0x260   : > { %v2439_v41 = vpop.f32.mrf.mxu0  ;;  %2641 = vst [vmem:[%s5413_s12 + $0x748] sm:$0xff] %v2099_v51  ;;  %v1933_v53 = vadd.f32 %v1932_v25, %v5390_v6  ;;  %v1048_v51 = vperm.slane %v1046_v23, 0  ;;  %v1319_v25 = vunpack.c.l.bf16 %v1255_v46  ;;  %v1128_v57 = vunpack.c.l.bf16 %v1052_v34 }
 0x261   : > { %v2440_v55 = vadd.f32 %v2439_v41, %v5392_v11  ;;  %2642 = vst [vmem:[%s5413_s12 + $0x750] sm:$0xff] %v2268_v60  ;;  %v1318_v60 = vunpack.c.l.bf16 %v1254_v56  ;;  %v1614_v41 = vunpack.c.l.b16 %v1444_v33 }
 0x262   : > { %1971 = vmatmul.bf16.gmra.mxu1 %v5756_v9  ;;  %2140 = vmatmul.bf16.gmra.mxu2 %v5756_v9  ;;  %2644 = vst [vmem:[%s5413_s12 + $0x780] sm:$0xff] %v1933_v53  ;;  %v1615_v53 = vunpack.c.l.b16 %v1445_v58  ;;  %v1127_v20 = vunpack.c.l.bf16 %v1048_v51  ;;  %v1193_v46 = vadd.f32 %v5187_v10, %v1128_v57 }
 0x263   : > { %2309 = vmatmul.bf16.gmra.mxu3 %v5756_v9  ;;  %2478 = vmatmul.bf16.gmra.mxu0 %v5756_v9  ;;  %2647 = vst [vmem:[%s5413_s12 + $0x798] sm:$0xff] %v2440_v55  ;;  %v4138_v55 = vpack.i.b16 %v617_v63, %v617_v63  ;;  %4701 = vtanh.f32 %v1318_v60 }
 0x264   : > { %4703 = vtanh.f32 %v1319_v25  ;;  %v5871_v23 = vpack.c.b16 %v1615_v53, %v1614_v41  ;;  %v1192_v63 = vadd.f32 %v5187_v10, %v1127_v20  ;;  %v1058_v25 = vpack.i.b16 %v810_v3, %v810_v3 }
 0x265   : > { %v2101_v22 = vpop.f32.mrf.mxu2 }
 0x266   : > { %v2270_v59 = vpop.f32.mrf.mxu3  ;;  %v2102_v45 = vadd.f32 %v2101_v22, %v5416_v1  ;;  %v1256_v51 = vpack.c.bf16 %v1192_v63, %v1192_v63  ;;  %v1060_v32 = vperm.slane %v1058_v25, 0 }
 0x267   : > { %v2271_v8 = vadd.f32 %v2270_v59, %v5419_v37  ;;  %v1934_v28 = vpop.f32.mrf.mxu1 }
 0x268   : > { %v2441_v31 = vpop.f32.mrf.mxu0  ;;  %2645 = vst [vmem:[%s5413_s12 + $0x788] sm:$0xff] %v2102_v45  ;;  %v1935_v14 = vadd.f32 %v1934_v28, %v5390_v6 }
 0x269   : > { %v2442_v48 = vadd.f32 %v2441_v31, %v5392_v11  ;;  %2646 = vst [vmem:[%s5413_s12 + $0x790] sm:$0xff] %v2271_v8  ;;  %v809_v8 = vperm.slane %v4138_v55, 0  ;;  %v4702_v28 = vpop.eup %4701  ;;  %v618_v31 = vsel %vm526_vm4, %v5787_v0, %v5800_v12  ;;  %v1257_v0 = vpack.c.bf16 %v1193_v46, %v1193_v46 }
 0x26a   : > { %2648 = vst [vmem:[%s5413_s12 + $0x7c0] sm:$0xff] %v1935_v14  ;;  %v4704_v33 = vpop.eup %4703  ;;  %v620_v34 = vrot.slane %v618_v31, 3  ;;  %v1446_v53 = vpack.c.bf16 %v4702_v28, %v4702_v28  ;;  %v1130_v31 = vunpack.c.l.bf16 %v1060_v32 }
 0x26b   : > { %2651 = vst [vmem:[%s5413_s12 + $0x7d8] sm:$0xff] %v2442_v48  ;;  %v1054_v48 = vpack.i.b16 %v809_v8, %v809_v8  ;;  %v1447_v55 = vpack.c.bf16 %v4704_v33, %v4704_v33  ;;  %v1321_v57 = vunpack.c.l.bf16 %v1257_v0 }
 0x26c   : > { %v1195_v25 = vadd.f32 %v5187_v10, %v1130_v31 }
 0x26d   : > { %v2103_v40 = vpop.f32.mrf.mxu2  ;;  %v1056_v20 = vperm.slane %v1054_v48, 0 }
 0x26e   : > { %v2272_v54 = vpop.f32.mrf.mxu3  ;;  %v2104_v30 = vadd.f32 %v2103_v40, %v5416_v1 }
 0x26f   : > { %v2273_v43 = vadd.f32 %v2272_v54, %v5419_v37  ;;  %v1937_v22 = vpop.f32.mrf.mxu1  ;;  %v1129_v63 = vunpack.c.l.bf16 %v1056_v20 }
 0x270   : > { %v2444_v59 = vpop.f32.mrf.mxu0  ;;  %2649 = vst [vmem:[%s5413_s12 + $0x7c8] sm:$0xff] %v2104_v30  ;;  %v1938_v56 = vadd.f32 %v1937_v22, %v5390_v6  ;;  %v1320_v30 = vunpack.c.l.bf16 %v1256_v51  ;;  %v1616_v22 = vunpack.c.l.b16 %v1446_v53 }
 0x271   : > { %v2445_v45 = vadd.f32 %v2444_v59, %v5392_v11  ;;  %2650 = vst [vmem:[%s5413_s12 + $0x7d0] sm:$0xff] %v2273_v43  ;;  %v684_v43 = vunpack.i.h.s16 %v620_v34  ;;  %v1617_v59 = vunpack.c.l.b16 %v1447_v55 }
 0x272   : > { %1976 = vmatmul.bf16.gmra.mxu1 %v5785_v38  ;;  %2145 = vmatmul.bf16.gmra.mxu2 %v5785_v38  ;;  %2652 = vst [vmem:[%s5413_s12 + $0x800] sm:$0xff] %v1938_v56  ;;  %v4139_v56 = vpack.i.b16 %v620_v34, %v620_v34  ;;  %4705 = vtanh.f32 %v1320_v30 }
 0x273   : > { %2314 = vmatmul.bf16.gmra.mxu3 %v5785_v38  ;;  %2483 = vmatmul.bf16.gmra.mxu0 %v5785_v38  ;;  %2655 = vst [vmem:[%s5413_s12 + $0x818] sm:$0xff] %v2445_v45  ;;  %v748_v28 = vpack.i.b16 %v684_v43, %v684_v43  ;;  %4707 = vtanh.f32 %v1321_v57  ;;  %v1259_v43 = vpack.c.bf16 %v1195_v25, %v1195_v25 }
 0x275   : > { %v2106_v58 = vpop.f32.mrf.mxu2  ;;  %v812_v34 = vperm.slane %v748_v28, 0 }
 0x276   : > { %v2275_v14 = vpop.f32.mrf.mxu3  ;;  %v2107_v60 = vadd.f32 %v2106_v58, %v5416_v1 }
 0x277   : > { %v2276_v49 = vadd.f32 %v2275_v14, %v5419_v37  ;;  %v1939_v12 = vpop.f32.mrf.mxu1  ;;  %v5898_v14 = vpack.c.b16 %v1617_v59, %v1616_v22  ;;  %v1066_v30 = vpack.i.b16 %v812_v34, %v812_v34 }
 0x278   : > { %v2446_v41 = vpop.f32.mrf.mxu0  ;;  %2653 = vst [vmem:[%s5413_s12 + $0x808] sm:$0xff] %v2107_v60  ;;  %v1940_v40 = vadd.f32 %v1939_v12, %v5390_v6  ;;  %v811_v60 = vperm.slane %v4139_v56, 0  ;;  %v4706_v0 = vpop.eup %4705 }
 0x279   : > { %v2447_v54 = vadd.f32 %v2446_v41, %v5392_v11  ;;  %2654 = vst [vmem:[%s5413_s12 + $0x810] sm:$0xff] %v2276_v49  ;;  %v1194_v49 = vadd.f32 %v5187_v10, %v1129_v63  ;;  %v4708_v12 = vpop.eup %4707  ;;  %v1448_v22 = vpack.c.bf16 %v4706_v0, %v4706_v0 }
 0x27a   : > { %2656 = vst [vmem:[%s5413_s12 + $0x840] sm:$0xff] %v1940_v40  ;;  %v1062_v55 = vpack.i.b16 %v811_v60, %v811_v60  ;;  %v1449_v59 = vpack.c.bf16 %v4708_v12, %v4708_v12 }
 0x27b   : > { %2659 = vst [vmem:[%s5413_s12 + $0x858] sm:$0xff] %v2447_v54  ;;  %v1258_v40 = vpack.c.bf16 %v1194_v49, %v1194_v49  ;;  %v1618_v28 = vunpack.c.l.b16 %v1448_v22 }
 0x27c   : > { %v1619_v31 = vunpack.c.l.b16 %v1449_v59 }
 0x27d   : > { %v2108_v45 = vpop.f32.mrf.mxu2  ;;  %v1322_v63 = vunpack.c.l.bf16 %v1258_v40  ;;  %v4434_v40 = vld [vmem:[#allocation8 + $0x14] sm:$0xf] }
 0x27e   : > { %v2277_v8 = vpop.f32.mrf.mxu3  ;;  %v2109_v3 = vadd.f32 %v2108_v45, %v5416_v1  ;;  %v5922_v0 = vpack.c.b16 %v1619_v31, %v1618_v28 }
 0x27f   : > { %v2278_v46 = vadd.f32 %v2277_v8, %v5419_v37  ;;  %v1942_v33 = vpop.f32.mrf.mxu1  ;;  %v1064_v8 = vperm.slane %v1062_v55, 0  ;;  %4709 = vtanh.f32 %v1322_v63 }
 0x280   : > { %v2449_v58 = vpop.f32.mrf.mxu0  ;;  %2657 = vst [vmem:[%s5413_s12 + $0x848] sm:$0xff] %v2109_v3  ;;  %v1943_v48 = vadd.f32 %v1942_v33, %v5390_v6  ;;  %v1068_v3 = vperm.slane %v1066_v30, 0 }
 0x281   : > { %v2450_v51 = vadd.f32 %v2449_v58, %v5392_v11  ;;  %2658 = vst [vmem:[%s5413_s12 + $0x850] sm:$0xff] %v2278_v46  ;;  %v1323_v46 = vunpack.c.l.bf16 %v1259_v43  ;;  %v4278_v43 = vld [vmem:[#allocation8 + $0x18] sm:$0xf] }
 0x282   : > { %1981 = vmatmul.bf16.gmra.mxu1 %v5817_v47  ;;  %2150 = vmatmul.bf16.gmra.mxu2 %v5817_v47  ;;  %2660 = vst [vmem:[%s5413_s12 + $0x880] sm:$0xff] %v1943_v48  ;;  %v1131_v48 = vunpack.c.l.bf16 %v1064_v8  ;;  %v1132_v49 = vunpack.c.l.bf16 %v1068_v3 }
 0x283   : > { %2319 = vmatmul.bf16.gmra.mxu3 %v5817_v47  ;;  %2488 = vmatmul.bf16.gmra.mxu0 %v5817_v47  ;;  %2663 = vst [vmem:[%s5413_s12 + $0x898] sm:$0xff] %v2450_v51  ;;  %4711 = vtanh.f32 %v1323_v46 }
 0x284   : > { %v1197_v55 = vadd.f32 %v5187_v10, %v1132_v49  ;;  %v4436_v49 = vld [vmem:[#allocation8 + $0x2c] sm:$0xf0] }
 0x285   : > { %v2111_v41 = vpop.f32.mrf.mxu2 }
 0x286   : > { %v2280_v53 = vpop.f32.mrf.mxu3  ;;  %v2112_v54 = vadd.f32 %v2111_v41, %v5416_v1  ;;  %v1261_v63 = vpack.c.bf16 %v1197_v55, %v1197_v55 }
 0x287   : > { %v2281_v20 = vadd.f32 %v2280_v53, %v5419_v37  ;;  %v1944_v32 = vpop.f32.mrf.mxu1  ;;  %v1196_v53 = vadd.f32 %v5187_v10, %v1131_v48 }
 0x288   : > { %v2451_v57 = vpop.f32.mrf.mxu0  ;;  %2661 = vst [vmem:[%s5413_s12 + $0x888] sm:$0xff] %v2112_v54  ;;  %v1945_v56 = vadd.f32 %v1944_v32, %v5390_v6  ;;  %v4272_v54 = vld [vmem:[#allocation8 + $0x30] sm:$0xf0]  ;;  %v4437_v32 = vld [vmem:[#allocation8 + $0x34] sm:$0xf0] }
 0x289   : > { %v2452_v45 = vadd.f32 %v2451_v57, %v5392_v11  ;;  %2662 = vst [vmem:[%s5413_s12 + $0x890] sm:$0xff] %v2281_v20  ;;  %v4710_v20 = vpop.eup %4709  ;;  %v4275_v30 = vor.u32 %v4434_v40, %v4272_v54 }
 0x28a   : > { %2664 = vst [vmem:[%s5413_s12 + $0x8c0] sm:$0xff] %v1945_v56  ;;  %v4712_v57 = vpop.eup %4711  ;;  %v4279_v56 = vor.u32 %v4437_v32, %v4278_v43  ;;  %v1450_v28 = vpack.c.bf16 %v4710_v20, %v4710_v20 }
 0x28b   : > { %2667 = vst [vmem:[%s5413_s12 + $0x8d8] sm:$0xff] %v2452_v45  ;;  %v1260_v45 = vpack.c.bf16 %v1196_v53, %v1196_v53  ;;  %3158 = vmatpush.bf16.msrb.mxu2 %v4275_v30  ;;  %v1451_v31 = vpack.c.bf16 %v4712_v57, %v4712_v57  ;;  %v4280_v53 = vld [vmem:[#allocation8 + $0x38] sm:$0xf0] }
 0x28c   : > { %3327 = vmatpush.bf16.msrb.mxu3 %v4279_v56 }
 0x28d   : > { %v2113_v33 = vpop.f32.mrf.mxu2  ;;  %v1324_v48 = vunpack.c.l.bf16 %v1260_v45 }
 0x28e   : > { %v2282_v58 = vpop.f32.mrf.mxu3  ;;  %v2114_v51 = vadd.f32 %v2113_v33, %v5416_v1 }
 0x28f   : > { %v2283_v60 = vadd.f32 %v2282_v58, %v5419_v37  ;;  %v1947_v34 = vpop.f32.mrf.mxu1  ;;  %4713 = vtanh.f32 %v1324_v48 }
 0x290   : > { %v2454_v25 = vpop.f32.mrf.mxu0  ;;  %2665 = vst [vmem:[%s5413_s12 + $0x8c8] sm:$0xff] %v2114_v51  ;;  %v1948_v12 = vadd.f32 %v1947_v34, %v5390_v6  ;;  %v1325_v51 = vunpack.c.l.bf16 %v1261_v63  ;;  %v1620_v34 = vunpack.c.l.b16 %v1450_v28 }
 0x291   : > { %v2455_v41 = vadd.f32 %v2454_v25, %v5392_v11  ;;  %2666 = vst [vmem:[%s5413_s12 + $0x8d0] sm:$0xff] %v2283_v60  ;;  %v4270_v60 = vld [vmem:[#allocation8 + $0x10] sm:$0xf]  ;;  %v1621_v25 = vunpack.c.l.b16 %v1451_v31 }
 0x292   : > { %1986 = vmatmul.bf16.gmra.mxu1 %v5844_v42  ;;  %2155 = vmatmul.bf16.gmra.mxu2 %v5844_v42  ;;  %2668 = vst [vmem:[%s5413_s12 + $0x900] sm:$0xff] %v1948_v12  ;;  %v4271_v12 = vor.u32 %v4436_v49, %v4270_v60  ;;  %4715 = vtanh.f32 %v1325_v51 }
 0x293   : > { %2324 = vmatmul.bf16.gmra.mxu3 %v5844_v42  ;;  %2493 = vmatmul.bf16.gmra.mxu0 %v5844_v42  ;;  %2671 = vst [vmem:[%s5413_s12 + $0x918] sm:$0xff] %v2455_v41  ;;  %v4435_v41 = vld [vmem:[#allocation8 + $0x1c] sm:$0xf]  ;;  %v5946_v57 = vpack.c.b16 %v1621_v25, %v1620_v34 }
 0x294   : > { %v4283_v54 = vor.u32 %v4435_v41, %v4280_v53  ;;  %2989 = vmatpush.bf16.msra.mxu1 %v4271_v12 }
 0x295   : > { %v2116_v22 = vpop.f32.mrf.mxu2  ;;  %v4714_v56 = vpop.eup %4713 }
 0x296   : > { %v2285_v59 = vpop.f32.mrf.mxu3  ;;  %v2117_v10 = vadd.f32 %v2116_v22, %v5416_v1  ;;  %3496 = vmatpush.bf16.msra.mxu0 %v4283_v54  ;;  %v1452_v31 = vpack.c.bf16 %v4714_v56, %v4714_v56 }
 0x297   : > { %v2286_v8 = vadd.f32 %v2285_v59, %v5419_v37  ;;  %v1949_v3 = vpop.f32.mrf.mxu1 }
 0x298   : > { %v2456_v46 = vpop.f32.mrf.mxu0  ;;  %2669 = vst [vmem:[%s5413_s12 + $0x908] sm:$0xff] %v2117_v10  ;;  %v1950_v33 = vadd.f32 %v1949_v3, %v5390_v6  ;;  %v4716_v45 = vpop.eup %4715  ;;  %v1622_v51 = vunpack.c.l.b16 %v1452_v31 }
 0x299   : > { %v2457_v58 = vadd.f32 %v2456_v46, %v5392_v11  ;;  %2670 = vst [vmem:[%s5413_s12 + $0x910] sm:$0xff] %v2286_v8 }
 0x29a   : > { %2672 = vst [vmem:[%s5413_s12 + $0x940] sm:$0xff] %v1950_v33  ;;  %v1453_v33 = vpack.c.bf16 %v4716_v45, %v4716_v45 }
 0x29b   : > { %2675 = vst [vmem:[%s5413_s12 + $0x958] sm:$0xff] %v2457_v58 }
 0x29c   : > { %v1623_v60 = vunpack.c.l.b16 %v1453_v33 }
 0x29d   : > { %v2118_v55 = vpop.f32.mrf.mxu2 }
 0x29e   : > { %v2287_v40 = vpop.f32.mrf.mxu3  ;;  %v2119_v20 = vadd.f32 %v2118_v55, %v5416_v1  ;;  %v5968_v55 = vpack.c.b16 %v1623_v60, %v1622_v51 }
 0x29f   : > { %v2288_v30 = vadd.f32 %v2287_v40, %v5419_v37  ;;  %v1952_v43 = vpop.f32.mrf.mxu1 }
 0x2a0   : > { %v2459_v32 = vpop.f32.mrf.mxu0  ;;  %2673 = vst [vmem:[%s5413_s12 + $0x948] sm:$0xff] %v2119_v20  ;;  %v1953_v22 = vadd.f32 %v1952_v43, %v5390_v6 }
 0x2a1   : > { %v2460_v59 = vadd.f32 %v2459_v32, %v5392_v11  ;;  %2674 = vst [vmem:[%s5413_s12 + $0x950] sm:$0xff] %v2288_v30 }
 0x2a2   : > { %1991 = vmatmul.bf16.gmra.mxu1 %v5871_v23  ;;  %2160 = vmatmul.bf16.gmra.mxu2 %v5871_v23  ;;  %2676 = vst [vmem:[%s5413_s12 + $0x980] sm:$0xff] %v1953_v22 }
 0x2a3   : > { %2329 = vmatmul.bf16.gmra.mxu3 %v5871_v23  ;;  %2498 = vmatmul.bf16.gmra.mxu0 %v5871_v23  ;;  %2679 = vst [vmem:[%s5413_s12 + $0x998] sm:$0xff] %v2460_v59 }
 0x2a5   : > { %v2121_v10 = vpop.f32.mrf.mxu2 }
 0x2a6   : > { %v2290_v8 = vpop.f32.mrf.mxu3  ;;  %v2122_v63 = vadd.f32 %v2121_v10, %v5416_v1 }
 0x2a7   : > { %v2291_v3 = vadd.f32 %v2290_v8, %v5419_v37  ;;  %v1954_v46 = vpop.f32.mrf.mxu1 }
 0x2a8   : > { %v2461_v28 = vpop.f32.mrf.mxu0  ;;  %2677 = vst [vmem:[%s5413_s12 + $0x988] sm:$0xff] %v2122_v63  ;;  %v1955_v58 = vadd.f32 %v1954_v46, %v5390_v6 }
 0x2a9   : > { %v2462_v48 = vadd.f32 %v2461_v28, %v5392_v11  ;;  %2678 = vst [vmem:[%s5413_s12 + $0x990] sm:$0xff] %v2291_v3 }
 0x2aa   : > { %2680 = vst [vmem:[%s5413_s12 + $0x9c0] sm:$0xff] %v1955_v58 }
 0x2ab   : > { %2683 = vst [vmem:[%s5413_s12 + $0x9d8] sm:$0xff] %v2462_v48 }
 0x2ad   : > { %v2123_v49 = vpop.f32.mrf.mxu2 }
 0x2ae   : > { %v2292_v34 = vpop.f32.mrf.mxu3  ;;  %v2124_v25 = vadd.f32 %v2123_v49, %v5416_v1 }
 0x2af   : > { %v2293_v12 = vadd.f32 %v2292_v34, %v5419_v37  ;;  %v1957_v41 = vpop.f32.mrf.mxu1 }
 0x2b0   : > { %v2464_v53 = vpop.f32.mrf.mxu0  ;;  %2681 = vst [vmem:[%s5413_s12 + $0x9c8] sm:$0xff] %v2124_v25  ;;  %v1958_v40 = vadd.f32 %v1957_v41, %v5390_v6 }
 0x2b1   : > { %v2465_v54 = vadd.f32 %v2464_v53, %v5392_v11  ;;  %2682 = vst [vmem:[%s5413_s12 + $0x9d0] sm:$0xff] %v2293_v12 }
 0x2b2   : > { %1996 = vmatmul.bf16.gmra.mxu1 %v5898_v14  ;;  %2165 = vmatmul.bf16.gmra.mxu2 %v5898_v14  ;;  %2684 = vst [vmem:[%s5413_s12 + $0xa00] sm:$0xff] %v1958_v40 }
 0x2b3   : > { %2334 = vmatmul.bf16.gmra.mxu3 %v5898_v14  ;;  %2503 = vmatmul.bf16.gmra.mxu0 %v5898_v14  ;;  %2687 = vst [vmem:[%s5413_s12 + $0xa18] sm:$0xff] %v2465_v54 }
 0x2b5   : > { %v2126_v20 = vpop.f32.mrf.mxu2 }
 0x2b6   : > { %v2295_v30 = vpop.f32.mrf.mxu3  ;;  %v2127_v43 = vadd.f32 %v2126_v20, %v5416_v1 }
 0x2b7   : > { %v2296_v32 = vadd.f32 %v2295_v30, %v5419_v37  ;;  %v1959_v22 = vpop.f32.mrf.mxu1 }
 0x2b8   : > { %v2466_v59 = vpop.f32.mrf.mxu0  ;;  %2685 = vst [vmem:[%s5413_s12 + $0xa08] sm:$0xff] %v2127_v43  ;;  %v1960_v56 = vadd.f32 %v1959_v22, %v5390_v6 }
 0x2b9   : > { %v2467_v45 = vadd.f32 %v2466_v59, %v5392_v11  ;;  %2686 = vst [vmem:[%s5413_s12 + $0xa10] sm:$0xff] %v2296_v32 }
 0x2ba   : > { %2688 = vst [vmem:[%s5413_s12 + $0xa40] sm:$0xff] %v1960_v56 }
 0x2bb   : > { %2691 = vst [vmem:[%s5413_s12 + $0xa58] sm:$0xff] %v2467_v45 }
 0x2bd   : > { %v2128_v10 = vpop.f32.mrf.mxu2 }
 0x2be   : > { %v2297_v8 = vpop.f32.mrf.mxu3  ;;  %v2129_v63 = vadd.f32 %v2128_v10, %v5416_v1 }
 0x2bf   : > { %v2298_v3 = vadd.f32 %v2297_v8, %v5419_v37  ;;  %v1962_v46 = vpop.f32.mrf.mxu1 }
 0x2c0   : > { %v2469_v28 = vpop.f32.mrf.mxu0  ;;  %2689 = vst [vmem:[%s5413_s12 + $0xa48] sm:$0xff] %v2129_v63  ;;  %v1963_v31 = vadd.f32 %v1962_v46, %v5390_v6 }
 0x2c1   : > { %v2470_v33 = vadd.f32 %v2469_v28, %v5392_v11  ;;  %2690 = vst [vmem:[%s5413_s12 + $0xa50] sm:$0xff] %v2298_v3 }
 0x2c2   : > { %2001 = vmatmul.bf16.gmra.mxu1 %v5922_v0  ;;  %2170 = vmatmul.bf16.gmra.mxu2 %v5922_v0  ;;  %2692 = vst [vmem:[%s5413_s12 + $0xa80] sm:$0xff] %v1963_v31 }
 0x2c3   : > { %2339 = vmatmul.bf16.gmra.mxu3 %v5922_v0  ;;  %2508 = vmatmul.bf16.gmra.mxu0 %v5922_v0  ;;  %2695 = vst [vmem:[%s5413_s12 + $0xa98] sm:$0xff] %v2470_v33 }
 0x2c5   : > { %v2131_v58 = vpop.f32.mrf.mxu2 }
 0x2c6   : > { %v2300_v48 = vpop.f32.mrf.mxu3  ;;  %v2132_v51 = vadd.f32 %v2131_v58, %v5416_v1 }
 0x2c7   : > { %v2301_v60 = vadd.f32 %v2300_v48, %v5419_v37  ;;  %v1964_v49 = vpop.f32.mrf.mxu1 }
 0x2c8   : > { %v2471_v34 = vpop.f32.mrf.mxu0  ;;  %2693 = vst [vmem:[%s5413_s12 + $0xa88] sm:$0xff] %v2132_v51  ;;  %v1965_v25 = vadd.f32 %v1964_v49, %v5390_v6 }
 0x2c9   : > { %v2472_v12 = vadd.f32 %v2471_v34, %v5392_v11  ;;  %2694 = vst [vmem:[%s5413_s12 + $0xa90] sm:$0xff] %v2301_v60 }
 0x2ca   : > { %2696 = vst [vmem:[%s5413_s12 + $0xac0] sm:$0xff] %v1965_v25 }
 0x2cb   : > { %2699 = vst [vmem:[%s5413_s12 + $0xad8] sm:$0xff] %v2472_v12 }
 0x2cd   : > { %v2133_v41 = vpop.f32.mrf.mxu2 }
 0x2ce   : > { %v2302_v53 = vpop.f32.mrf.mxu3  ;;  %v2134_v40 = vadd.f32 %v2133_v41, %v5416_v1 }
 0x2cf   : > { %v2303_v54 = vadd.f32 %v2302_v53, %v5419_v37 }
 0x2d0   : > { %v2474_v20 = vpop.f32.mrf.mxu0  ;;  %2697 = vst [vmem:[%s5413_s12 + $0xac8] sm:$0xff] %v2134_v40 }
 0x2d1   : > { %v2475_v43 = vadd.f32 %v2474_v20, %v5392_v11  ;;  %2698 = vst [vmem:[%s5413_s12 + $0xad0] sm:$0xff] %v2303_v54 }
 0x2d2   : > { %2006 = vmatmul.bf16.gmra.mxu1 %v5946_v57  ;;  %2175 = vmatmul.bf16.gmra.mxu2 %v5946_v57 }
 0x2d3   : > { %2344 = vmatmul.bf16.gmra.mxu3 %v5946_v57  ;;  %2513 = vmatmul.bf16.gmra.mxu0 %v5946_v57  ;;  %2703 = vst [vmem:[%s5413_s12 + $0xb18] sm:$0xff] %v2475_v43 }
 0x2d5   : > { %v2136_v32 = vpop.f32.mrf.mxu2 }
 0x2d6   : > { %v2305_v22 = vpop.f32.mrf.mxu3  ;;  %v2137_v59 = vadd.f32 %v2136_v32, %v5416_v1 }
 0x2d7   : > { %v2306_v56 = vadd.f32 %v2305_v22, %v5419_v37 }
 0x2d8   : > { %v2476_v10 = vpop.f32.mrf.mxu0  ;;  %2701 = vst [vmem:[%s5413_s12 + $0xb08] sm:$0xff] %v2137_v59 }
 0x2d9   : > { %v2477_v63 = vadd.f32 %v2476_v10, %v5392_v11  ;;  %2702 = vst [vmem:[%s5413_s12 + $0xb10] sm:$0xff] %v2306_v56 }
 0x2db   : > { %2707 = vst [vmem:[%s5413_s12 + $0xb58] sm:$0xff] %v2477_v63 }
 0x2dd   : > { %v2138_v3 = vpop.f32.mrf.mxu2 }
 0x2de   : > { %v2307_v46 = vpop.f32.mrf.mxu3  ;;  %v2139_v28 = vadd.f32 %v2138_v3, %v5416_v1 }
 0x2df   : > { %v2308_v31 = vadd.f32 %v2307_v46, %v5419_v37 }
 0x2e0   : > { %v2479_v33 = vpop.f32.mrf.mxu0  ;;  %2705 = vst [vmem:[%s5413_s12 + $0xb48] sm:$0xff] %v2139_v28 }
 0x2e1   : > { %v2480_v48 = vadd.f32 %v2479_v33, %v5392_v11  ;;  %2706 = vst [vmem:[%s5413_s12 + $0xb50] sm:$0xff] %v2308_v31 }
 0x2e2   : > { %2011 = vmatmul.bf16.gmra.mxu1 %v5968_v55  ;;  %2180 = vmatmul.bf16.gmra.mxu2 %v5968_v55 }
 0x2e3   : > { %2349 = vmatmul.bf16.gmra.mxu3 %v5968_v55  ;;  %2518 = vmatmul.bf16.gmra.mxu0 %v5968_v55  ;;  %2711 = vst [vmem:[%s5413_s12 + $0xb98] sm:$0xff] %v2480_v48 }
 0x2e5   : > { %v2141_v51 = vpop.f32.mrf.mxu2 }
 0x2e6   : > { %v2310_v60 = vpop.f32.mrf.mxu3  ;;  %v2142_v49 = vadd.f32 %v2141_v51, %v5416_v1 }
 0x2e7   : > { %v2311_v34 = vadd.f32 %v2310_v60, %v5419_v37 }
 0x2e8   : > { %v2481_v12 = vpop.f32.mrf.mxu0  ;;  %2709 = vst [vmem:[%s5413_s12 + $0xb88] sm:$0xff] %v2142_v49 }
 0x2e9   : > { %v2482_v53 = vadd.f32 %v2481_v12, %v5392_v11  ;;  %2710 = vst [vmem:[%s5413_s12 + $0xb90] sm:$0xff] %v2311_v34 }
 0x2eb   : > { %2715 = vst [vmem:[%s5413_s12 + $0xbd8] sm:$0xff] %v2482_v53 }
 0x2ed   : > { %v2143_v40 = vpop.f32.mrf.mxu2 }
 0x2ee   : > { %v2312_v54 = vpop.f32.mrf.mxu3 }
 0x2ef   : > { %v2313_v20 = vadd.f32 %v2312_v54, %v5419_v37 }
 0x2f1   : > { %2714 = vst [vmem:[%s5413_s12 + $0xbd0] sm:$0xff] %v2313_v20 }
 0x2f2   : > { %2990 = vmatmul.bf16.vlgmr.msra.gmra.mxu1 %v5197_v5  ;;  %3159 = vmatmul.bf16.vlgmr.msrb.gmra.mxu2 %v5197_v5 }
 0x2f3   : > { %3328 = vmatmul.bf16.vlgmr.msrb.gmra.mxu3 %v5197_v5  ;;  %3497 = vmatmul.bf16.vlgmr.msra.gmra.mxu0 %v5197_v5  ;;  %v1967_v5 = vpop.f32.mrf.mxu1 }
 0x2f4   : > { %v1968_v30 = vadd.f32 %v1967_v5, %v5390_v6  ;;  %v2144_v5 = vadd.f32 %v2143_v40, %v5416_v1 }
 0x2f5   : > { %v2146_v22 = vpop.f32.mrf.mxu2 }
 0x2f6   : > { %2700 = vst [vmem:[%s5413_s12 + $0xb00] sm:$0xff] %v1968_v30  ;;  %v2484_v30 = vpop.f32.mrf.mxu0  ;;  %v2315_v59 = vpop.f32.mrf.mxu3  ;;  %v2147_v56 = vadd.f32 %v2146_v22, %v5416_v1 }
 0x2f7   : > { %2713 = vst [vmem:[%s5413_s12 + $0xbc8] sm:$0xff] %v2144_v5  ;;  %v2485_v32 = vadd.f32 %v2484_v30, %v5392_v11 }
 0x2f8   : > { %2717 = vst [vmem:[%s5413_s12 + $0xc08] sm:$0xff] %v2147_v56 }
 0x2f9   : > { %2719 = vst [vmem:[%s5413_s12 + $0xc18] sm:$0xff] %v2485_v32 }
 0x2fb   : > { %v1969_v45 = vpop.f32.mrf.mxu1 }
 0x2fc   : > { %v1970_v8 = vadd.f32 %v1969_v45, %v5390_v6  ;;  %v2316_v45 = vadd.f32 %v2315_v59, %v5419_v37 }
 0x2fd   : > { %v2148_v46 = vpop.f32.mrf.mxu2 }
 0x2fe   : > { %2704 = vst [vmem:[%s5413_s12 + $0xb40] sm:$0xff] %v1970_v8  ;;  %v2486_v8 = vpop.f32.mrf.mxu0  ;;  %v2317_v28 = vpop.f32.mrf.mxu3  ;;  %v2149_v31 = vadd.f32 %v2148_v46, %v5416_v1 }
 0x2ff   : > { %v2487_v3 = vadd.f32 %v2486_v8, %v5392_v11  ;;  %2718 = vst [vmem:[%s5413_s12 + $0xc10] sm:$0xff] %v2316_v45 }
 0x300   : > { %2721 = vst [vmem:[%s5413_s12 + $0xc48] sm:$0xff] %v2149_v31 }
 0x301   : > { %2723 = vst [vmem:[%s5413_s12 + $0xc58] sm:$0xff] %v2487_v3 }
 0x302   : > { %2995 = vmatmul.bf16.gmra.mxu1 %v5213_v36  ;;  %3164 = vmatmul.bf16.gmra.mxu2 %v5213_v36 }
 0x303   : > { %3333 = vmatmul.bf16.gmra.mxu3 %v5213_v36  ;;  %3502 = vmatmul.bf16.gmra.mxu0 %v5213_v36  ;;  %v1972_v36 = vpop.f32.mrf.mxu1 }
 0x304   : > { %v1973_v58 = vadd.f32 %v1972_v36, %v5390_v6  ;;  %v2318_v36 = vadd.f32 %v2317_v28, %v5419_v37 }
 0x305   : > { %v2151_v51 = vpop.f32.mrf.mxu2 }
 0x306   : > { %2708 = vst [vmem:[%s5413_s12 + $0xb80] sm:$0xff] %v1973_v58  ;;  %v2489_v33 = vpop.f32.mrf.mxu0  ;;  %v2320_v60 = vpop.f32.mrf.mxu3  ;;  %v2152_v49 = vadd.f32 %v2151_v51, %v5416_v1 }
 0x307   : > { %v2490_v48 = vadd.f32 %v2489_v33, %v5392_v11  ;;  %2722 = vst [vmem:[%s5413_s12 + $0xc50] sm:$0xff] %v2318_v36  ;;  %v2321_v34 = vadd.f32 %v2320_v60, %v5419_v37 }
 0x308   : > { %2725 = vst [vmem:[%s5413_s12 + $0xc88] sm:$0xff] %v2152_v49 }
 0x309   : > { %2727 = vst [vmem:[%s5413_s12 + $0xc98] sm:$0xff] %v2490_v48 }
 0x30a   : > { %2726 = vst [vmem:[%s5413_s12 + $0xc90] sm:$0xff] %v2321_v34 }
 0x30b   : > { %v1974_v25 = vpop.f32.mrf.mxu1 }
 0x30c   : > { %v1975_v41 = vadd.f32 %v1974_v25, %v5390_v6 }
 0x30d   : > { %v2153_v40 = vpop.f32.mrf.mxu2 }
 0x30e   : > { %2712 = vst [vmem:[%s5413_s12 + $0xbc0] sm:$0xff] %v1975_v41  ;;  %v2491_v12 = vpop.f32.mrf.mxu0  ;;  %v2322_v54 = vpop.f32.mrf.mxu3  ;;  %v2154_v5 = vadd.f32 %v2153_v40, %v5416_v1 }
 0x30f   : > { %v2492_v53 = vadd.f32 %v2491_v12, %v5392_v11  ;;  %v2323_v20 = vadd.f32 %v2322_v54, %v5419_v37 }
 0x310   : > { %2729 = vst [vmem:[%s5413_s12 + $0xcc8] sm:$0xff] %v2154_v5 }
 0x311   : > { %2731 = vst [vmem:[%s5413_s12 + $0xcd8] sm:$0xff] %v2492_v53 }
 0x312   : > { %3000 = vmatmul.bf16.gmra.mxu1 %v5224_v62  ;;  %3169 = vmatmul.bf16.gmra.mxu2 %v5224_v62  ;;  %2730 = vst [vmem:[%s5413_s12 + $0xcd0] sm:$0xff] %v2323_v20 }
 0x313   : > { %3338 = vmatmul.bf16.gmra.mxu3 %v5224_v62  ;;  %3507 = vmatmul.bf16.gmra.mxu0 %v5224_v62  ;;  %v1977_v62 = vpop.f32.mrf.mxu1 }
 0x314   : > { %v1978_v43 = vadd.f32 %v1977_v62, %v5390_v6 }
 0x315   : > { %v2156_v32 = vpop.f32.mrf.mxu2 }
 0x316   : > { %2716 = vst [vmem:[%s5413_s12 + $0xc00] sm:$0xff] %v1978_v43  ;;  %v2494_v62 = vpop.f32.mrf.mxu0  ;;  %v2325_v22 = vpop.f32.mrf.mxu3  ;;  %v2157_v59 = vadd.f32 %v2156_v32, %v5416_v1 }
 0x317   : > { %v2495_v43 = vadd.f32 %v2494_v62, %v5392_v11  ;;  %v2326_v56 = vadd.f32 %v2325_v22, %v5419_v37 }
 0x318   : > { %2733 = vst [vmem:[%s5413_s12 + $0xd08] sm:$0xff] %v2157_v59 }
 0x319   : > { %2735 = vst [vmem:[%s5413_s12 + $0xd18] sm:$0xff] %v2495_v43 }
 0x31a   : > { %2734 = vst [vmem:[%s5413_s12 + $0xd10] sm:$0xff] %v2326_v56 }
 0x31b   : > { %v1979_v10 = vpop.f32.mrf.mxu1 }
 0x31c   : > { %v1980_v63 = vadd.f32 %v1979_v10, %v5390_v6 }
 0x31d   : > { %v2158_v3 = vpop.f32.mrf.mxu2 }
 0x31e   : > { %2720 = vst [vmem:[%s5413_s12 + $0xc40] sm:$0xff] %v1980_v63  ;;  %v2496_v10 = vpop.f32.mrf.mxu0  ;;  %v2327_v46 = vpop.f32.mrf.mxu3  ;;  %v2159_v28 = vadd.f32 %v2158_v3, %v5416_v1 }
 0x31f   : > { %v2497_v63 = vadd.f32 %v2496_v10, %v5392_v11  ;;  %v2328_v31 = vadd.f32 %v2327_v46, %v5419_v37 }
 0x320   : > { %2737 = vst [vmem:[%s5413_s12 + $0xd48] sm:$0xff] %v2159_v28 }
 0x321   : > { %2739 = vst [vmem:[%s5413_s12 + $0xd58] sm:$0xff] %v2497_v63 }
 0x322   : > { %3005 = vmatmul.bf16.gmra.mxu1 %v5235_v44  ;;  %3174 = vmatmul.bf16.gmra.mxu2 %v5235_v44  ;;  %2738 = vst [vmem:[%s5413_s12 + $0xd50] sm:$0xff] %v2328_v31 }
 0x323   : > { %3343 = vmatmul.bf16.gmra.mxu3 %v5235_v44  ;;  %3512 = vmatmul.bf16.gmra.mxu0 %v5235_v44  ;;  %v1982_v44 = vpop.f32.mrf.mxu1 }
 0x324   : > { %v1983_v58 = vadd.f32 %v1982_v44, %v5390_v6 }
 0x326   : > { %2724 = vst [vmem:[%s5413_s12 + $0xc80] sm:$0xff] %v1983_v58  ;;  %v2499_v36 = vpop.f32.mrf.mxu0  ;;  %v2161_v58 = vpop.f32.mrf.mxu2 }
 0x327   : > { %v2500_v33 = vadd.f32 %v2499_v36, %v5392_v11  ;;  %v2330_v48 = vpop.f32.mrf.mxu3  ;;  %v2162_v51 = vadd.f32 %v2161_v58, %v5416_v1 }
 0x328   : > { %v2331_v60 = vadd.f32 %v2330_v48, %v5419_v37 }
 0x329   : > { %2743 = vst [vmem:[%s5413_s12 + $0xd98] sm:$0xff] %v2500_v33 }
 0x32a   : > { %2741 = vst [vmem:[%s5413_s12 + $0xd88] sm:$0xff] %v2162_v51 }
 0x32b   : > { %v1984_v25 = vpop.f32.mrf.mxu1  ;;  %2742 = vst [vmem:[%s5413_s12 + $0xd90] sm:$0xff] %v2331_v60 }
 0x32c   : > { %v1985_v41 = vadd.f32 %v1984_v25, %v5390_v6 }
 0x32e   : > { %2728 = vst [vmem:[%s5413_s12 + $0xcc0] sm:$0xff] %v1985_v41  ;;  %v2501_v34 = vpop.f32.mrf.mxu0  ;;  %v2163_v41 = vpop.f32.mrf.mxu2 }
 0x32f   : > { %v2502_v12 = vadd.f32 %v2501_v34, %v5392_v11  ;;  %v2332_v53 = vpop.f32.mrf.mxu3  ;;  %v2164_v40 = vadd.f32 %v2163_v41, %v5416_v1 }
 0x330   : > { %v2333_v54 = vadd.f32 %v2332_v53, %v5419_v37 }
 0x331   : > { %2747 = vst [vmem:[%s5413_s12 + $0xdd8] sm:$0xff] %v2502_v12 }
 0x332   : > { %3010 = vmatmul.bf16.gmra.mxu1 %v5247_v7  ;;  %3179 = vmatmul.bf16.gmra.mxu2 %v5247_v7  ;;  %2745 = vst [vmem:[%s5413_s12 + $0xdc8] sm:$0xff] %v2164_v40 }
 0x333   : > { %3348 = vmatmul.bf16.gmra.mxu3 %v5247_v7  ;;  %3517 = vmatmul.bf16.gmra.mxu0 %v5247_v7  ;;  %v1987_v7 = vpop.f32.mrf.mxu1  ;;  %2746 = vst [vmem:[%s5413_s12 + $0xdd0] sm:$0xff] %v2333_v54 }
 0x334   : > { %v1988_v30 = vadd.f32 %v1987_v7, %v5390_v6 }
 0x336   : > { %2732 = vst [vmem:[%s5413_s12 + $0xd00] sm:$0xff] %v1988_v30  ;;  %v2504_v5 = vpop.f32.mrf.mxu0  ;;  %v2166_v62 = vpop.f32.mrf.mxu2 }
 0x337   : > { %v2505_v7 = vadd.f32 %v2504_v5, %v5392_v11  ;;  %v2335_v30 = vpop.f32.mrf.mxu3  ;;  %v2167_v43 = vadd.f32 %v2166_v62, %v5416_v1 }
 0x338   : > { %v2336_v32 = vadd.f32 %v2335_v30, %v5419_v37 }
 0x339   : > { %2751 = vst [vmem:[%s5413_s12 + $0xe18] sm:$0xff] %v2505_v7 }
 0x33a   : > { %2749 = vst [vmem:[%s5413_s12 + $0xe08] sm:$0xff] %v2167_v43 }
 0x33b   : > { %v1989_v45 = vpop.f32.mrf.mxu1  ;;  %2750 = vst [vmem:[%s5413_s12 + $0xe10] sm:$0xff] %v2336_v32 }
 0x33c   : > { %v1990_v8 = vadd.f32 %v1989_v45, %v5390_v6 }
 0x33e   : > { %2736 = vst [vmem:[%s5413_s12 + $0xd40] sm:$0xff] %v1990_v8  ;;  %v2506_v59 = vpop.f32.mrf.mxu0  ;;  %v2168_v10 = vpop.f32.mrf.mxu2 }
 0x33f   : > { %v2507_v45 = vadd.f32 %v2506_v59, %v5392_v11  ;;  %v2337_v8 = vpop.f32.mrf.mxu3  ;;  %v2169_v63 = vadd.f32 %v2168_v10, %v5416_v1 }
 0x340   : > { %v2338_v3 = vadd.f32 %v2337_v8, %v5419_v37 }
 0x341   : > { %2755 = vst [vmem:[%s5413_s12 + $0xe58] sm:$0xff] %v2507_v45 }
 0x342   : > { %3015 = vmatmul.bf16.gmra.mxu1 %v5263_v39  ;;  %3184 = vmatmul.bf16.gmra.mxu2 %v5263_v39  ;;  %2753 = vst [vmem:[%s5413_s12 + $0xe48] sm:$0xff] %v2169_v63 }
 0x343   : > { %3353 = vmatmul.bf16.gmra.mxu3 %v5263_v39  ;;  %3522 = vmatmul.bf16.gmra.mxu0 %v5263_v39  ;;  %v1992_v39 = vpop.f32.mrf.mxu1  ;;  %2754 = vst [vmem:[%s5413_s12 + $0xe50] sm:$0xff] %v2338_v3 }
 0x344   : > { %v1993_v44 = vadd.f32 %v1992_v39, %v5390_v6 }
 0x346   : > { %2740 = vst [vmem:[%s5413_s12 + $0xd80] sm:$0xff] %v1993_v44  ;;  %v2509_v46 = vpop.f32.mrf.mxu0  ;;  %v2171_v39 = vpop.f32.mrf.mxu2 }
 0x347   : > { %v2510_v31 = vadd.f32 %v2509_v46, %v5392_v11  ;;  %v2340_v36 = vpop.f32.mrf.mxu3  ;;  %v2172_v44 = vadd.f32 %v2171_v39, %v5416_v1 }
 0x348   : > { %v2341_v33 = vadd.f32 %v2340_v36, %v5419_v37 }
 0x349   : > { %2759 = vst [vmem:[%s5413_s12 + $0xe98] sm:$0xff] %v2510_v31 }
 0x34a   : > { %2757 = vst [vmem:[%s5413_s12 + $0xe88] sm:$0xff] %v2172_v44  ;;  %v2812_v44 = vld [vmem:[#allocation10 + $0x4] sm:$0xf] }
 0x34b   : > { %v1994_v49 = vpop.f32.mrf.mxu1  ;;  %2758 = vst [vmem:[%s5413_s12 + $0xe90] sm:$0xff] %v2341_v33  ;;  %v6208_v33 = vperm.slane %v2812_v44, 0 }
 0x34c   : > { %v1995_v25 = vadd.f32 %v1994_v49, %v5390_v6 }
 0x34e   : > { %2744 = vst [vmem:[%s5413_s12 + $0xdc0] sm:$0xff] %v1995_v25  ;;  %v2511_v48 = vpop.f32.mrf.mxu0  ;;  %v2173_v49 = vpop.f32.mrf.mxu2 }
 0x34f   : > { %v2512_v60 = vadd.f32 %v2511_v48, %v5392_v11  ;;  %v2342_v34 = vpop.f32.mrf.mxu3  ;;  %v2174_v25 = vadd.f32 %v2173_v49, %v5416_v1 }
 0x350   : > { %v2343_v12 = vadd.f32 %v2342_v34, %v5419_v37 }
 0x351   : > { %2763 = vst [vmem:[%s5413_s12 + $0xed8] sm:$0xff] %v2512_v60 }
 0x352   : > { %3020 = vmatmul.bf16.gmra.mxu1 %v5274_v2  ;;  %3189 = vmatmul.bf16.gmra.mxu2 %v5274_v2  ;;  %2761 = vst [vmem:[%s5413_s12 + $0xec8] sm:$0xff] %v2174_v25  ;;  %v6219_v25 = vperm.slane %v2812_v44, 1 }
 0x353   : > { %3358 = vmatmul.bf16.gmra.mxu3 %v5274_v2  ;;  %3527 = vmatmul.bf16.gmra.mxu0 %v5274_v2  ;;  %v1997_v2 = vpop.f32.mrf.mxu1  ;;  %2762 = vst [vmem:[%s5413_s12 + $0xed0] sm:$0xff] %v2343_v12  ;;  %v6221_v12 = vperm.slane %v2812_v44, 2 }
 0x354   : > { %v1998_v20 = vadd.f32 %v1997_v2, %v5390_v6 }
 0x356   : > { %2748 = vst [vmem:[%s5413_s12 + $0xe00] sm:$0xff] %v1998_v20  ;;  %v2514_v41 = vpop.f32.mrf.mxu0  ;;  %v2176_v54 = vpop.f32.mrf.mxu2 }
 0x357   : > { %v2515_v40 = vadd.f32 %v2514_v41, %v5392_v11  ;;  %v2345_v2 = vpop.f32.mrf.mxu3  ;;  %v2177_v5 = vadd.f32 %v2176_v54, %v5416_v1 }
 0x358   : > { %v2346_v20 = vadd.f32 %v2345_v2, %v5419_v37 }
 0x359   : > { %2767 = vst [vmem:[%s5413_s12 + $0xf18] sm:$0xff] %v2515_v40 }
 0x35a   : > { %2765 = vst [vmem:[%s5413_s12 + $0xf08] sm:$0xff] %v2177_v5 }
 0x35b   : > { %v1999_v22 = vpop.f32.mrf.mxu1  ;;  %2766 = vst [vmem:[%s5413_s12 + $0xf10] sm:$0xff] %v2346_v20 }
 0x35c   : > { %v2000_v56 = vadd.f32 %v1999_v22, %v5390_v6 }
 0x35e   : > { %2752 = vst [vmem:[%s5413_s12 + $0xe40] sm:$0xff] %v2000_v56  ;;  %v2516_v62 = vpop.f32.mrf.mxu0  ;;  %v2178_v32 = vpop.f32.mrf.mxu2 }
 0x35f   : > { %v2517_v43 = vadd.f32 %v2516_v62, %v5392_v11  ;;  %v2347_v22 = vpop.f32.mrf.mxu3  ;;  %v2179_v59 = vadd.f32 %v2178_v32, %v5416_v1 }
 0x360   : > { %v2348_v56 = vadd.f32 %v2347_v22, %v5419_v37 }
 0x361   : > { %2771 = vst [vmem:[%s5413_s12 + $0xf58] sm:$0xff] %v2517_v43 }
 0x362   : > { %3025 = vmatmul.bf16.gmra.mxu1 %v5285_v35  ;;  %3194 = vmatmul.bf16.gmra.mxu2 %v5285_v35  ;;  %2769 = vst [vmem:[%s5413_s12 + $0xf48] sm:$0xff] %v2179_v59 }
 0x363   : > { %3363 = vmatmul.bf16.gmra.mxu3 %v5285_v35  ;;  %3532 = vmatmul.bf16.gmra.mxu0 %v5285_v35  ;;  %v2002_v35 = vpop.f32.mrf.mxu1  ;;  %2770 = vst [vmem:[%s5413_s12 + $0xf50] sm:$0xff] %v2348_v56 }
 0x364   : > { %v2003_v28 = vadd.f32 %v2002_v35, %v5390_v6 }
 0x366   : > { %2756 = vst [vmem:[%s5413_s12 + $0xe80] sm:$0xff] %v2003_v28  ;;  %v2519_v45 = vpop.f32.mrf.mxu0  ;;  %v2181_v63 = vpop.f32.mrf.mxu2 }
 0x367   : > { %v2520_v8 = vadd.f32 %v2519_v45, %v5392_v11  ;;  %v2350_v3 = vpop.f32.mrf.mxu3  ;;  %v2182_v35 = vadd.f32 %v2181_v63, %v5416_v1 }
 0x368   : > { %v2351_v46 = vadd.f32 %v2350_v3, %v5419_v37 }
 0x369   : > { %2775 = vst [vmem:[%s5413_s12 + $0xf98] sm:$0xff] %v2520_v8 }
 0x36a   : > { %2773 = vst [vmem:[%s5413_s12 + $0xf88] sm:$0xff] %v2182_v35 }
 0x36b   : > { %v2004_v58 = vpop.f32.mrf.mxu1  ;;  %2774 = vst [vmem:[%s5413_s12 + $0xf90] sm:$0xff] %v2351_v46 }
 0x36c   : > { %v2005_v51 = vadd.f32 %v2004_v58, %v5390_v6  ;;  %v6210_v58 = vperm.slane %v2812_v44, 3 }
 0x36e   : > { %2760 = vst [vmem:[%s5413_s12 + $0xec0] sm:$0xff] %v2005_v51  ;;  %v2521_v31 = vpop.f32.mrf.mxu0 }
 0x36f   : > { %v2522_v36 = vadd.f32 %v2521_v31, %v5392_v11  ;;  %v2352_v48 = vpop.f32.mrf.mxu3 }
 0x370   : > { %v2353_v60 = vadd.f32 %v2352_v48, %v5419_v37 }
 0x371   : > { %2779 = vst [vmem:[%s5413_s12 + $0xfd8] sm:$0xff] %v2522_v36 }
 0x372   : > { %3030 = vmatmul.bf16.gmra.mxu1 %v5296_v17  ;;  %3199 = vmatmul.bf16.gmra.mxu2 %v5296_v17  ;;  %2778 = vst [vmem:[%s5413_s12 + $0xfd0] sm:$0xff] %v2353_v60 }
 0x373   : > { %3368 = vmatmul.bf16.gmra.mxu3 %v5296_v17  ;;  %3537 = vmatmul.bf16.gmra.mxu0 %v5296_v17  ;;  %v2007_v17 = vpop.f32.mrf.mxu1 }
 0x374   : > { %v2008_v53 = vadd.f32 %v2007_v17, %v5390_v6 }
 0x376   : > { %2764 = vst [vmem:[%s5413_s12 + $0xf00] sm:$0xff] %v2008_v53  ;;  %v3498_v49 = vpop.f32.mrf.mxu0 }
 0x377   : > { %v3499_v34 = vadd.f32 %v3498_v49, %v6210_v58  ;;  %v3329_v37 = vpop.f32.mrf.mxu3 }
 0x378   : > { %v3330_v41 = vadd.f32 %v3329_v37, %v6221_v12 }
 0x379   : > { %3661 = vst [vmem:[%s5413_s12 + $0x38] sm:$0xff] %v3499_v34 }
 0x37a   : > { %3660 = vst [vmem:[%s5413_s12 + $0x30] sm:$0xff] %v3330_v41 }
 0x37b   : > { %v2009_v7 = vpop.f32.mrf.mxu1 }
 0x37c   : > { %v2010_v30 = vadd.f32 %v2009_v7, %v5390_v6 }
 0x37e   : > { %2768 = vst [vmem:[%s5413_s12 + $0xf40] sm:$0xff] %v2010_v30  ;;  %v3500_v40 = vpop.f32.mrf.mxu0 }
 0x37f   : > { %v3501_v2 = vadd.f32 %v3500_v40, %v6210_v58  ;;  %v3331_v20 = vpop.f32.mrf.mxu3 }
 0x380   : > { %v3332_v62 = vadd.f32 %v3331_v20, %v6221_v12 }
 0x381   : > { %3665 = vst [vmem:[%s5413_s12 + $0x78] sm:$0xff] %v3501_v2 }
 0x382   : > { %3035 = vmatmul.bf16.gmra.mxu1 %v5306_v27  ;;  %3204 = vmatmul.bf16.gmra.mxu2 %v5306_v27  ;;  %3664 = vst [vmem:[%s5413_s12 + $0x70] sm:$0xff] %v3332_v62 }
 0x383   : > { %3373 = vmatmul.bf16.gmra.mxu3 %v5306_v27  ;;  %3542 = vmatmul.bf16.gmra.mxu0 %v5306_v27  ;;  %v2012_v27 = vpop.f32.mrf.mxu1 }
 0x384   : > { %v2013_v10 = vadd.f32 %v2012_v27, %v5390_v6 }
 0x386   : > { %2772 = vst [vmem:[%s5413_s12 + $0xf80] sm:$0xff] %v2013_v10  ;;  %v3503_v30 = vpop.f32.mrf.mxu0 }
 0x387   : > { %v3504_v32 = vadd.f32 %v3503_v30, %v6210_v58  ;;  %v3334_v59 = vpop.f32.mrf.mxu3 }
 0x388   : > { %v3335_v27 = vadd.f32 %v3334_v59, %v6221_v12 }
 0x389   : > { %3669 = vst [vmem:[%s5413_s12 + $0xb8] sm:$0xff] %v3504_v32 }
 0x38a   : > { %3668 = vst [vmem:[%s5413_s12 + $0xb0] sm:$0xff] %v3335_v27 }
 0x38b   : > { %v2014_v28 = vpop.f32.mrf.mxu1 }
 0x38c   : > { %v2015_v39 = vadd.f32 %v2014_v28, %v5390_v6 }
 0x38e   : > { %2776 = vst [vmem:[%s5413_s12 + $0xfc0] sm:$0xff] %v2015_v39  ;;  %v3505_v10 = vpop.f32.mrf.mxu0 }
 0x38f   : > { %v3506_v63 = vadd.f32 %v3505_v10, %v6210_v58  ;;  %v3336_v35 = vpop.f32.mrf.mxu3 }
 0x390   : > { %v3337_v28 = vadd.f32 %v3336_v35, %v6221_v12 }
 0x391   : > { %3673 = vst [vmem:[%s5413_s12 + $0xf8] sm:$0xff] %v3506_v63 }
 0x392   : > { %3040 = vmatmul.bf16.gmra.mxu1 %v5317_v50  ;;  %3209 = vmatmul.bf16.gmra.mxu2 %v5317_v50  ;;  %3672 = vst [vmem:[%s5413_s12 + $0xf0] sm:$0xff] %v3337_v28 }
 0x393   : > { %3378 = vmatmul.bf16.gmra.mxu3 %v5317_v50  ;;  %3547 = vmatmul.bf16.gmra.mxu0 %v5317_v50  ;;  %v2183_v50 = vpop.f32.mrf.mxu2  ;;  %v2991_v6 = vpop.f32.mrf.mxu1 }
 0x394   : > { %v2184_v51 = vadd.f32 %v2183_v50, %v5416_v1  ;;  %v2992_v11 = vadd.f32 %v2991_v6, %v6208_v33 }
 0x396   : > { %2777 = vst [vmem:[%s5413_s12 + $0xfc8] sm:$0xff] %v2184_v51  ;;  %v3508_v31 = vpop.f32.mrf.mxu0 }
 0x397   : > { %3658 = vst [vmem:[%s5413_s12 + $0x20] sm:$0xff] %v2992_v11  ;;  %v3509_v36 = vadd.f32 %v3508_v31, %v6210_v58  ;;  %v3339_v50 = vpop.f32.mrf.mxu3 }
 0x398   : > { %v3340_v51 = vadd.f32 %v3339_v50, %v6221_v12 }
 0x399   : > { %3677 = vst [vmem:[%s5413_s12 + $0x138] sm:$0xff] %v3509_v36 }
 0x39a   : > { %3676 = vst [vmem:[%s5413_s12 + $0x130] sm:$0xff] %v3340_v51 }
 0x39b   : > { %v3160_v1 = vpop.f32.mrf.mxu2  ;;  %v2993_v53 = vpop.f32.mrf.mxu1 }
 0x39c   : > { %v3161_v17 = vadd.f32 %v3160_v1, %v6219_v25  ;;  %v2994_v54 = vadd.f32 %v2993_v53, %v6208_v33 }
 0x39e   : > { %3659 = vst [vmem:[%s5413_s12 + $0x28] sm:$0xff] %v3161_v17  ;;  %v3510_v6 = vpop.f32.mrf.mxu0 }
 0x39f   : > { %3662 = vst [vmem:[%s5413_s12 + $0x60] sm:$0xff] %v2994_v54  ;;  %v3511_v11 = vadd.f32 %v3510_v6, %v6210_v58  ;;  %v3341_v1 = vpop.f32.mrf.mxu3 }
 0x3a0   : > { %v3342_v17 = vadd.f32 %v3341_v1, %v6221_v12 }
 0x3a1   : > { %3681 = vst [vmem:[%s5413_s12 + $0x178] sm:$0xff] %v3511_v11 }
 0x3a2   : > { %3045 = vmatmul.bf16.gmra.mxu1 %v5330_v16  ;;  %3214 = vmatmul.bf16.gmra.mxu2 %v5330_v16  ;;  %3680 = vst [vmem:[%s5413_s12 + $0x170] sm:$0xff] %v3342_v17 }
 0x3a3   : > { %3383 = vmatmul.bf16.gmra.mxu3 %v5330_v16  ;;  %3552 = vmatmul.bf16.gmra.mxu0 %v5330_v16  ;;  %v3162_v5 = vpop.f32.mrf.mxu2  ;;  %v2996_v16 = vpop.f32.mrf.mxu1 }
 0x3a4   : > { %v3163_v7 = vadd.f32 %v3162_v5, %v6219_v25  ;;  %v2997_v43 = vadd.f32 %v2996_v16, %v6208_v33 }
 0x3a6   : > { %3663 = vst [vmem:[%s5413_s12 + $0x68] sm:$0xff] %v3163_v7  ;;  %v3513_v41 = vpop.f32.mrf.mxu0 }
 0x3a7   : > { %3666 = vst [vmem:[%s5413_s12 + $0xa0] sm:$0xff] %v2997_v43  ;;  %v3514_v40 = vadd.f32 %v3513_v41, %v6210_v58  ;;  %v3344_v2 = vpop.f32.mrf.mxu3 }
 0x3a8   : > { %v3345_v20 = vadd.f32 %v3344_v2, %v6221_v12 }
 0x3a9   : > { %3685 = vst [vmem:[%s5413_s12 + $0x1b8] sm:$0xff] %v3514_v40 }
 0x3aa   : > { %3684 = vst [vmem:[%s5413_s12 + $0x1b0] sm:$0xff] %v3345_v20 }
 0x3ab   : > { %v3165_v22 = vpop.f32.mrf.mxu2  ;;  %v2998_v45 = vpop.f32.mrf.mxu1 }
 0x3ac   : > { %v3166_v56 = vadd.f32 %v3165_v22, %v6219_v25  ;;  %v2999_v8 = vadd.f32 %v2998_v45, %v6208_v33 }
 0x3ae   : > { %3667 = vst [vmem:[%s5413_s12 + $0xa8] sm:$0xff] %v3166_v56  ;;  %v3515_v62 = vpop.f32.mrf.mxu0 }
 0x3af   : > { %3670 = vst [vmem:[%s5413_s12 + $0xe0] sm:$0xff] %v2999_v8  ;;  %v3516_v30 = vadd.f32 %v3515_v62, %v6210_v58  ;;  %v3346_v32 = vpop.f32.mrf.mxu3 }
 0x3b0   : > { %v3347_v59 = vadd.f32 %v3346_v32, %v6221_v12 }
 0x3b1   : > { %3689 = vst [vmem:[%s5413_s12 + $0x1f8] sm:$0xff] %v3516_v30 }
 0x3b2   : > { %3050 = vmatmul.bf16.gmra.mxu1 %v5367_v24  ;;  %3219 = vmatmul.bf16.gmra.mxu2 %v5367_v24  ;;  %3688 = vst [vmem:[%s5413_s12 + $0x1f0] sm:$0xff] %v3347_v59 }
 0x3b3   : > { %3388 = vmatmul.bf16.gmra.mxu3 %v5367_v24  ;;  %3557 = vmatmul.bf16.gmra.mxu0 %v5367_v24  ;;  %v3167_v3 = vpop.f32.mrf.mxu2  ;;  %v3001_v24 = vpop.f32.mrf.mxu1 }
 0x3b4   : > { %v3168_v46 = vadd.f32 %v3167_v3, %v6219_v25  ;;  %v3002_v39 = vadd.f32 %v3001_v24, %v6208_v33 }
 0x3b6   : > { %3671 = vst [vmem:[%s5413_s12 + $0xe8] sm:$0xff] %v3168_v46  ;;  %v3518_v56 = vpop.f32.mrf.mxu0 }
 0x3b7   : > { %3674 = vst [vmem:[%s5413_s12 + $0x120] sm:$0xff] %v3002_v39  ;;  %v3519_v45 = vadd.f32 %v3518_v56, %v6210_v58  ;;  %v3349_v8 = vpop.f32.mrf.mxu3 }
 0x3b8   : > { %v3350_v3 = vadd.f32 %v3349_v8, %v6221_v12 }
 0x3b9   : > { %3693 = vst [vmem:[%s5413_s12 + $0x238] sm:$0xff] %v3519_v45 }
 0x3ba   : > { %3692 = vst [vmem:[%s5413_s12 + $0x230] sm:$0xff] %v3350_v3 }
 0x3bb   : > { %v3170_v44 = vpop.f32.mrf.mxu2  ;;  %v3003_v60 = vpop.f32.mrf.mxu1 }
 0x3bc   : > { %v3171_v48 = vadd.f32 %v3170_v44, %v6219_v25  ;;  %v3004_v49 = vadd.f32 %v3003_v60, %v6208_v33 }
 0x3be   : > { %3675 = vst [vmem:[%s5413_s12 + $0x128] sm:$0xff] %v3171_v48  ;;  %v3520_v46 = vpop.f32.mrf.mxu0 }
 0x3bf   : > { %3678 = vst [vmem:[%s5413_s12 + $0x160] sm:$0xff] %v3004_v49  ;;  %v3521_v24 = vadd.f32 %v3520_v46, %v6210_v58  ;;  %v3351_v39 = vpop.f32.mrf.mxu3 }
 0x3c0   : > { %v3352_v44 = vadd.f32 %v3351_v39, %v6221_v12 }
 0x3c1   : > { %3697 = vst [vmem:[%s5413_s12 + $0x278] sm:$0xff] %v3521_v24 }
 0x3c2   : > { %3055 = vmatmul.bf16.gmra.mxu1 %v5407_v52  ;;  %3224 = vmatmul.bf16.gmra.mxu2 %v5407_v52  ;;  %3696 = vst [vmem:[%s5413_s12 + $0x270] sm:$0xff] %v3352_v44 }
 0x3c3   : > { %3393 = vmatmul.bf16.gmra.mxu3 %v5407_v52  ;;  %3562 = vmatmul.bf16.gmra.mxu0 %v5407_v52  ;;  %v3172_v34 = vpop.f32.mrf.mxu2  ;;  %v3006_v52 = vpop.f32.mrf.mxu1 }
 0x3c4   : > { %v3173_v37 = vadd.f32 %v3172_v34, %v6219_v25  ;;  %v3007_v53 = vadd.f32 %v3006_v52, %v6208_v33 }
 0x3c6   : > { %3679 = vst [vmem:[%s5413_s12 + $0x168] sm:$0xff] %v3173_v37  ;;  %v3523_v50 = vpop.f32.mrf.mxu0 }
 0x3c7   : > { %3682 = vst [vmem:[%s5413_s12 + $0x1a0] sm:$0xff] %v3007_v53  ;;  %v3524_v51 = vadd.f32 %v3523_v50, %v6210_v58  ;;  %v3354_v6 = vpop.f32.mrf.mxu3 }
 0x3c8   : > { %v3355_v11 = vadd.f32 %v3354_v6, %v6221_v12 }
 0x3c9   : > { %3701 = vst [vmem:[%s5413_s12 + $0x2b8] sm:$0xff] %v3524_v51 }
 0x3ca   : > { %3700 = vst [vmem:[%s5413_s12 + $0x2b0] sm:$0xff] %v3355_v11 }
 0x3cb   : > { %v3175_v54 = vpop.f32.mrf.mxu2  ;;  %v3008_v7 = vpop.f32.mrf.mxu1 }
 0x3cc   : > { %v3176_v5 = vadd.f32 %v3175_v54, %v6219_v25  ;;  %v3009_v16 = vadd.f32 %v3008_v7, %v6208_v33 }
 0x3ce   : > { %3683 = vst [vmem:[%s5413_s12 + $0x1a8] sm:$0xff] %v3176_v5  ;;  %v3525_v1 = vpop.f32.mrf.mxu0 }
 0x3cf   : > { %3686 = vst [vmem:[%s5413_s12 + $0x1e0] sm:$0xff] %v3009_v16  ;;  %v3526_v17 = vadd.f32 %v3525_v1, %v6210_v58  ;;  %v3356_v41 = vpop.f32.mrf.mxu3 }
 0x3d0   : > { %v3357_v40 = vadd.f32 %v3356_v41, %v6221_v12 }
 0x3d1   : > { %3705 = vst [vmem:[%s5413_s12 + $0x2f8] sm:$0xff] %v3526_v17 }
 0x3d2   : > { %3060 = vmatmul.bf16.gmra.mxu1 %v5480_v29  ;;  %3229 = vmatmul.bf16.gmra.mxu2 %v5480_v29  ;;  %3704 = vst [vmem:[%s5413_s12 + $0x2f0] sm:$0xff] %v3357_v40 }
 0x3d3   : > { %3398 = vmatmul.bf16.gmra.mxu3 %v5480_v29  ;;  %3567 = vmatmul.bf16.gmra.mxu0 %v5480_v29  ;;  %v3177_v43 = vpop.f32.mrf.mxu2  ;;  %v3011_v29 = vpop.f32.mrf.mxu1 }
 0x3d4   : > { %v3178_v22 = vadd.f32 %v3177_v43, %v6219_v25  ;;  %v3012_v27 = vadd.f32 %v3011_v29, %v6208_v33 }
 0x3d6   : > { %3687 = vst [vmem:[%s5413_s12 + $0x1e8] sm:$0xff] %v3178_v22  ;;  %v3528_v54 = vpop.f32.mrf.mxu0 }
 0x3d7   : > { %3690 = vst [vmem:[%s5413_s12 + $0x220] sm:$0xff] %v3012_v27  ;;  %v3529_v5 = vadd.f32 %v3528_v54, %v6210_v58  ;;  %v3359_v7 = vpop.f32.mrf.mxu3 }
 0x3d8   : > { %v3360_v16 = vadd.f32 %v3359_v7, %v6221_v12 }
 0x3d9   : > { %3709 = vst [vmem:[%s5413_s12 + $0x338] sm:$0xff] %v3529_v5 }
 0x3da   : > { %3708 = vst [vmem:[%s5413_s12 + $0x330] sm:$0xff] %v3360_v16 }
 0x3db   : > { %v3180_v10 = vpop.f32.mrf.mxu2  ;;  %v3013_v35 = vpop.f32.mrf.mxu1 }
 0x3dc   : > { %v3181_v63 = vadd.f32 %v3180_v10, %v6219_v25  ;;  %v3014_v28 = vadd.f32 %v3013_v35, %v6208_v33 }
 0x3de   : > { %3691 = vst [vmem:[%s5413_s12 + $0x228] sm:$0xff] %v3181_v63  ;;  %v3530_v43 = vpop.f32.mrf.mxu0 }
 0x3df   : > { %3694 = vst [vmem:[%s5413_s12 + $0x260] sm:$0xff] %v3014_v28  ;;  %v3531_v22 = vadd.f32 %v3530_v43, %v6210_v58  ;;  %v3361_v29 = vpop.f32.mrf.mxu3 }
 0x3e0   : > { %v3362_v27 = vadd.f32 %v3361_v29, %v6221_v12 }
 0x3e1   : > { %3713 = vst [vmem:[%s5413_s12 + $0x378] sm:$0xff] %v3531_v22 }
 0x3e2   : > { %3065 = vmatmul.bf16.gmra.mxu1 %v5524_v4  ;;  %3234 = vmatmul.bf16.gmra.mxu2 %v5524_v4  ;;  %3712 = vst [vmem:[%s5413_s12 + $0x370] sm:$0xff] %v3362_v27 }
 0x3e3   : > { %3403 = vmatmul.bf16.gmra.mxu3 %v5524_v4  ;;  %3572 = vmatmul.bf16.gmra.mxu0 %v5524_v4  ;;  %v3182_v31 = vpop.f32.mrf.mxu2  ;;  %v3016_v4 = vpop.f32.mrf.mxu1 }
 0x3e4   : > { %v3183_v36 = vadd.f32 %v3182_v31, %v6219_v25  ;;  %v3017_v48 = vadd.f32 %v3016_v4, %v6208_v33 }
 0x3e6   : > { %3695 = vst [vmem:[%s5413_s12 + $0x268] sm:$0xff] %v3183_v36  ;;  %v3533_v45 = vpop.f32.mrf.mxu0 }
 0x3e7   : > { %3698 = vst [vmem:[%s5413_s12 + $0x2a0] sm:$0xff] %v3017_v48  ;;  %v3534_v8 = vadd.f32 %v3533_v45, %v6210_v58  ;;  %v3364_v3 = vpop.f32.mrf.mxu3 }
 0x3e8   : > { %v3365_v46 = vadd.f32 %v3364_v3, %v6221_v12 }
 0x3e9   : > { %3717 = vst [vmem:[%s5413_s12 + $0x3b8] sm:$0xff] %v3534_v8 }
 0x3ea   : > { %3716 = vst [vmem:[%s5413_s12 + $0x3b0] sm:$0xff] %v3365_v46 }
 0x3eb   : > { %v3185_v60 = vpop.f32.mrf.mxu2  ;;  %v3018_v34 = vpop.f32.mrf.mxu1 }
 0x3ec   : > { %v3186_v49 = vadd.f32 %v3185_v60, %v6219_v25  ;;  %v3019_v37 = vadd.f32 %v3018_v34, %v6208_v33 }
 0x3ee   : > { %3699 = vst [vmem:[%s5413_s12 + $0x2a8] sm:$0xff] %v3186_v49  ;;  %v3535_v24 = vpop.f32.mrf.mxu0 }
 0x3ef   : > { %3702 = vst [vmem:[%s5413_s12 + $0x2e0] sm:$0xff] %v3019_v37  ;;  %v3536_v39 = vadd.f32 %v3535_v24, %v6210_v58  ;;  %v3366_v44 = vpop.f32.mrf.mxu3 }
 0x3f0   : > { %v3367_v50 = vadd.f32 %v3366_v44, %v6221_v12 }
 0x3f1   : > { %3721 = vst [vmem:[%s5413_s12 + $0x3f8] sm:$0xff] %v3536_v39 }
 0x3f2   : > { %3070 = vmatmul.bf16.gmra.mxu1 %v5555_v15  ;;  %3239 = vmatmul.bf16.gmra.mxu2 %v5555_v15  ;;  %3720 = vst [vmem:[%s5413_s12 + $0x3f0] sm:$0xff] %v3367_v50 }
 0x3f3   : > { %3408 = vmatmul.bf16.gmra.mxu3 %v5555_v15  ;;  %3577 = vmatmul.bf16.gmra.mxu0 %v5555_v15  ;;  %v3187_v52 = vpop.f32.mrf.mxu2  ;;  %v3021_v15 = vpop.f32.mrf.mxu1 }
 0x3f4   : > { %v3188_v53 = vadd.f32 %v3187_v52, %v6219_v25  ;;  %v3022_v2 = vadd.f32 %v3021_v15, %v6208_v33 }
 0x3f6   : > { %3703 = vst [vmem:[%s5413_s12 + $0x2e8] sm:$0xff] %v3188_v53  ;;  %v3538_v48 = vpop.f32.mrf.mxu0 }
 0x3f7   : > { %3706 = vst [vmem:[%s5413_s12 + $0x320] sm:$0xff] %v3022_v2  ;;  %v3539_v60 = vadd.f32 %v3538_v48, %v6210_v58  ;;  %v3369_v49 = vpop.f32.mrf.mxu3 }
 0x3f8   : > { %v3370_v34 = vadd.f32 %v3369_v49, %v6221_v12 }
 0x3f9   : > { %3725 = vst [vmem:[%s5413_s12 + $0x438] sm:$0xff] %v3539_v60 }
 0x3fa   : > { %3724 = vst [vmem:[%s5413_s12 + $0x430] sm:$0xff] %v3370_v34 }
 0x3fb   : > { %v3190_v20 = vpop.f32.mrf.mxu2  ;;  %v3023_v30 = vpop.f32.mrf.mxu1 }
 0x3fc   : > { %v3191_v62 = vadd.f32 %v3190_v20, %v6219_v25  ;;  %v3024_v32 = vadd.f32 %v3023_v30, %v6208_v33 }
 0x3fe   : > { %3707 = vst [vmem:[%s5413_s12 + $0x328] sm:$0xff] %v3191_v62  ;;  %v3540_v37 = vpop.f32.mrf.mxu0 }
 0x3ff   : > { %3710 = vst [vmem:[%s5413_s12 + $0x360] sm:$0xff] %v3024_v32  ;;  %v3541_v52 = vadd.f32 %v3540_v37, %v6210_v58  ;;  %v3371_v53 = vpop.f32.mrf.mxu3 }
 0x400   : > { %v3372_v15 = vadd.f32 %v3371_v53, %v6221_v12 }
 0x401   : > { %3729 = vst [vmem:[%s5413_s12 + $0x478] sm:$0xff] %v3541_v52 }
 0x402   : > { %3075 = vmatmul.bf16.gmra.mxu1 %v5585_v18  ;;  %3244 = vmatmul.bf16.gmra.mxu2 %v5585_v18  ;;  %3728 = vst [vmem:[%s5413_s12 + $0x470] sm:$0xff] %v3372_v15 }
 0x403   : > { %3413 = vmatmul.bf16.gmra.mxu3 %v5585_v18  ;;  %3582 = vmatmul.bf16.gmra.mxu0 %v5585_v18  ;;  %v3192_v59 = vpop.f32.mrf.mxu2  ;;  %v3026_v18 = vpop.f32.mrf.mxu1 }
 0x404   : > { %v3193_v56 = vadd.f32 %v3192_v59, %v6219_v25  ;;  %v3027_v10 = vadd.f32 %v3026_v18, %v6208_v33 }
 0x406   : > { %3711 = vst [vmem:[%s5413_s12 + $0x368] sm:$0xff] %v3193_v56  ;;  %v3543_v54 = vpop.f32.mrf.mxu0 }
 0x407   : > { %3714 = vst [vmem:[%s5413_s12 + $0x3a0] sm:$0xff] %v3027_v10  ;;  %v3544_v5 = vadd.f32 %v3543_v54, %v6210_v58  ;;  %v3374_v7 = vpop.f32.mrf.mxu3 }
 0x408   : > { %v3375_v16 = vadd.f32 %v3374_v7, %v6221_v12 }
 0x409   : > { %3733 = vst [vmem:[%s5413_s12 + $0x4b8] sm:$0xff] %v3544_v5 }
 0x40a   : > { %3732 = vst [vmem:[%s5413_s12 + $0x4b0] sm:$0xff] %v3375_v16 }
 0x40b   : > { %v3195_v63 = vpop.f32.mrf.mxu2  ;;  %v3028_v28 = vpop.f32.mrf.mxu1 }
 0x40c   : > { %v3196_v35 = vadd.f32 %v3195_v63, %v6219_v25  ;;  %v3029_v31 = vadd.f32 %v3028_v28, %v6208_v33 }
 0x40e   : > { %3715 = vst [vmem:[%s5413_s12 + $0x3a8] sm:$0xff] %v3196_v35  ;;  %v3545_v43 = vpop.f32.mrf.mxu0 }
 0x40f   : > { %3718 = vst [vmem:[%s5413_s12 + $0x3e0] sm:$0xff] %v3029_v31  ;;  %v3546_v22 = vadd.f32 %v3545_v43, %v6210_v58  ;;  %v3376_v29 = vpop.f32.mrf.mxu3 }
 0x410   : > { %v3377_v27 = vadd.f32 %v3376_v29, %v6221_v12 }
 0x411   : > { %3737 = vst [vmem:[%s5413_s12 + $0x4f8] sm:$0xff] %v3546_v22 }
 0x412   : > { %3080 = vmatmul.bf16.gmra.mxu1 %v5612_v21  ;;  %3249 = vmatmul.bf16.gmra.mxu2 %v5612_v21  ;;  %3736 = vst [vmem:[%s5413_s12 + $0x4f0] sm:$0xff] %v3377_v27 }
 0x413   : > { %3418 = vmatmul.bf16.gmra.mxu3 %v5612_v21  ;;  %3587 = vmatmul.bf16.gmra.mxu0 %v5612_v21  ;;  %v3197_v36 = vpop.f32.mrf.mxu2  ;;  %v3031_v21 = vpop.f32.mrf.mxu1 }
 0x414   : > { %v3198_v4 = vadd.f32 %v3197_v36, %v6219_v25  ;;  %v3032_v51 = vadd.f32 %v3031_v21, %v6208_v33 }
 0x416   : > { %3719 = vst [vmem:[%s5413_s12 + $0x3e8] sm:$0xff] %v3198_v4  ;;  %v3548_v18 = vpop.f32.mrf.mxu0 }
 0x417   : > { %3722 = vst [vmem:[%s5413_s12 + $0x420] sm:$0xff] %v3032_v51  ;;  %v3549_v10 = vadd.f32 %v3548_v18, %v6210_v58  ;;  %v3379_v63 = vpop.f32.mrf.mxu3 }
 0x418   : > { %v3380_v35 = vadd.f32 %v3379_v63, %v6221_v12 }
 0x419   : > { %3741 = vst [vmem:[%s5413_s12 + $0x538] sm:$0xff] %v3549_v10 }
 0x41a   : > { %3740 = vst [vmem:[%s5413_s12 + $0x530] sm:$0xff] %v3380_v35 }
 0x41b   : > { %v3200_v6 = vpop.f32.mrf.mxu2  ;;  %v3033_v1 = vpop.f32.mrf.mxu1 }
 0x41c   : > { %v3201_v11 = vadd.f32 %v3200_v6, %v6219_v25  ;;  %v3034_v17 = vadd.f32 %v3033_v1, %v6208_v33 }
 0x41e   : > { %3723 = vst [vmem:[%s5413_s12 + $0x428] sm:$0xff] %v3201_v11  ;;  %v3550_v28 = vpop.f32.mrf.mxu0 }
 0x41f   : > { %3726 = vst [vmem:[%s5413_s12 + $0x460] sm:$0xff] %v3034_v17  ;;  %v3551_v31 = vadd.f32 %v3550_v28, %v6210_v58  ;;  %v3381_v36 = vpop.f32.mrf.mxu3 }
 0x420   : > { %v3382_v4 = vadd.f32 %v3381_v36, %v6221_v12 }
 0x421   : > { %3745 = vst [vmem:[%s5413_s12 + $0x578] sm:$0xff] %v3551_v31 }
 0x422   : > { %3085 = vmatmul.bf16.gmra.mxu1 %v5639_v26  ;;  %3254 = vmatmul.bf16.gmra.mxu2 %v5639_v26  ;;  %3744 = vst [vmem:[%s5413_s12 + $0x570] sm:$0xff] %v3382_v4 }
 0x423   : > { %3423 = vmatmul.bf16.gmra.mxu3 %v5639_v26  ;;  %3592 = vmatmul.bf16.gmra.mxu0 %v5639_v26  ;;  %v3202_v41 = vpop.f32.mrf.mxu2  ;;  %v3036_v26 = vpop.f32.mrf.mxu1 }
 0x424   : > { %v3203_v40 = vadd.f32 %v3202_v41, %v6219_v25  ;;  %v3037_v2 = vadd.f32 %v3036_v26, %v6208_v33 }
 0x426   : > { %3727 = vst [vmem:[%s5413_s12 + $0x468] sm:$0xff] %v3203_v40  ;;  %v3553_v50 = vpop.f32.mrf.mxu0 }
 0x427   : > { %3730 = vst [vmem:[%s5413_s12 + $0x4a0] sm:$0xff] %v3037_v2  ;;  %v3554_v48 = vadd.f32 %v3553_v50, %v6210_v58  ;;  %v3384_v60 = vpop.f32.mrf.mxu3 }
 0x428   : > { %v3385_v49 = vadd.f32 %v3384_v60, %v6221_v12 }
 0x429   : > { %3749 = vst [vmem:[%s5413_s12 + $0x5b8] sm:$0xff] %v3554_v48 }
 0x42a   : > { %3748 = vst [vmem:[%s5413_s12 + $0x5b0] sm:$0xff] %v3385_v49 }
 0x42b   : > { %v3205_v20 = vpop.f32.mrf.mxu2  ;;  %v3038_v30 = vpop.f32.mrf.mxu1 }
 0x42c   : > { %v3206_v62 = vadd.f32 %v3205_v20, %v6219_v25  ;;  %v3039_v32 = vadd.f32 %v3038_v30, %v6208_v33 }
 0x42e   : > { %3731 = vst [vmem:[%s5413_s12 + $0x4a8] sm:$0xff] %v3206_v62  ;;  %v3555_v34 = vpop.f32.mrf.mxu0 }
 0x42f   : > { %3734 = vst [vmem:[%s5413_s12 + $0x4e0] sm:$0xff] %v3039_v32  ;;  %v3556_v37 = vadd.f32 %v3555_v34, %v6210_v58  ;;  %v3386_v52 = vpop.f32.mrf.mxu3 }
 0x430   : > { %v3387_v53 = vadd.f32 %v3386_v52, %v6221_v12 }
 0x431   : > { %3753 = vst [vmem:[%s5413_s12 + $0x5f8] sm:$0xff] %v3556_v37 }
 0x432   : > { %3090 = vmatmul.bf16.gmra.mxu1 %v5672_v13  ;;  %3259 = vmatmul.bf16.gmra.mxu2 %v5672_v13  ;;  %3752 = vst [vmem:[%s5413_s12 + $0x5f0] sm:$0xff] %v3387_v53 }
 0x433   : > { %3428 = vmatmul.bf16.gmra.mxu3 %v5672_v13  ;;  %3597 = vmatmul.bf16.gmra.mxu0 %v5672_v13  ;;  %v3207_v59 = vpop.f32.mrf.mxu2  ;;  %v3041_v13 = vpop.f32.mrf.mxu1 }
 0x434   : > { %v3208_v56 = vadd.f32 %v3207_v59, %v6219_v25  ;;  %v3042_v45 = vadd.f32 %v3041_v13, %v6208_v33 }
 0x436   : > { %3735 = vst [vmem:[%s5413_s12 + $0x4e8] sm:$0xff] %v3208_v56  ;;  %v3558_v40 = vpop.f32.mrf.mxu0 }
 0x437   : > { %3738 = vst [vmem:[%s5413_s12 + $0x520] sm:$0xff] %v3042_v45  ;;  %v3559_v26 = vadd.f32 %v3558_v40, %v6210_v58  ;;  %v3389_v2 = vpop.f32.mrf.mxu3 }
 0x438   : > { %v3390_v20 = vadd.f32 %v3389_v2, %v6221_v12 }
 0x439   : > { %3757 = vst [vmem:[%s5413_s12 + $0x638] sm:$0xff] %v3559_v26 }
 0x43a   : > { %3756 = vst [vmem:[%s5413_s12 + $0x630] sm:$0xff] %v3390_v20 }
 0x43b   : > { %v3210_v8 = vpop.f32.mrf.mxu2  ;;  %v3043_v46 = vpop.f32.mrf.mxu1 }
 0x43c   : > { %v3211_v3 = vadd.f32 %v3210_v8, %v6219_v25  ;;  %v3044_v24 = vadd.f32 %v3043_v46, %v6208_v33 }
 0x43e   : > { %3739 = vst [vmem:[%s5413_s12 + $0x528] sm:$0xff] %v3211_v3  ;;  %v3560_v62 = vpop.f32.mrf.mxu0 }
 0x43f   : > { %3742 = vst [vmem:[%s5413_s12 + $0x560] sm:$0xff] %v3044_v24  ;;  %v3561_v30 = vadd.f32 %v3560_v62, %v6210_v58  ;;  %v3391_v32 = vpop.f32.mrf.mxu3 }
 0x440   : > { %v3392_v59 = vadd.f32 %v3391_v32, %v6221_v12 }
 0x441   : > { %3761 = vst [vmem:[%s5413_s12 + $0x678] sm:$0xff] %v3561_v30 }
 0x442   : > { %3095 = vmatmul.bf16.gmra.mxu1 %v5702_v19  ;;  %3264 = vmatmul.bf16.gmra.mxu2 %v5702_v19  ;;  %3760 = vst [vmem:[%s5413_s12 + $0x670] sm:$0xff] %v3392_v59 }
 0x443   : > { %3433 = vmatmul.bf16.gmra.mxu3 %v5702_v19  ;;  %3602 = vmatmul.bf16.gmra.mxu0 %v5702_v19  ;;  %v3212_v39 = vpop.f32.mrf.mxu2  ;;  %v3046_v19 = vpop.f32.mrf.mxu1 }
 0x444   : > { %v3213_v44 = vadd.f32 %v3212_v39, %v6219_v25  ;;  %v3047_v21 = vadd.f32 %v3046_v19, %v6208_v33 }
 0x446   : > { %3743 = vst [vmem:[%s5413_s12 + $0x568] sm:$0xff] %v3213_v44  ;;  %v3563_v29 = vpop.f32.mrf.mxu0 }
 0x447   : > { %3746 = vst [vmem:[%s5413_s12 + $0x5a0] sm:$0xff] %v3047_v21  ;;  %v3564_v27 = vadd.f32 %v3563_v29, %v6210_v58  ;;  %v3394_v18 = vpop.f32.mrf.mxu3 }
 0x448   : > { %v3395_v10 = vadd.f32 %v3394_v18, %v6221_v12 }
 0x449   : > { %3765 = vst [vmem:[%s5413_s12 + $0x6b8] sm:$0xff] %v3564_v27 }
 0x44a   : > { %3764 = vst [vmem:[%s5413_s12 + $0x6b0] sm:$0xff] %v3395_v10 }
 0x44b   : > { %v3215_v51 = vpop.f32.mrf.mxu2  ;;  %v3048_v11 = vpop.f32.mrf.mxu1 }
 0x44c   : > { %v3216_v6 = vadd.f32 %v3215_v51, %v6219_v25  ;;  %v3049_v1 = vadd.f32 %v3048_v11, %v6208_v33 }
 0x44e   : > { %3747 = vst [vmem:[%s5413_s12 + $0x5a8] sm:$0xff] %v3216_v6  ;;  %v3565_v63 = vpop.f32.mrf.mxu0 }
 0x44f   : > { %3750 = vst [vmem:[%s5413_s12 + $0x5e0] sm:$0xff] %v3049_v1  ;;  %v3566_v35 = vadd.f32 %v3565_v63, %v6210_v58  ;;  %v3396_v28 = vpop.f32.mrf.mxu3 }
 0x450   : > { %v3397_v31 = vadd.f32 %v3396_v28, %v6221_v12 }
 0x451   : > { %3769 = vst [vmem:[%s5413_s12 + $0x6f8] sm:$0xff] %v3566_v35 }
 0x452   : > { %3100 = vmatmul.bf16.gmra.mxu1 %v5729_v61  ;;  %3269 = vmatmul.bf16.gmra.mxu2 %v5729_v61  ;;  %3768 = vst [vmem:[%s5413_s12 + $0x6f0] sm:$0xff] %v3397_v31 }
 0x453   : > { %3438 = vmatmul.bf16.gmra.mxu3 %v5729_v61  ;;  %3607 = vmatmul.bf16.gmra.mxu0 %v5729_v61  ;;  %v3217_v17 = vpop.f32.mrf.mxu2  ;;  %v3051_v61 = vpop.f32.mrf.mxu1 }
 0x454   : > { %v3218_v41 = vadd.f32 %v3217_v17, %v6219_v25  ;;  %v3052_v15 = vadd.f32 %v3051_v61, %v6208_v33 }
 0x456   : > { %3751 = vst [vmem:[%s5413_s12 + $0x5e8] sm:$0xff] %v3218_v41  ;;  %v3568_v39 = vpop.f32.mrf.mxu0 }
 0x457   : > { %3754 = vst [vmem:[%s5413_s12 + $0x620] sm:$0xff] %v3052_v15  ;;  %v3569_v44 = vadd.f32 %v3568_v39, %v6210_v58  ;;  %v3399_v19 = vpop.f32.mrf.mxu3 }
 0x458   : > { %v3400_v21 = vadd.f32 %v3399_v19, %v6221_v12 }
 0x459   : > { %3773 = vst [vmem:[%s5413_s12 + $0x738] sm:$0xff] %v3569_v44 }
 0x45a   : > { %3772 = vst [vmem:[%s5413_s12 + $0x730] sm:$0xff] %v3400_v21 }
 0x45b   : > { %v3220_v54 = vpop.f32.mrf.mxu2  ;;  %v3053_v7 = vpop.f32.mrf.mxu1 }
 0x45c   : > { %v3221_v5 = vadd.f32 %v3220_v54, %v6219_v25  ;;  %v3054_v16 = vadd.f32 %v3053_v7, %v6208_v33 }
 0x45e   : > { %3755 = vst [vmem:[%s5413_s12 + $0x628] sm:$0xff] %v3221_v5  ;;  %v3570_v51 = vpop.f32.mrf.mxu0 }
 0x45f   : > { %3758 = vst [vmem:[%s5413_s12 + $0x660] sm:$0xff] %v3054_v16  ;;  %v3571_v6 = vadd.f32 %v3570_v51, %v6210_v58  ;;  %v3401_v11 = vpop.f32.mrf.mxu3 }
 0x460   : > { %v3402_v1 = vadd.f32 %v3401_v11, %v6221_v12 }
 0x461   : > { %3777 = vst [vmem:[%s5413_s12 + $0x778] sm:$0xff] %v3571_v6 }
 0x462   : > { %3105 = vmatmul.bf16.gmra.mxu1 %v5756_v9  ;;  %3274 = vmatmul.bf16.gmra.mxu2 %v5756_v9  ;;  %3776 = vst [vmem:[%s5413_s12 + $0x770] sm:$0xff] %v3402_v1 }
 0x463   : > { %3443 = vmatmul.bf16.gmra.mxu3 %v5756_v9  ;;  %3612 = vmatmul.bf16.gmra.mxu0 %v5756_v9  ;;  %v3222_v43 = vpop.f32.mrf.mxu2  ;;  %v3056_v9 = vpop.f32.mrf.mxu1 }
 0x464   : > { %v3223_v22 = vadd.f32 %v3222_v43, %v6219_v25  ;;  %v3057_v56 = vadd.f32 %v3056_v9, %v6208_v33 }
 0x466   : > { %3759 = vst [vmem:[%s5413_s12 + $0x668] sm:$0xff] %v3223_v22  ;;  %v3573_v37 = vpop.f32.mrf.mxu0 }
 0x467   : > { %3762 = vst [vmem:[%s5413_s12 + $0x6a0] sm:$0xff] %v3057_v56  ;;  %v3574_v52 = vadd.f32 %v3573_v37, %v6210_v58  ;;  %v3404_v53 = vpop.f32.mrf.mxu3 }
 0x468   : > { %v3405_v40 = vadd.f32 %v3404_v53, %v6221_v12 }
 0x469   : > { %3781 = vst [vmem:[%s5413_s12 + $0x7b8] sm:$0xff] %v3574_v52 }
 0x46a   : > { %3780 = vst [vmem:[%s5413_s12 + $0x7b0] sm:$0xff] %v3405_v40 }
 0x46b   : > { %v3225_v13 = vpop.f32.mrf.mxu2  ;;  %v3058_v8 = vpop.f32.mrf.mxu1 }
 0x46c   : > { %v3226_v45 = vadd.f32 %v3225_v13, %v6219_v25  ;;  %v3059_v3 = vadd.f32 %v3058_v8, %v6208_v33 }
 0x46e   : > { %3763 = vst [vmem:[%s5413_s12 + $0x6a8] sm:$0xff] %v3226_v45  ;;  %v3575_v26 = vpop.f32.mrf.mxu0 }
 0x46f   : > { %3766 = vst [vmem:[%s5413_s12 + $0x6e0] sm:$0xff] %v3059_v3  ;;  %v3576_v2 = vadd.f32 %v3575_v26, %v6210_v58  ;;  %v3406_v20 = vpop.f32.mrf.mxu3 }
 0x470   : > { %v3407_v62 = vadd.f32 %v3406_v20, %v6221_v12 }
 0x471   : > { %3785 = vst [vmem:[%s5413_s12 + $0x7f8] sm:$0xff] %v3576_v2 }
 0x472   : > { %3110 = vmatmul.bf16.gmra.mxu1 %v5785_v38  ;;  %3279 = vmatmul.bf16.gmra.mxu2 %v5785_v38  ;;  %3784 = vst [vmem:[%s5413_s12 + $0x7f0] sm:$0xff] %v3407_v62 }
 0x473   : > { %3448 = vmatmul.bf16.gmra.mxu3 %v5785_v38  ;;  %3617 = vmatmul.bf16.gmra.mxu0 %v5785_v38  ;;  %v3227_v46 = vpop.f32.mrf.mxu2  ;;  %v3061_v38 = vpop.f32.mrf.mxu1 }
 0x474   : > { %v3228_v24 = vadd.f32 %v3227_v46, %v6219_v25  ;;  %v3062_v36 = vadd.f32 %v3061_v38, %v6208_v33 }
 0x476   : > { %3767 = vst [vmem:[%s5413_s12 + $0x6e8] sm:$0xff] %v3228_v24  ;;  %v3578_v16 = vpop.f32.mrf.mxu0 }
 0x477   : > { %3770 = vst [vmem:[%s5413_s12 + $0x720] sm:$0xff] %v3062_v36  ;;  %v3579_v43 = vadd.f32 %v3578_v16, %v6210_v58  ;;  %v3409_v22 = vpop.f32.mrf.mxu3 }
 0x478   : > { %v3410_v9 = vadd.f32 %v3409_v22, %v6221_v12 }
 0x479   : > { %3789 = vst [vmem:[%s5413_s12 + $0x838] sm:$0xff] %v3579_v43 }
 0x47a   : > { %3788 = vst [vmem:[%s5413_s12 + $0x830] sm:$0xff] %v3410_v9 }
 0x47b   : > { %v3230_v4 = vpop.f32.mrf.mxu2  ;;  %v3063_v48 = vpop.f32.mrf.mxu1 }
 0x47c   : > { %v3231_v50 = vadd.f32 %v3230_v4, %v6219_v25  ;;  %v3064_v60 = vadd.f32 %v3063_v48, %v6208_v33 }
 0x47e   : > { %3771 = vst [vmem:[%s5413_s12 + $0x728] sm:$0xff] %v3231_v50  ;;  %v3580_v56 = vpop.f32.mrf.mxu0 }
 0x47f   : > { %3774 = vst [vmem:[%s5413_s12 + $0x760] sm:$0xff] %v3064_v60  ;;  %v3581_v13 = vadd.f32 %v3580_v56, %v6210_v58  ;;  %v3411_v45 = vpop.f32.mrf.mxu3 }
 0x480   : > { %v3412_v8 = vadd.f32 %v3411_v45, %v6221_v12 }
 0x481   : > { %3793 = vst [vmem:[%s5413_s12 + $0x878] sm:$0xff] %v3581_v13 }
 0x482   : > { %3115 = vmatmul.bf16.gmra.mxu1 %v5817_v47  ;;  %3284 = vmatmul.bf16.gmra.mxu2 %v5817_v47  ;;  %3792 = vst [vmem:[%s5413_s12 + $0x870] sm:$0xff] %v3412_v8 }
 0x483   : > { %3453 = vmatmul.bf16.gmra.mxu3 %v5817_v47  ;;  %3622 = vmatmul.bf16.gmra.mxu0 %v5817_v47  ;;  %v3232_v49 = vpop.f32.mrf.mxu2  ;;  %v3066_v47 = vpop.f32.mrf.mxu1 }
 0x484   : > { %v3233_v34 = vadd.f32 %v3232_v49, %v6219_v25  ;;  %v3067_v17 = vadd.f32 %v3066_v47, %v6208_v33 }
 0x486   : > { %3775 = vst [vmem:[%s5413_s12 + $0x768] sm:$0xff] %v3233_v34  ;;  %v3583_v63 = vpop.f32.mrf.mxu0 }
 0x487   : > { %3778 = vst [vmem:[%s5413_s12 + $0x7a0] sm:$0xff] %v3067_v17  ;;  %v3584_v35 = vadd.f32 %v3583_v63, %v6210_v58  ;;  %v3414_v28 = vpop.f32.mrf.mxu3 }
 0x488   : > { %v3415_v31 = vadd.f32 %v3414_v28, %v6221_v12 }
 0x489   : > { %3797 = vst [vmem:[%s5413_s12 + $0x8b8] sm:$0xff] %v3584_v35 }
 0x48a   : > { %3796 = vst [vmem:[%s5413_s12 + $0x8b0] sm:$0xff] %v3415_v31 }
 0x48b   : > { %v3235_v41 = vpop.f32.mrf.mxu2  ;;  %v3068_v15 = vpop.f32.mrf.mxu1 }
 0x48c   : > { %v3236_v61 = vadd.f32 %v3235_v41, %v6219_v25  ;;  %v3069_v54 = vadd.f32 %v3068_v15, %v6208_v33 }
 0x48e   : > { %3779 = vst [vmem:[%s5413_s12 + $0x7a8] sm:$0xff] %v3236_v61  ;;  %v3585_v39 = vpop.f32.mrf.mxu0 }
 0x48f   : > { %3782 = vst [vmem:[%s5413_s12 + $0x7e0] sm:$0xff] %v3069_v54  ;;  %v3586_v44 = vadd.f32 %v3585_v39, %v6210_v58  ;;  %v3416_v19 = vpop.f32.mrf.mxu3 }
 0x490   : > { %v3417_v21 = vadd.f32 %v3416_v19, %v6221_v12 }
 0x491   : > { %3801 = vst [vmem:[%s5413_s12 + $0x8f8] sm:$0xff] %v3586_v44 }
 0x492   : > { %3120 = vmatmul.bf16.gmra.mxu1 %v5844_v42  ;;  %3289 = vmatmul.bf16.gmra.mxu2 %v5844_v42  ;;  %3800 = vst [vmem:[%s5413_s12 + $0x8f0] sm:$0xff] %v3417_v21 }
 0x493   : > { %3458 = vmatmul.bf16.gmra.mxu3 %v5844_v42  ;;  %3627 = vmatmul.bf16.gmra.mxu0 %v5844_v42  ;;  %v3237_v5 = vpop.f32.mrf.mxu2  ;;  %v3071_v42 = vpop.f32.mrf.mxu1 }
 0x494   : > { %v3238_v7 = vadd.f32 %v3237_v5, %v6219_v25  ;;  %v3072_v30 = vadd.f32 %v3071_v42, %v6208_v33 }
 0x496   : > { %3783 = vst [vmem:[%s5413_s12 + $0x7e8] sm:$0xff] %v3238_v7  ;;  %v3588_v48 = vpop.f32.mrf.mxu0 }
 0x497   : > { %3786 = vst [vmem:[%s5413_s12 + $0x820] sm:$0xff] %v3072_v30  ;;  %v3589_v60 = vadd.f32 %v3588_v48, %v6210_v58  ;;  %v3419_v49 = vpop.f32.mrf.mxu3 }
 0x498   : > { %v3420_v34 = vadd.f32 %v3419_v49, %v6221_v12 }
 0x499   : > { %3805 = vst [vmem:[%s5413_s12 + $0x938] sm:$0xff] %v3589_v60 }
 0x49a   : > { %3804 = vst [vmem:[%s5413_s12 + $0x930] sm:$0xff] %v3420_v34 }
 0x49b   : > { %v3240_v32 = vpop.f32.mrf.mxu2  ;;  %v3073_v29 = vpop.f32.mrf.mxu1 }
 0x49c   : > { %v3241_v59 = vadd.f32 %v3240_v32, %v6219_v25  ;;  %v3074_v27 = vadd.f32 %v3073_v29, %v6208_v33 }
 0x49e   : > { %3787 = vst [vmem:[%s5413_s12 + $0x828] sm:$0xff] %v3241_v59  ;;  %v3590_v47 = vpop.f32.mrf.mxu0 }
 0x49f   : > { %3790 = vst [vmem:[%s5413_s12 + $0x860] sm:$0xff] %v3074_v27  ;;  %v3591_v17 = vadd.f32 %v3590_v47, %v6210_v58  ;;  %v3421_v41 = vpop.f32.mrf.mxu3 }
 0x4a0   : > { %v3422_v61 = vadd.f32 %v3421_v41, %v6221_v12 }
 0x4a1   : > { %3809 = vst [vmem:[%s5413_s12 + $0x978] sm:$0xff] %v3591_v17 }
 0x4a2   : > { %3125 = vmatmul.bf16.gmra.mxu1 %v5871_v23  ;;  %3294 = vmatmul.bf16.gmra.mxu2 %v5871_v23  ;;  %3808 = vst [vmem:[%s5413_s12 + $0x970] sm:$0xff] %v3422_v61 }
 0x4a3   : > { %3463 = vmatmul.bf16.gmra.mxu3 %v5871_v23  ;;  %3632 = vmatmul.bf16.gmra.mxu0 %v5871_v23  ;;  %v3242_v18 = vpop.f32.mrf.mxu2  ;;  %v3076_v23 = vpop.f32.mrf.mxu1 }
 0x4a4   : > { %v3243_v10 = vadd.f32 %v3242_v18, %v6219_v25  ;;  %v3077_v3 = vadd.f32 %v3076_v23, %v6208_v33 }
 0x4a6   : > { %3791 = vst [vmem:[%s5413_s12 + $0x868] sm:$0xff] %v3243_v10  ;;  %v3593_v40 = vpop.f32.mrf.mxu0 }
 0x4a7   : > { %3794 = vst [vmem:[%s5413_s12 + $0x8a0] sm:$0xff] %v3077_v3  ;;  %v3594_v26 = vadd.f32 %v3593_v40, %v6210_v58  ;;  %v3424_v2 = vpop.f32.mrf.mxu3 }
 0x4a8   : > { %v3425_v20 = vadd.f32 %v3424_v2, %v6221_v12 }
 0x4a9   : > { %3813 = vst [vmem:[%s5413_s12 + $0x9b8] sm:$0xff] %v3594_v26 }
 0x4aa   : > { %3812 = vst [vmem:[%s5413_s12 + $0x9b0] sm:$0xff] %v3425_v20 }
 0x4ab   : > { %v3245_v46 = vpop.f32.mrf.mxu2  ;;  %v3078_v38 = vpop.f32.mrf.mxu1 }
 0x4ac   : > { %v3246_v24 = vadd.f32 %v3245_v46, %v6219_v25  ;;  %v3079_v36 = vadd.f32 %v3078_v38, %v6208_v33 }
 0x4ae   : > { %3795 = vst [vmem:[%s5413_s12 + $0x8a8] sm:$0xff] %v3246_v24  ;;  %v3595_v62 = vpop.f32.mrf.mxu0 }
 0x4af   : > { %3798 = vst [vmem:[%s5413_s12 + $0x8e0] sm:$0xff] %v3079_v36  ;;  %v3596_v16 = vadd.f32 %v3595_v62, %v6210_v58  ;;  %v3426_v43 = vpop.f32.mrf.mxu3 }
 0x4b0   : > { %v3427_v22 = vadd.f32 %v3426_v43, %v6221_v12 }
 0x4b1   : > { %3817 = vst [vmem:[%s5413_s12 + $0x9f8] sm:$0xff] %v3596_v16 }
 0x4b2   : > { %3130 = vmatmul.bf16.gmra.mxu1 %v5898_v14  ;;  %3299 = vmatmul.bf16.gmra.mxu2 %v5898_v14  ;;  %3816 = vst [vmem:[%s5413_s12 + $0x9f0] sm:$0xff] %v3427_v22 }
 0x4b3   : > { %3468 = vmatmul.bf16.gmra.mxu3 %v5898_v14  ;;  %3637 = vmatmul.bf16.gmra.mxu0 %v5898_v14  ;;  %v3247_v4 = vpop.f32.mrf.mxu2  ;;  %v3081_v14 = vpop.f32.mrf.mxu1 }
 0x4b4   : > { %v3248_v50 = vadd.f32 %v3247_v4, %v6219_v25  ;;  %v3082_v51 = vadd.f32 %v3081_v14, %v6208_v33 }
 0x4b6   : > { %3799 = vst [vmem:[%s5413_s12 + $0x8e8] sm:$0xff] %v3248_v50  ;;  %v3598_v59 = vpop.f32.mrf.mxu0 }
 0x4b7   : > { %3802 = vst [vmem:[%s5413_s12 + $0x920] sm:$0xff] %v3082_v51  ;;  %v3599_v29 = vadd.f32 %v3598_v59, %v6210_v58  ;;  %v3429_v27 = vpop.f32.mrf.mxu3 }
 0x4b8   : > { %v3430_v18 = vadd.f32 %v3429_v27, %v6221_v12 }
 0x4b9   : > { %3821 = vst [vmem:[%s5413_s12 + $0xa38] sm:$0xff] %v3599_v29 }
 0x4ba   : > { %3820 = vst [vmem:[%s5413_s12 + $0xa30] sm:$0xff] %v3430_v18 }
 0x4bb   : > { %v3250_v6 = vpop.f32.mrf.mxu2  ;;  %v3083_v1 = vpop.f32.mrf.mxu1 }
 0x4bc   : > { %v3251_v11 = vadd.f32 %v3250_v6, %v6219_v25  ;;  %v3084_v37 = vadd.f32 %v3083_v1, %v6208_v33 }
 0x4be   : > { %3803 = vst [vmem:[%s5413_s12 + $0x928] sm:$0xff] %v3251_v11  ;;  %v3600_v10 = vpop.f32.mrf.mxu0 }
 0x4bf   : > { %3806 = vst [vmem:[%s5413_s12 + $0x960] sm:$0xff] %v3084_v37  ;;  %v3601_v23 = vadd.f32 %v3600_v10, %v6210_v58  ;;  %v3431_v3 = vpop.f32.mrf.mxu3 }
 0x4c1   : > { %3825 = vst [vmem:[%s5413_s12 + $0xa78] sm:$0xff] %v3601_v23 }
 0x4c2   : > { %3135 = vmatmul.bf16.gmra.mxu1 %v5922_v0  ;;  %3304 = vmatmul.bf16.gmra.mxu2 %v5922_v0 }
 0x4c3   : > { %3473 = vmatmul.bf16.gmra.mxu3 %v5922_v0  ;;  %3642 = vmatmul.bf16.gmra.mxu0 %v5922_v0  ;;  %v3252_v52 = vpop.f32.mrf.mxu2  ;;  %v3086_v0 = vpop.f32.mrf.mxu1 }
 0x4c4   : > { %v3253_v53 = vadd.f32 %v3252_v52, %v6219_v25  ;;  %v3087_v15 = vadd.f32 %v3086_v0, %v6208_v33 }
 0x4c6   : > { %3807 = vst [vmem:[%s5413_s12 + $0x968] sm:$0xff] %v3253_v53  ;;  %v3603_v28 = vpop.f32.mrf.mxu0 }
 0x4c7   : > { %3810 = vst [vmem:[%s5413_s12 + $0x9a0] sm:$0xff] %v3087_v15  ;;  %v3604_v31 = vadd.f32 %v3603_v28, %v6210_v58  ;;  %v3434_v39 = vpop.f32.mrf.mxu3 }
 0x4c8   : > { %v3435_v44 = vadd.f32 %v3434_v39, %v6221_v12 }
 0x4c9   : > { %3829 = vst [vmem:[%s5413_s12 + $0xab8] sm:$0xff] %v3604_v31 }
 0x4ca   : > { %3828 = vst [vmem:[%s5413_s12 + $0xab0] sm:$0xff] %v3435_v44 }
 0x4cb   : > { %v3255_v54 = vpop.f32.mrf.mxu2  ;;  %v3088_v7 = vpop.f32.mrf.mxu1 }
 0x4cc   : > { %v3256_v5 = vadd.f32 %v3255_v54, %v6219_v25  ;;  %v3089_v42 = vadd.f32 %v3088_v7, %v6208_v33 }
 0x4ce   : > { %3811 = vst [vmem:[%s5413_s12 + $0x9a8] sm:$0xff] %v3256_v5  ;;  %v3605_v19 = vpop.f32.mrf.mxu0 }
 0x4cf   : > { %3814 = vst [vmem:[%s5413_s12 + $0x9e0] sm:$0xff] %v3089_v42  ;;  %v3606_v21 = vadd.f32 %v3605_v19, %v6210_v58  ;;  %v3436_v48 = vpop.f32.mrf.mxu3 }
 0x4d0   : > { %v3437_v60 = vadd.f32 %v3436_v48, %v6221_v12 }
 0x4d1   : > { %3833 = vst [vmem:[%s5413_s12 + $0xaf8] sm:$0xff] %v3606_v21 }
 0x4d2   : > { %3140 = vmatmul.bf16.gmra.mxu1 %v5946_v57  ;;  %3309 = vmatmul.bf16.gmra.mxu2 %v5946_v57  ;;  %3832 = vst [vmem:[%s5413_s12 + $0xaf0] sm:$0xff] %v3437_v60 }
 0x4d3   : > { %3478 = vmatmul.bf16.gmra.mxu3 %v5946_v57  ;;  %3647 = vmatmul.bf16.gmra.mxu0 %v5946_v57  ;;  %v3257_v30 = vpop.f32.mrf.mxu2  ;;  %v3091_v57 = vpop.f32.mrf.mxu1 }
 0x4d4   : > { %v3258_v32 = vadd.f32 %v3257_v30, %v6219_v25  ;;  %v3092_v9 = vadd.f32 %v3091_v57, %v6208_v33 }
 0x4d6   : > { %3815 = vst [vmem:[%s5413_s12 + $0x9e8] sm:$0xff] %v3258_v32  ;;  %v3608_v49 = vpop.f32.mrf.mxu0 }
 0x4d7   : > { %3818 = vst [vmem:[%s5413_s12 + $0xa20] sm:$0xff] %v3092_v9  ;;  %v3609_v34 = vadd.f32 %v3608_v49, %v6210_v58  ;;  %v3439_v47 = vpop.f32.mrf.mxu3 }
 0x4d8   : > { %v3440_v17 = vadd.f32 %v3439_v47, %v6221_v12 }
 0x4d9   : > { %3837 = vst [vmem:[%s5413_s12 + $0xb38] sm:$0xff] %v3609_v34 }
 0x4da   : > { %3836 = vst [vmem:[%s5413_s12 + $0xb30] sm:$0xff] %v3440_v17 }
 0x4db   : > { %v3260_v56 = vpop.f32.mrf.mxu2  ;;  %v3093_v45 = vpop.f32.mrf.mxu1 }
 0x4dc   : > { %v3261_v13 = vadd.f32 %v3260_v56, %v6219_v25  ;;  %v3094_v8 = vadd.f32 %v3093_v45, %v6208_v33 }
 0x4de   : > { %3819 = vst [vmem:[%s5413_s12 + $0xa28] sm:$0xff] %v3261_v13  ;;  %v3610_v41 = vpop.f32.mrf.mxu0 }
 0x4df   : > { %3822 = vst [vmem:[%s5413_s12 + $0xa60] sm:$0xff] %v3094_v8  ;;  %v3611_v61 = vadd.f32 %v3610_v41, %v6210_v58  ;;  %v3441_v40 = vpop.f32.mrf.mxu3 }
 0x4e0   : > { %v3442_v26 = vadd.f32 %v3441_v40, %v6221_v12 }
 0x4e1   : > { %3841 = vst [vmem:[%s5413_s12 + $0xb78] sm:$0xff] %v3611_v61 }
 0x4e2   : > { %3145 = vmatmul.bf16.gmra.mxu1 %v5968_v55  ;;  %3314 = vmatmul.bf16.gmra.mxu2 %v5968_v55  ;;  %3840 = vst [vmem:[%s5413_s12 + $0xb70] sm:$0xff] %v3442_v26 }
 0x4e3   : > { %3483 = vmatmul.bf16.gmra.mxu3 %v5968_v55  ;;  %3652 = vmatmul.bf16.gmra.mxu0 %v5968_v55  ;;  %v3262_v63 = vpop.f32.mrf.mxu2  ;;  %v3432_v55 = vadd.f32 %v3431_v3, %v6221_v12  ;;  %v3096_v46 = vpop.f32.mrf.mxu1 }
 0x4e4   : > { %v3263_v35 = vadd.f32 %v3262_v63, %v6219_v25  ;;  %v3097_v24 = vadd.f32 %v3096_v46, %v6208_v33 }
 0x4e5   : > { %3824 = vst [vmem:[%s5413_s12 + $0xa70] sm:$0xff] %v3432_v55 }
 0x4e6   : > { %3823 = vst [vmem:[%s5413_s12 + $0xa68] sm:$0xff] %v3263_v35  ;;  %v3613_v2 = vpop.f32.mrf.mxu0 }
 0x4e7   : > { %3826 = vst [vmem:[%s5413_s12 + $0xaa0] sm:$0xff] %v3097_v24  ;;  %v3614_v20 = vadd.f32 %v3613_v2, %v6210_v58  ;;  %v3444_v62 = vpop.f32.mrf.mxu3 }
 0x4e8   : > { %v3445_v16 = vadd.f32 %v3444_v62, %v6221_v12 }
 0x4e9   : > { %3845 = vst [vmem:[%s5413_s12 + $0xbb8] sm:$0xff] %v3614_v20 }
 0x4ea   : > { %3844 = vst [vmem:[%s5413_s12 + $0xbb0] sm:$0xff] %v3445_v16 }
 0x4eb   : > { %v3265_v38 = vpop.f32.mrf.mxu2  ;;  %v3098_v4 = vpop.f32.mrf.mxu1 }
 0x4ec   : > { %v3266_v36 = vadd.f32 %v3265_v38, %v6219_v25  ;;  %v3099_v50 = vadd.f32 %v3098_v4, %v6208_v33 }
 0x4ee   : > { %3827 = vst [vmem:[%s5413_s12 + $0xaa8] sm:$0xff] %v3266_v36  ;;  %v3615_v43 = vpop.f32.mrf.mxu0 }
 0x4ef   : > { %3830 = vst [vmem:[%s5413_s12 + $0xae0] sm:$0xff] %v3099_v50  ;;  %v3616_v22 = vadd.f32 %v3615_v43, %v6210_v58  ;;  %v3446_v59 = vpop.f32.mrf.mxu3 }
 0x4f0   : > { %v3447_v29 = vadd.f32 %v3446_v59, %v6221_v12 }
 0x4f1   : > { %3849 = vst [vmem:[%s5413_s12 + $0xbf8] sm:$0xff] %v3616_v22 }
 0x4f2   : > { %3848 = vst [vmem:[%s5413_s12 + $0xbf0] sm:$0xff] %v3447_v29 }
 0x4f3   : > { %v3267_v14 = vpop.f32.mrf.mxu2  ;;  %v3101_v6 = vpop.f32.mrf.mxu1 }
 0x4f4   : > { %v3268_v51 = vadd.f32 %v3267_v14, %v6219_v25  ;;  %v3102_v11 = vadd.f32 %v3101_v6, %v6208_v33 }
 0x4f6   : > { %3831 = vst [vmem:[%s5413_s12 + $0xae8] sm:$0xff] %v3268_v51  ;;  %v3618_v27 = vpop.f32.mrf.mxu0 }
 0x4f7   : > { %3834 = vst [vmem:[%s5413_s12 + $0xb20] sm:$0xff] %v3102_v11  ;;  %v3619_v18 = vadd.f32 %v3618_v27, %v6210_v58  ;;  %v3449_v10 = vpop.f32.mrf.mxu3 }
 0x4f8   : > { %v3450_v23 = vadd.f32 %v3449_v10, %v6221_v12 }
 0x4f9   : > { %3853 = vst [vmem:[%s5413_s12 + $0xc38] sm:$0xff] %v3619_v18 }
 0x4fa   : > { %3852 = vst [vmem:[%s5413_s12 + $0xc30] sm:$0xff] %v3450_v23 }
 0x4fb   : > { %v3270_v1 = vpop.f32.mrf.mxu2  ;;  %v3103_v52 = vpop.f32.mrf.mxu1 }
 0x4fc   : > { %v3271_v37 = vadd.f32 %v3270_v1, %v6219_v25  ;;  %v3104_v53 = vadd.f32 %v3103_v52, %v6208_v33 }
 0x4fe   : > { %3835 = vst [vmem:[%s5413_s12 + $0xb28] sm:$0xff] %v3271_v37  ;;  %v3620_v3 = vpop.f32.mrf.mxu0 }
 0x4ff   : > { %3838 = vst [vmem:[%s5413_s12 + $0xb60] sm:$0xff] %v3104_v53  ;;  %v3621_v55 = vadd.f32 %v3620_v3, %v6210_v58  ;;  %v3451_v28 = vpop.f32.mrf.mxu3 }
 0x500   : > { %v3452_v31 = vadd.f32 %v3451_v28, %v6221_v12 }
 0x501   : > { %3857 = vst [vmem:[%s5413_s12 + $0xc78] sm:$0xff] %v3621_v55 }
 0x502   : > { %3856 = vst [vmem:[%s5413_s12 + $0xc70] sm:$0xff] %v3452_v31 }
 0x503   : > { %v3272_v0 = vpop.f32.mrf.mxu2  ;;  %v3106_v54 = vpop.f32.mrf.mxu1 }
 0x504   : > { %v3273_v15 = vadd.f32 %v3272_v0, %v6219_v25  ;;  %v3107_v5 = vadd.f32 %v3106_v54, %v6208_v33 }
 0x506   : > { %3839 = vst [vmem:[%s5413_s12 + $0xb68] sm:$0xff] %v3273_v15  ;;  %v3623_v39 = vpop.f32.mrf.mxu0 }
 0x507   : > { %3842 = vst [vmem:[%s5413_s12 + $0xba0] sm:$0xff] %v3107_v5  ;;  %v3624_v44 = vadd.f32 %v3623_v39, %v6210_v58  ;;  %v3454_v19 = vpop.f32.mrf.mxu3 }
 0x508   : > { %v3455_v21 = vadd.f32 %v3454_v19, %v6221_v12 }
 0x509   : > { %3861 = vst [vmem:[%s5413_s12 + $0xcb8] sm:$0xff] %v3624_v44 }
 0x50a   : > { %3860 = vst [vmem:[%s5413_s12 + $0xcb0] sm:$0xff] %v3455_v21 }
 0x50b   : > { %v3275_v7 = vpop.f32.mrf.mxu2  ;;  %v3108_v30 = vpop.f32.mrf.mxu1 }
 0x50c   : > { %v3276_v42 = vadd.f32 %v3275_v7, %v6219_v25  ;;  %v3109_v32 = vadd.f32 %v3108_v30, %v6208_v33 }
 0x50e   : > { %3843 = vst [vmem:[%s5413_s12 + $0xba8] sm:$0xff] %v3276_v42  ;;  %v3625_v48 = vpop.f32.mrf.mxu0 }
 0x50f   : > { %3846 = vst [vmem:[%s5413_s12 + $0xbe0] sm:$0xff] %v3109_v32  ;;  %v3626_v60 = vadd.f32 %v3625_v48, %v6210_v58  ;;  %v3456_v49 = vpop.f32.mrf.mxu3 }
 0x510   : > { %v3457_v34 = vadd.f32 %v3456_v49, %v6221_v12 }
 0x511   : > { %3865 = vst [vmem:[%s5413_s12 + $0xcf8] sm:$0xff] %v3626_v60 }
 0x512   : > { %3864 = vst [vmem:[%s5413_s12 + $0xcf0] sm:$0xff] %v3457_v34 }
 0x513   : > { %v3277_v57 = vpop.f32.mrf.mxu2  ;;  %v3111_v56 = vpop.f32.mrf.mxu1 }
 0x514   : > { %v3278_v9 = vadd.f32 %v3277_v57, %v6219_v25  ;;  %v3112_v13 = vadd.f32 %v3111_v56, %v6208_v33 }
 0x516   : > { %3847 = vst [vmem:[%s5413_s12 + $0xbe8] sm:$0xff] %v3278_v9  ;;  %v3628_v47 = vpop.f32.mrf.mxu0 }
 0x517   : > { %3850 = vst [vmem:[%s5413_s12 + $0xc20] sm:$0xff] %v3112_v13  ;;  %v3629_v17 = vadd.f32 %v3628_v47, %v6210_v58  ;;  %v3459_v41 = vpop.f32.mrf.mxu3 }
 0x518   : > { %v3460_v61 = vadd.f32 %v3459_v41, %v6221_v12 }
 0x519   : > { %3869 = vst [vmem:[%s5413_s12 + $0xd38] sm:$0xff] %v3629_v17 }
 0x51a   : > { %3868 = vst [vmem:[%s5413_s12 + $0xd30] sm:$0xff] %v3460_v61 }
 0x51b   : > { %v3280_v45 = vpop.f32.mrf.mxu2  ;;  %v3113_v63 = vpop.f32.mrf.mxu1 }
 0x51c   : > { %v3281_v8 = vadd.f32 %v3280_v45, %v6219_v25  ;;  %v3114_v35 = vadd.f32 %v3113_v63, %v6208_v33 }
 0x51e   : > { %3851 = vst [vmem:[%s5413_s12 + $0xc28] sm:$0xff] %v3281_v8  ;;  %v3630_v40 = vpop.f32.mrf.mxu0 }
 0x51f   : > { %3854 = vst [vmem:[%s5413_s12 + $0xc60] sm:$0xff] %v3114_v35  ;;  %v3631_v26 = vadd.f32 %v3630_v40, %v6210_v58  ;;  %v3461_v2 = vpop.f32.mrf.mxu3 }
 0x520   : > { %v3462_v20 = vadd.f32 %v3461_v2, %v6221_v12 }
 0x521   : > { %3873 = vst [vmem:[%s5413_s12 + $0xd78] sm:$0xff] %v3631_v26 }
 0x522   : > { %3872 = vst [vmem:[%s5413_s12 + $0xd70] sm:$0xff] %v3462_v20 }
 0x523   : > { %v3282_v46 = vpop.f32.mrf.mxu2  ;;  %v3116_v38 = vpop.f32.mrf.mxu1 }
 0x524   : > { %v3283_v24 = vadd.f32 %v3282_v46, %v6219_v25  ;;  %v3117_v36 = vadd.f32 %v3116_v38, %v6208_v33 }
 0x526   : > { %3855 = vst [vmem:[%s5413_s12 + $0xc68] sm:$0xff] %v3283_v24  ;;  %v3633_v62 = vpop.f32.mrf.mxu0 }
 0x527   : > { %3858 = vst [vmem:[%s5413_s12 + $0xca0] sm:$0xff] %v3117_v36  ;;  %v3634_v16 = vadd.f32 %v3633_v62, %v6210_v58  ;;  %v3464_v43 = vpop.f32.mrf.mxu3 }
 0x528   : > { %v3465_v22 = vadd.f32 %v3464_v43, %v6221_v12 }
 0x529   : > { %3877 = vst [vmem:[%s5413_s12 + $0xdb8] sm:$0xff] %v3634_v16 }
 0x52a   : > { %3876 = vst [vmem:[%s5413_s12 + $0xdb0] sm:$0xff] %v3465_v22 }
 0x52b   : > { %v3285_v4 = vpop.f32.mrf.mxu2  ;;  %v3118_v14 = vpop.f32.mrf.mxu1 }
 0x52c   : > { %v3286_v50 = vadd.f32 %v3285_v4, %v6219_v25  ;;  %v3119_v51 = vadd.f32 %v3118_v14, %v6208_v33 }
 0x52e   : > { %3859 = vst [vmem:[%s5413_s12 + $0xca8] sm:$0xff] %v3286_v50  ;;  %v3635_v59 = vpop.f32.mrf.mxu0 }
 0x52f   : > { %3862 = vst [vmem:[%s5413_s12 + $0xce0] sm:$0xff] %v3119_v51  ;;  %v3636_v29 = vadd.f32 %v3635_v59, %v6210_v58  ;;  %v3466_v27 = vpop.f32.mrf.mxu3 }
 0x530   : > { %v3467_v18 = vadd.f32 %v3466_v27, %v6221_v12 }
 0x531   : > { %3881 = vst [vmem:[%s5413_s12 + $0xdf8] sm:$0xff] %v3636_v29 }
 0x532   : > { %3880 = vst [vmem:[%s5413_s12 + $0xdf0] sm:$0xff] %v3467_v18 }
 0x533   : > { %v3287_v6 = vpop.f32.mrf.mxu2  ;;  %v3121_v1 = vpop.f32.mrf.mxu1 }
 0x534   : > { %v3288_v11 = vadd.f32 %v3287_v6, %v6219_v25  ;;  %v3122_v37 = vadd.f32 %v3121_v1, %v6208_v33 }
 0x536   : > { %3863 = vst [vmem:[%s5413_s12 + $0xce8] sm:$0xff] %v3288_v11  ;;  %v3638_v10 = vpop.f32.mrf.mxu0 }
 0x537   : > { %3866 = vst [vmem:[%s5413_s12 + $0xd20] sm:$0xff] %v3122_v37  ;;  %v3639_v23 = vadd.f32 %v3638_v10, %v6210_v58  ;;  %v3469_v3 = vpop.f32.mrf.mxu3 }
 0x538   : > { %v3470_v55 = vadd.f32 %v3469_v3, %v6221_v12 }
 0x539   : > { %3885 = vst [vmem:[%s5413_s12 + $0xe38] sm:$0xff] %v3639_v23 }
 0x53a   : > { %3884 = vst [vmem:[%s5413_s12 + $0xe30] sm:$0xff] %v3470_v55 }
 0x53b   : > { %v3290_v52 = vpop.f32.mrf.mxu2  ;;  %v3123_v0 = vpop.f32.mrf.mxu1 }
 0x53c   : > { %v3291_v53 = vadd.f32 %v3290_v52, %v6219_v25  ;;  %v3124_v15 = vadd.f32 %v3123_v0, %v6208_v33 }
 0x53e   : > { %3867 = vst [vmem:[%s5413_s12 + $0xd28] sm:$0xff] %v3291_v53  ;;  %v3640_v28 = vpop.f32.mrf.mxu0 }
 0x53f   : > { %3870 = vst [vmem:[%s5413_s12 + $0xd60] sm:$0xff] %v3124_v15  ;;  %v3641_v31 = vadd.f32 %v3640_v28, %v6210_v58  ;;  %v3471_v39 = vpop.f32.mrf.mxu3 }
 0x540   : > { %v3472_v44 = vadd.f32 %v3471_v39, %v6221_v12 }
 0x541   : > { %3889 = vst [vmem:[%s5413_s12 + $0xe78] sm:$0xff] %v3641_v31 }
 0x542   : > { %3888 = vst [vmem:[%s5413_s12 + $0xe70] sm:$0xff] %v3472_v44 }
 0x543   : > { %v3292_v54 = vpop.f32.mrf.mxu2  ;;  %v3126_v7 = vpop.f32.mrf.mxu1 }
 0x544   : > { %v3293_v5 = vadd.f32 %v3292_v54, %v6219_v25  ;;  %v3127_v42 = vadd.f32 %v3126_v7, %v6208_v33 }
 0x546   : > { %3871 = vst [vmem:[%s5413_s12 + $0xd68] sm:$0xff] %v3293_v5  ;;  %v3643_v19 = vpop.f32.mrf.mxu0 }
 0x547   : > { %3874 = vst [vmem:[%s5413_s12 + $0xda0] sm:$0xff] %v3127_v42  ;;  %v3644_v21 = vadd.f32 %v3643_v19, %v6210_v58  ;;  %v3474_v48 = vpop.f32.mrf.mxu3 }
 0x548   : > { %v3475_v60 = vadd.f32 %v3474_v48, %v6221_v12 }
 0x549   : > { %3893 = vst [vmem:[%s5413_s12 + $0xeb8] sm:$0xff] %v3644_v21 }
 0x54a   : > { %3892 = vst [vmem:[%s5413_s12 + $0xeb0] sm:$0xff] %v3475_v60 }
 0x54b   : > { %v3295_v30 = vpop.f32.mrf.mxu2  ;;  %v3128_v57 = vpop.f32.mrf.mxu1 }
 0x54c   : > { %v3296_v32 = vadd.f32 %v3295_v30, %v6219_v25  ;;  %v3129_v9 = vadd.f32 %v3128_v57, %v6208_v33 }
 0x54e   : > { %3875 = vst [vmem:[%s5413_s12 + $0xda8] sm:$0xff] %v3296_v32  ;;  %v3645_v49 = vpop.f32.mrf.mxu0 }
 0x54f   : > { %3878 = vst [vmem:[%s5413_s12 + $0xde0] sm:$0xff] %v3129_v9  ;;  %v3646_v34 = vadd.f32 %v3645_v49, %v6210_v58  ;;  %v3476_v47 = vpop.f32.mrf.mxu3 }
 0x550   : > { %v3477_v17 = vadd.f32 %v3476_v47, %v6221_v12 }
 0x551   : > { %3897 = vst [vmem:[%s5413_s12 + $0xef8] sm:$0xff] %v3646_v34 }
 0x552   : > { %3896 = vst [vmem:[%s5413_s12 + $0xef0] sm:$0xff] %v3477_v17 }
 0x553   : > { %v3297_v56 = vpop.f32.mrf.mxu2  ;;  %v3131_v45 = vpop.f32.mrf.mxu1 }
 0x554   : > { %v3298_v13 = vadd.f32 %v3297_v56, %v6219_v25  ;;  %v3132_v8 = vadd.f32 %v3131_v45, %v6208_v33 }
 0x556   : > { %3879 = vst [vmem:[%s5413_s12 + $0xde8] sm:$0xff] %v3298_v13  ;;  %v3648_v41 = vpop.f32.mrf.mxu0 }
 0x557   : > { %3882 = vst [vmem:[%s5413_s12 + $0xe20] sm:$0xff] %v3132_v8  ;;  %v3649_v61 = vadd.f32 %v3648_v41, %v6210_v58  ;;  %v3479_v40 = vpop.f32.mrf.mxu3 }
 0x558   : > { %v3480_v26 = vadd.f32 %v3479_v40, %v6221_v12 }
 0x559   : > { %3901 = vst [vmem:[%s5413_s12 + $0xf38] sm:$0xff] %v3649_v61 }
 0x55a   : > { %3900 = vst [vmem:[%s5413_s12 + $0xf30] sm:$0xff] %v3480_v26 }
 0x55b   : > { %v3300_v63 = vpop.f32.mrf.mxu2  ;;  %v3133_v46 = vpop.f32.mrf.mxu1 }
 0x55c   : > { %v3301_v35 = vadd.f32 %v3300_v63, %v6219_v25  ;;  %v3134_v24 = vadd.f32 %v3133_v46, %v6208_v33 }
 0x55e   : > { %3883 = vst [vmem:[%s5413_s12 + $0xe28] sm:$0xff] %v3301_v35  ;;  %v3650_v2 = vpop.f32.mrf.mxu0 }
 0x55f   : > { %3886 = vst [vmem:[%s5413_s12 + $0xe60] sm:$0xff] %v3134_v24  ;;  %v3651_v20 = vadd.f32 %v3650_v2, %v6210_v58  ;;  %v3481_v62 = vpop.f32.mrf.mxu3 }
 0x560   : > { %v3482_v16 = vadd.f32 %v3481_v62, %v6221_v12 }
 0x561   : > { %3905 = vst [vmem:[%s5413_s12 + $0xf78] sm:$0xff] %v3651_v20 }
 0x562   : > { %3904 = vst [vmem:[%s5413_s12 + $0xf70] sm:$0xff] %v3482_v16 }
 0x563   : > { %v3302_v38 = vpop.f32.mrf.mxu2  ;;  %v3136_v4 = vpop.f32.mrf.mxu1 }
 0x564   : > { %v3303_v36 = vadd.f32 %v3302_v38, %v6219_v25  ;;  %v3137_v50 = vadd.f32 %v3136_v4, %v6208_v33 }
 0x566   : > { %3887 = vst [vmem:[%s5413_s12 + $0xe68] sm:$0xff] %v3303_v36  ;;  %v3653_v43 = vpop.f32.mrf.mxu0 }
 0x567   : > { %3890 = vst [vmem:[%s5413_s12 + $0xea0] sm:$0xff] %v3137_v50  ;;  %v3654_v22 = vadd.f32 %v3653_v43, %v6210_v58  ;;  %v3484_v59 = vpop.f32.mrf.mxu3 }
 0x568   : > { %v3485_v29 = vadd.f32 %v3484_v59, %v6221_v12 }
 0x569   : > { %3909 = vst [vmem:[%s5413_s12 + $0xfb8] sm:$0xff] %v3654_v22 }
 0x56a   : > { %3908 = vst [vmem:[%s5413_s12 + $0xfb0] sm:$0xff] %v3485_v29 }
 0x56b   : > { %v3305_v14 = vpop.f32.mrf.mxu2  ;;  %v3138_v6 = vpop.f32.mrf.mxu1 }
 0x56c   : > { %v3306_v51 = vadd.f32 %v3305_v14, %v6219_v25  ;;  %v3139_v11 = vadd.f32 %v3138_v6, %v6208_v33 }
 0x56e   : > { %3891 = vst [vmem:[%s5413_s12 + $0xea8] sm:$0xff] %v3306_v51  ;;  %v3655_v27 = vpop.f32.mrf.mxu0 }
 0x56f   : > { %3894 = vst [vmem:[%s5413_s12 + $0xee0] sm:$0xff] %v3139_v11  ;;  %v3656_v18 = vadd.f32 %v3655_v27, %v6210_v58  ;;  %v3486_v10 = vpop.f32.mrf.mxu3 }
 0x570   : > { %v3487_v23 = vadd.f32 %v3486_v10, %v6221_v12 }
 0x571   : > { %3913 = vst [vmem:[%s5413_s12 + $0xff8] sm:$0xff] %v3656_v18 }
 0x572   : > { %3912 = vst [vmem:[%s5413_s12 + $0xff0] sm:$0xff] %v3487_v23 }
 0x573   : > { %v3307_v1 = vpop.f32.mrf.mxu2  ;;  %v3141_v52 = vpop.f32.mrf.mxu1 }
 0x574   : > { %v3308_v37 = vadd.f32 %v3307_v1, %v6219_v25  ;;  %v3142_v53 = vadd.f32 %v3141_v52, %v6208_v33 }
 0x576   : > { %3895 = vst [vmem:[%s5413_s12 + $0xee8] sm:$0xff] %v3308_v37 }
 0x577   : > { %3898 = vst [vmem:[%s5413_s12 + $0xf20] sm:$0xff] %v3142_v53 }
 0x57b   : > { %v3310_v0 = vpop.f32.mrf.mxu2  ;;  %v3143_v54 = vpop.f32.mrf.mxu1 }
 0x57c   : > { %v3311_v15 = vadd.f32 %v3310_v0, %v6219_v25  ;;  %v3144_v5 = vadd.f32 %v3143_v54, %v6208_v33 }
 0x57e   : > { %3899 = vst [vmem:[%s5413_s12 + $0xf28] sm:$0xff] %v3311_v15 }
 0x57f   : > { %3902 = vst [vmem:[%s5413_s12 + $0xf60] sm:$0xff] %v3144_v5 }
 0x583   : > { %v3312_v7 = vpop.f32.mrf.mxu2  ;;  %v3146_v30 = vpop.f32.mrf.mxu1 }
 0x584   : > { %v3313_v42 = vadd.f32 %v3312_v7, %v6219_v25  ;;  %v3147_v32 = vadd.f32 %v3146_v30, %v6208_v33 }
 0x586   : > { %3903 = vst [vmem:[%s5413_s12 + $0xf68] sm:$0xff] %v3313_v42 }
 0x587   : > { %3906 = vst [vmem:[%s5413_s12 + $0xfa0] sm:$0xff] %v3147_v32 }
 0x58b   : > { %v3315_v57 = vpop.f32.mrf.mxu2  ;;  %v3148_v56 = vpop.f32.mrf.mxu1 }
 0x58c   : > { %v3316_v9 = vadd.f32 %v3315_v57, %v6219_v25  ;;  %v3149_v13 = vadd.f32 %v3148_v56, %v6208_v33 }
 0x58e   : > { %3907 = vst [vmem:[%s5413_s12 + $0xfa8] sm:$0xff] %v3316_v9 }
 0x58f   : > { %3910 = vst [vmem:[%s5413_s12 + $0xfe0] sm:$0xff] %v3149_v13 }
 0x593   : > { %v3317_v45 = vpop.f32.mrf.mxu2 }
 0x594   : > { %v3318_v8 = vadd.f32 %v3317_v45, %v6219_v25 }
 0x596   : > { %3911 = vst [vmem:[%s5413_s12 + $0xfe8] sm:$0xff] %v3318_v8 }
 0x597   : > { %4896 = shalt.err (!%p4893_p4)
}
 0x598   : > { %s4969_s9 = smov 1024   ;;  %s4970_s30 = smov 64  }
 0x599   : > { %4497 = dma.vmem_to_hbm [thread:$0]  (%p5103_p2), %s3933_s24, 65536, %s3935_s17, %s3915_s28, %s4969_s9, %s4969_s9, %s4970_s30  }
 0x59a PF: > { %s3949_s11 = sand.u32 1, %s4939_s21   ;;  %p4517_p6 = pnand %p4088_p10, %p5053_p5 }
 0x59b   : > { %s3950_s12 = scalar_lea.sflag [#allocation4], %s3949_s11 }
 0x59c   : > { %p4518_p8 = pneg %p4517_p6 }
 0x59e   : > { %4934 = dma.done.wait (%p4518_p8), %s3950_s12, 65536  }
 0x59f   : > { %4936 = vsyncadd (%p4518_p8), %s3950_s12, 4294901760  ;;  %s24_s26 = sadd.s32 1, %s4959_s26   ;;  %s6878_s21 = smov %s4943_s22 }
 0x5a0   : > { %p21_p9 = scmp.ge.s32.totalorder %s24_s26, 4   ;;  %s6879_s22 = smov %s4947_s23 }
 0x5a1   : > { %s6880_s23 = smov %s5113_s15  ;;  %s6881_s24 = smov %s4955_s25 }
 0x5a2   : > { %s6882_s25 = smov %s6884_s8  ;;  %23 = sbr.rel (!%p21_p9) target bundleno = 12 (0xc), region = 110 }
 0x5a7   :  { %3956 = vsyncpa [#allocation3], 1 }
 0x5a8   :  { %3958 = vsyncpa [#allocation3 + $0x1], 1 }
 0x5a9   :  { %3959 = vsyncpa [#allocation6], 1 }
 0x5aa   :  { %3960 = vsyncpa [#allocation9], 1 }
 0x5ab   :  { %3961 = vsyncpa [#allocation4], 1 }
 0x5ac   :  { %3963 = vsyncpa [#allocation4 + $0x1], 1 }

</bundles_post_ra>
